<compile_context>
chip_gen: v7x
topology: tpu7x:2x2x1
jax: 0.10.0
libtpu: 0.0.40
codegen_flags: <defaults>
</compile_context>

<pallas_src>
import jax
import jax.numpy as jnp
from jax.experimental import pallas as pl
from jax.experimental.pallas import tpu as pltpu

FEAT_DIM = 512            # feat_dim
PROJ_DIM = 128            # proj_dim
ATTN_DIM = 128            # attention hidden
CLS_HID = FEAT_DIM // 2   # classifier hidden
LN_EPS = 1e-5             # torch.nn.LayerNorm default
_VMEM_LIMIT = 32 * 1024 * 1024  # conservative scoped-VMEM budget (v7x-safe)


def _round_up(v, m):
    return (v + m - 1) // m * m


def _full_spec(p):
    """Full-array block, same block for every grid step (weights / LN params)."""
    nd = p.ndim
    return pl.BlockSpec(p.shape, lambda *_: (0,) * nd)


def _ln(x, g, b):
    """LayerNorm over the last (lane) axis in f32."""
    mu = jnp.mean(x, axis=-1, keepdims=True)
    var = jnp.mean(jnp.square(x - mu), axis=-1, keepdims=True)
    return (x - mu) * jax.lax.rsqrt(var + LN_EPS) * g + b


# ---------------------------------------------------------------------------
# Kernel 1: fused patch stage over (B*N) row tiles.
#   in-kernel bf16 cast -> embed matmul (stand-in feature extractor) ->
#   feats written once -> packed [patch projector L1 | attention L1] ->
#   LN/ReLU/Tanh -> projector L2 + LN, attention L2 -> (feats, patch_proj,
#   pre-softmax scores).
# ---------------------------------------------------------------------------
def _patch_fused_kernel(x_ref, ew_ref, eb_ref,
                        w1a_ref, b1a_ref, g1_ref, be1_ref, ga_ref, bea_ref,
                        w2_ref, b2_ref, g2_ref, be2_ref, wa2t_ref, ba2_ref,
                        feat_ref, pp_ref, sc_ref):
    x = x_ref[...].astype(jnp.bfloat16)                         # cast in VMEM
    # TODO(synk): for very large K (real image patches) pipeline the K axis
    # inside this kernel (pltpu.emit_pipeline) instead of a full-K block.
    f = jnp.dot(x, ew_ref[...],
                preferred_element_type=jnp.float32) + eb_ref[...]
    f_bf = f.astype(jnp.bfloat16)
    feat_ref[...] = f_bf                                        # feats -> HBM once

    h_all = jnp.dot(f_bf, w1a_ref[...],
                    preferred_element_type=jnp.float32) + b1a_ref[...]
    h = jnp.maximum(_ln(h_all[:, :FEAT_DIM], g1_ref[...], be1_ref[...]), 0.0)
    a = jnp.tanh(_ln(h_all[:, FEAT_DIM:], ga_ref[...], bea_ref[...]))

    pp = jnp.dot(h.astype(jnp.bfloat16), w2_ref[...],
                 preferred_element_type=jnp.float32) + b2_ref[...]
    pp_ref[...] = _ln(pp, g2_ref[...], be2_ref[...])
    # (tm,1) score store is a masked vst; tiny (tm*4 B) and fusion-free.
    sc_ref[...] = jnp.sum(a * wa2t_ref[...], axis=-1, keepdims=True) + ba2_ref[...]


def patch_stage(xf, embed_w, embed_b, patch_params, *, tm_max=512):
    rows, k = xf.shape
    tm = min(tm_max, _round_up(rows, 8))
    rows_p = _round_up(rows, tm)
    if rows_p != rows:  # only pad the ragged remainder (usually a no-op)
        xf = jnp.pad(xf, ((0, rows_p - rows), (0, 0)))

    in_specs = [pl.BlockSpec((tm, k), lambda i: (i, 0)),
                _full_spec(embed_w), _full_spec(embed_b)]
    in_specs += [_full_spec(p) for p in patch_params]
    out_specs = [pl.BlockSpec((tm, FEAT_DIM), lambda i: (i, 0)),
                 pl.BlockSpec((tm, PROJ_DIM), lambda i: (i, 0)),
                 pl.BlockSpec((tm, 1), lambda i: (i, 0))]

    feats, pp, sc = pl.pallas_call(
        _patch_fused_kernel,
        out_shape=(jax.ShapeDtypeStruct((rows_p, FEAT_DIM), jnp.bfloat16),
                   jax.ShapeDtypeStruct((rows_p, PROJ_DIM), jnp.float32),
                   jax.ShapeDtypeStruct((rows_p, 1), jnp.float32)),
        grid_spec=pltpu.PrefetchScalarGridSpec(
            num_scalar_prefetch=0,
            grid=(rows_p // tm,),
            in_specs=in_specs,
            out_specs=out_specs),
        compiler_params=pltpu.CompilerParams(
            dimension_semantics=("parallel",),
            vmem_limit_bytes=_VMEM_LIMIT),
    )(xf, embed_w, embed_b, *patch_params)
    if rows_p != rows:
        feats, pp, sc = feats[:rows], pp[:rows], sc[:rows]
    return feats, pp, sc


# ---------------------------------------------------------------------------
# Kernel 2: fused bag + patient stage, GB bags per grid step.
#   exact softmax over N (lane-dense), MXU aggregation (GB batched (1,N)@(N,F)),
#   patient LayerNorm, packed [patient projector L1 | classifier L1],
#   projector L2 + LN and classifier L2 -> (attn, patient_proj, logit).
# ---------------------------------------------------------------------------
def _bag_patient_kernel(sc_ref, f_ref, gpn_ref, bpn_ref,
                        wpc_ref, bpc_ref, gq1_ref, beq1_ref, gc_ref, bec_ref,
                        wp2_ref, bp2_ref, gq2_ref, beq2_ref, wc2t_ref, bc2_ref,
                        attn_ref, pproj_ref, logit_ref):
    s = sc_ref[...]                                             # (GB,1,N) f32
    m = jnp.max(s, axis=-1, keepdims=True)
    e = jnp.exp(s - m)
    attn = e / jnp.sum(e, axis=-1, keepdims=True)               # exact softmax
    attn_ref[...] = attn

    # attention-weighted aggregation on the MXU, batched over the bag group.
    pf = jnp.einsum('gon,gnf->gof', attn.astype(jnp.bfloat16), f_ref[...],
                    preferred_element_type=jnp.float32)         # (GB,1,F)
    pf = _ln(pf, gpn_ref[...], bpn_ref[...])                    # patient LN

    u = jnp.einsum('gof,fd->god', pf.astype(jnp.bfloat16), wpc_ref[...],
                   preferred_element_type=jnp.float32) + bpc_ref[...]
    q1 = jnp.maximum(_ln(u[..., :FEAT_DIM], gq1_ref[...], beq1_ref[...]), 0.0)
    c1 = jnp.maximum(_ln(u[..., FEAT_DIM:], gc_ref[...], bec_ref[...]), 0.0)

    q = jnp.einsum('goh,hp->gop', q1.astype(jnp.bfloat16), wp2_ref[...],
                   preferred_element_type=jnp.float32) + bp2_ref[...]
    pproj_ref[...] = _ln(q, gq2_ref[...], beq2_ref[...])
    # Dropout(p=0.2) is identity at inference.
    logit_ref[...] = jnp.sum(c1 * wc2t_ref[...], axis=-1,
                             keepdims=True) + bc2_ref[...]


def _pick_bag_group(b_sz, n, f_dim):
    gb = 1 if b_sz < 4 else min(8, b_sz // 2)   # keep >=2 parallel steps
    # keep the double-buffered feats tile within ~16 MiB (v7x-safe).
    while gb > 1 and gb * n * f_dim * 2 * 2 > 16 * 1024 * 1024:
        gb //= 2
    return gb


def bag_patient_stage(scores_b, feats_b, bag_params, patient_params):
    b_sz, _, n = scores_b.shape
    f_dim = feats_b.shape[-1]
    gb = _pick_bag_group(b_sz, n, f_dim)
    b_p = _round_up(b_sz, gb)
    if b_p != b_sz:
        scores_b = jnp.pad(scores_b, ((0, b_p - b_sz), (0, 0), (0, 0)))
        feats_b = jnp.pad(feats_b, ((0, b_p - b_sz), (0, 0), (0, 0)))
    # TODO(synk): for very large bags (N*F tile too big even at gb=1) tile N on
    # a second "arbitrary" grid axis with an online softmax.
    gpn, bpn = bag_params

    in_specs = [pl.BlockSpec((gb, 1, n), lambda b: (b, 0, 0)),
                pl.BlockSpec((gb, n, f_dim), lambda b: (b, 0, 0)),
                _full_spec(gpn), _full_spec(bpn)]
    in_specs += [_full_spec(p) for p in patient_params]
    out_specs = [pl.BlockSpec((gb, 1, n), lambda b: (b, 0, 0)),
                 pl.BlockSpec((gb, 1, PROJ_DIM), lambda b: (b, 0, 0)),
                 pl.BlockSpec((gb, 1, 1), lambda b: (b, 0, 0))]

    attn, pproj, logits = pl.pallas_call(
        _bag_patient_kernel,
        out_shape=(jax.ShapeDtypeStruct((b_p, 1, n), jnp.float32),
                   jax.ShapeDtypeStruct((b_p, 1, PROJ_DIM), jnp.float32),
                   jax.ShapeDtypeStruct((b_p, 1, 1), jnp.float32)),
        grid_spec=pltpu.PrefetchScalarGridSpec(
            num_scalar_prefetch=0,
            grid=(b_p // gb,),
            in_specs=in_specs,
            out_specs=out_specs),
        compiler_params=pltpu.CompilerParams(
            dimension_semantics=("parallel",),
            vmem_limit_bytes=_VMEM_LIMIT),
    )(scores_b, feats_b, gpn, bpn, *patient_params)
    return attn[:b_sz], pproj[:b_sz], logits[:b_sz]


# ---------------------------------------------------------------------------
# Parameter init (deterministic, synthetic).  Same-input weight matrices are
# packed: [w1 | wa1] -> (512, 640) and [wp1 | wc1] -> (512, 768); MXU weights
# are stored in bf16, bias / LayerNorm params stay f32.
# ---------------------------------------------------------------------------
def init_params(key, embed_in_dim):
    F, P, A, C2 = FEAT_DIM, PROJ_DIM, ATTN_DIM, CLS_HID
    ks = iter(jax.random.split(key, 40))

    def lin(din, dout):
        kw, kb = next(ks), next(ks)
        w = jax.random.normal(kw, (din, dout), jnp.float32) / jnp.sqrt(
            jnp.float32(din))
        b = jax.random.normal(kb, (1, dout), jnp.float32) * 0.01
        return w, b

    def lnp(d):
        return jnp.ones((1, d), jnp.float32), jnp.zeros((1, d), jnp.float32)

    bf = lambda a: a.astype(jnp.bfloat16)

    embed_w, embed_b = lin(embed_in_dim, F)

    # patch projector + attention (patch level)
    w1, b1 = lin(F, F); g1, be1 = lnp(F)
    w2, b2 = lin(F, P); g2, be2 = lnp(P)
    wa1, ba1 = lin(F, A); ga, bea = lnp(A)
    wa2, ba2 = lin(A, 1)
    # patient layer norm
    gpn, bpn = lnp(F)
    # patient projector + classifier (patient level)
    wp1, bp1 = lin(F, F); gq1, beq1 = lnp(F)
    wp2, bp2 = lin(F, P); gq2, beq2 = lnp(P)
    wc1, bc1 = lin(F, C2); gc, bec = lnp(C2)
    wc2, bc2 = lin(C2, 1)

    return {
        "embed_w": bf(embed_w),
        "embed_b": embed_b,
        "patch": (
            bf(jnp.concatenate([w1, wa1], axis=1)),    # (F, F+A) bf16
            jnp.concatenate([b1, ba1], axis=1),         # (1, F+A)
            g1, be1, ga, bea,
            bf(w2), b2, g2, be2,
            wa2.T, ba2,                                 # (1, A), (1, 1)
        ),
        "bag": (gpn, bpn),
        "patient": (
            bf(jnp.concatenate([wp1, wc1], axis=1)),    # (F, F+C2) bf16
            jnp.concatenate([bp1, bc1], axis=1),         # (1, F+C2)
            gq1, beq1, gc, bec,
            bf(wp2), bp2, gq2, beq2,
            wc2.T, bc2,                                 # (1, C2), (1, 1)
        ),
    }


# ---------------------------------------------------------------------------
# Forward wrapper (matches MILHistopathModel.forward outputs)
# ---------------------------------------------------------------------------
def mil_forward(x, params):
    b_sz, n_patch, c, h, w = x.shape
    rows = b_sz * n_patch
    xf = x.reshape(rows, c * h * w)          # stays f32; bf16 cast is in-kernel

    feats, pp, scores = patch_stage(xf, params["embed_w"], params["embed_b"],
                                    params["patch"])

    patch_proj = pp.reshape(b_sz, n_patch, PROJ_DIM)
    scores_b = scores.reshape(b_sz, 1, n_patch)      # tiny relayout (rows*4 B)
    feats_b = feats.reshape(b_sz, n_patch, FEAT_DIM)

    attn, patient_proj, logits = bag_patient_stage(scores_b, feats_b,
                                                   params["bag"],
                                                   params["patient"])
    # num_classes=2 -> single logit, squeezed (matches the PyTorch module).
    return (patch_proj, patient_proj[:, 0, :], logits[:, 0, 0], attn[:, 0, :])


if __name__ == "__main__":
    B, N_PATCH, C, H, W = 2, 8, 3, 16, 16
    key = jax.random.PRNGKey(0)
    kx, kp = jax.random.split(key)
    x = jax.random.normal(kx, (B, N_PATCH, C, H, W), jnp.float32)
    params = init_params(kp, C * H * W)

    fwd = jax.jit(mil_forward)
    patch_proj, patient_proj, logits, attn = fwd(x, params)
    jax.block_until_ready((patch_proj, patient_proj, logits, attn))

    assert patch_proj.shape == (B, N_PATCH, PROJ_DIM)
    assert patient_proj.shape == (B, PROJ_DIM)
    assert logits.shape == (B,)
    assert attn.shape == (B, N_PATCH)
    # attention weights sum to ~1 per bag (exact softmax divide).
    assert bool(jnp.all(jnp.abs(jnp.sum(attn, axis=1) - 1.0) < 1e-3))
    assert bool(jnp.all(jnp.isfinite(patient_proj)))
    assert bool(jnp.all(jnp.isfinite(logits)))

    print("KERNEL_OK")
</pallas_src>

<mosaic_0001>
module attributes {stable_mosaic.version = 11 : i64} {
  func.func @_patch_fused_kernel(%arg0: i32, %arg1: memref<16x768xf32, #tpu.memory_space<vmem>>, %arg2: memref<768x512xbf16, #tpu.memory_space<vmem>>, %arg3: memref<1x512xf32, #tpu.memory_space<vmem>>, %arg4: memref<512x640xbf16, #tpu.memory_space<vmem>>, %arg5: memref<1x640xf32, #tpu.memory_space<vmem>>, %arg6: memref<1x512xf32, #tpu.memory_space<vmem>>, %arg7: memref<1x512xf32, #tpu.memory_space<vmem>>, %arg8: memref<1x128xf32, #tpu.memory_space<vmem>>, %arg9: memref<1x128xf32, #tpu.memory_space<vmem>>, %arg10: memref<512x128xbf16, #tpu.memory_space<vmem>>, %arg11: memref<1x128xf32, #tpu.memory_space<vmem>>, %arg12: memref<1x128xf32, #tpu.memory_space<vmem>>, %arg13: memref<1x128xf32, #tpu.memory_space<vmem>>, %arg14: memref<1x128xf32, #tpu.memory_space<vmem>>, %arg15: memref<1x1xf32, #tpu.memory_space<vmem>>, %arg16: memref<16x512xbf16, #tpu.memory_space<vmem>>, %arg17: memref<16x128xf32, #tpu.memory_space<vmem>>, %arg18: memref<16x1xf32, #tpu.memory_space<vmem>>) attributes {dimension_semantics = [#tpu.dimension_semantics<parallel>], iteration_bounds = array<i64: 1>, scalar_prefetch = 0 : i64, scratch_operands = 0 : i64, tpu.core_type = #tpu.core_type<tc>, window_params = [{transform_indices = @transform_0, window_bounds = array<i64: 16, 768>}, {pipeline_mode = #tpu.pipeline_mode<synchronous>, transform_indices = @transform_1, window_bounds = array<i64: 768, 512>}, {pipeline_mode = #tpu.pipeline_mode<synchronous>, transform_indices = @transform_2, window_bounds = array<i64: 1, 512>}, {pipeline_mode = #tpu.pipeline_mode<synchronous>, transform_indices = @transform_3, window_bounds = array<i64: 512, 640>}, {pipeline_mode = #tpu.pipeline_mode<synchronous>, transform_indices = @transform_4, window_bounds = array<i64: 1, 640>}, {pipeline_mode = #tpu.pipeline_mode<synchronous>, transform_indices = @transform_5, window_bounds = array<i64: 1, 512>}, {pipeline_mode = #tpu.pipeline_mode<synchronous>, transform_indices = @transform_6, window_bounds = array<i64: 1, 512>}, {pipeline_mode = #tpu.pipeline_mode<synchronous>, transform_indices = @transform_7, window_bounds = array<i64: 1, 128>}, {pipeline_mode = #tpu.pipeline_mode<synchronous>, transform_indices = @transform_8, window_bounds = array<i64: 1, 128>}, {pipeline_mode = #tpu.pipeline_mode<synchronous>, transform_indices = @transform_9, window_bounds = array<i64: 512, 128>}, {pipeline_mode = #tpu.pipeline_mode<synchronous>, transform_indices = @transform_10, window_bounds = array<i64: 1, 128>}, {pipeline_mode = #tpu.pipeline_mode<synchronous>, transform_indices = @transform_11, window_bounds = array<i64: 1, 128>}, {pipeline_mode = #tpu.pipeline_mode<synchronous>, transform_indices = @transform_12, window_bounds = array<i64: 1, 128>}, {pipeline_mode = #tpu.pipeline_mode<synchronous>, transform_indices = @transform_13, window_bounds = array<i64: 1, 128>}, {pipeline_mode = #tpu.pipeline_mode<synchronous>, transform_indices = @transform_14, window_bounds = array<i64: 1, 1>}, {transform_indices = @transform_15, window_bounds = array<i64: 16, 512>}, {transform_indices = @transform_16, window_bounds = array<i64: 16, 128>}, {transform_indices = @transform_17, window_bounds = array<i64: 16, 1>}]} {
    %c0 = arith.constant 0 : index
    %c0_0 = arith.constant 0 : index
    %0 = vector.load %arg1[%c0, %c0_0] : memref<16x768xf32, #tpu.memory_space<vmem>>, vector<16x768xf32>
    %1 = arith.truncf %0 : vector<16x768xf32> to vector<16x768xbf16>
    %c0_1 = arith.constant 0 : index
    %c0_2 = arith.constant 0 : index
    %2 = vector.load %arg2[%c0_1, %c0_2] : memref<768x512xbf16, #tpu.memory_space<vmem>>, vector<768x512xbf16>
    %cst = arith.constant dense<0.000000e+00> : vector<16x512xf32>
    %3 = tpu.matmul %1, %2, %cst {dimension_numbers = #tpu.dot_dimension_numbers<[1], [0], [0], [1], [0, 0, 1, 1], [], []>} : vector<16x768xbf16>, vector<768x512xbf16>, vector<16x512xf32> -> vector<16x512xf32>
    %c0_3 = arith.constant 0 : index
    %c0_4 = arith.constant 0 : index
    %4 = vector.load %arg3[%c0_3, %c0_4] : memref<1x512xf32, #tpu.memory_space<vmem>>, vector<1x512xf32>
    %5 = vector.broadcast %4 : vector<1x512xf32> to vector<16x512xf32>
    %6 = arith.addf %3, %5 : vector<16x512xf32>
    %7 = arith.truncf %6 : vector<16x512xf32> to vector<16x512xbf16>
    %c0_5 = arith.constant 0 : index
    %c0_6 = arith.constant 0 : index
    %8 = vector.load %arg16[%c0_5, %c0_6] : memref<16x512xbf16, #tpu.memory_space<vmem>>, vector<16x512xbf16>
    tpu.vector_store %arg16[%c0_5, %c0_6], %7 {strides = array<i32>} : memref<16x512xbf16, #tpu.memory_space<vmem>>, vector<16x512xbf16>,
    %c0_7 = arith.constant 0 : index
    %c0_8 = arith.constant 0 : index
    %9 = vector.load %arg4[%c0_7, %c0_8] : memref<512x640xbf16, #tpu.memory_space<vmem>>, vector<512x640xbf16>
    %cst_9 = arith.constant dense<0.000000e+00> : vector<16x640xf32>
    %10 = tpu.matmul %7, %9, %cst_9 {dimension_numbers = #tpu.dot_dimension_numbers<[1], [0], [0], [1], [0, 0, 1, 1], [], []>} : vector<16x512xbf16>, vector<512x640xbf16>, vector<16x640xf32> -> vector<16x640xf32>
    %c0_10 = arith.constant 0 : index
    %c0_11 = arith.constant 0 : index
    %11 = vector.load %arg5[%c0_10, %c0_11] : memref<1x640xf32, #tpu.memory_space<vmem>>, vector<1x640xf32>
    %12 = vector.broadcast %11 : vector<1x640xf32> to vector<16x640xf32>
    %13 = arith.addf %10, %12 : vector<16x640xf32>
    %14 = vector.extract_strided_slice %13 {offsets = [0, 0], sizes = [16, 512], strides = [1, 1]} : vector<16x640xf32> to vector<16x512xf32>
    %c0_12 = arith.constant 0 : index
    %c0_13 = arith.constant 0 : index
    %15 = vector.load %arg6[%c0_12, %c0_13] : memref<1x512xf32, #tpu.memory_space<vmem>>, vector<1x512xf32>
    %c0_14 = arith.constant 0 : index
    %c0_15 = arith.constant 0 : index
    %16 = vector.load %arg7[%c0_14, %c0_15] : memref<1x512xf32, #tpu.memory_space<vmem>>, vector<1x512xf32>
    %cst_16 = arith.constant dense<0.000000e+00> : vector<16xf32>
    %17 = vector.multi_reduction <add>, %14, %cst_16 [1] : vector<16x512xf32> to vector<16xf32>
    %18 = vector.shape_cast %17 : vector<16xf32> to vector<16x1xf32>
    %cst_17 = arith.constant 5.120000e+02 : f32
    %19 = vector.broadcast %cst_17 : f32 to vector<16x1xf32>
    %20 = arith.divf %18, %19 : vector<16x1xf32>
    %21 = vector.broadcast %20 : vector<16x1xf32> to vector<16x512xf32>
    %22 = arith.subf %14, %21 : vector<16x512xf32>
    %23 = arith.mulf %22, %22 : vector<16x512xf32>
    %cst_18 = arith.constant dense<0.000000e+00> : vector<16xf32>
    %24 = vector.multi_reduction <add>, %23, %cst_18 [1] : vector<16x512xf32> to vector<16xf32>
    %25 = vector.shape_cast %24 : vector<16xf32> to vector<16x1xf32>
    %cst_19 = arith.constant 5.120000e+02 : f32
    %26 = vector.broadcast %cst_19 : f32 to vector<16x1xf32>
    %27 = arith.divf %25, %26 : vector<16x1xf32>
    %28 = vector.broadcast %20 : vector<16x1xf32> to vector<16x512xf32>
    %29 = arith.subf %14, %28 : vector<16x512xf32>
    %cst_20 = arith.constant 9.99999974E-6 : f32
    %30 = vector.broadcast %cst_20 : f32 to vector<16x1xf32>
    %31 = arith.addf %27, %30 : vector<16x1xf32>
    %32 = math.rsqrt %31 : vector<16x1xf32>
    %33 = vector.broadcast %32 : vector<16x1xf32> to vector<16x512xf32>
    %34 = arith.mulf %29, %33 : vector<16x512xf32>
    %35 = vector.broadcast %15 : vector<1x512xf32> to vector<16x512xf32>
    %36 = arith.mulf %34, %35 : vector<16x512xf32>
    %37 = vector.broadcast %16 : vector<1x512xf32> to vector<16x512xf32>
    %38 = arith.addf %36, %37 : vector<16x512xf32>
    %cst_21 = arith.constant 0.000000e+00 : f32
    %39 = vector.broadcast %cst_21 : f32 to vector<16x512xf32>
    %40 = arith.maximumf %38, %39 : vector<16x512xf32>
    %41 = vector.extract_strided_slice %13 {offsets = [0, 512], sizes = [16, 128], strides = [1, 1]} : vector<16x640xf32> to vector<16x128xf32>
    %c0_22 = arith.constant 0 : index
    %c0_23 = arith.constant 0 : index
    %42 = vector.load %arg8[%c0_22, %c0_23] : memref<1x128xf32, #tpu.memory_space<vmem>>, vector<1x128xf32>
    %c0_24 = arith.constant 0 : index
    %c0_25 = arith.constant 0 : index
    %43 = vector.load %arg9[%c0_24, %c0_25] : memref<1x128xf32, #tpu.memory_space<vmem>>, vector<1x128xf32>
    %cst_26 = arith.constant dense<0.000000e+00> : vector<16xf32>
    %44 = vector.multi_reduction <add>, %41, %cst_26 [1] : vector<16x128xf32> to vector<16xf32>
    %45 = vector.shape_cast %44 : vector<16xf32> to vector<16x1xf32>
    %cst_27 = arith.constant 1.280000e+02 : f32
    %46 = vector.broadcast %cst_27 : f32 to vector<16x1xf32>
    %47 = arith.divf %45, %46 : vector<16x1xf32>
    %48 = vector.broadcast %47 : vector<16x1xf32> to vector<16x128xf32>
    %49 = arith.subf %41, %48 : vector<16x128xf32>
    %50 = arith.mulf %49, %49 : vector<16x128xf32>
    %cst_28 = arith.constant dense<0.000000e+00> : vector<16xf32>
    %51 = vector.multi_reduction <add>, %50, %cst_28 [1] : vector<16x128xf32> to vector<16xf32>
    %52 = vector.shape_cast %51 : vector<16xf32> to vector<16x1xf32>
    %cst_29 = arith.constant 1.280000e+02 : f32
    %53 = vector.broadcast %cst_29 : f32 to vector<16x1xf32>
    %54 = arith.divf %52, %53 : vector<16x1xf32>
    %55 = vector.broadcast %47 : vector<16x1xf32> to vector<16x128xf32>
    %56 = arith.subf %41, %55 : vector<16x128xf32>
    %cst_30 = arith.constant 9.99999974E-6 : f32
    %57 = vector.broadcast %cst_30 : f32 to vector<16x1xf32>
    %58 = arith.addf %54, %57 : vector<16x1xf32>
    %59 = math.rsqrt %58 : vector<16x1xf32>
    %60 = vector.broadcast %59 : vector<16x1xf32> to vector<16x128xf32>
    %61 = arith.mulf %56, %60 : vector<16x128xf32>
    %62 = vector.broadcast %42 : vector<1x128xf32> to vector<16x128xf32>
    %63 = arith.mulf %61, %62 : vector<16x128xf32>
    %64 = vector.broadcast %43 : vector<1x128xf32> to vector<16x128xf32>
    %65 = arith.addf %63, %64 : vector<16x128xf32>
    %66 = math.tanh %65 : vector<16x128xf32>
    %67 = arith.truncf %40 : vector<16x512xf32> to vector<16x512xbf16>
    %c0_31 = arith.constant 0 : index
    %c0_32 = arith.constant 0 : index
    %68 = vector.load %arg10[%c0_31, %c0_32] : memref<512x128xbf16, #tpu.memory_space<vmem>>, vector<512x128xbf16>
    %cst_33 = arith.constant dense<0.000000e+00> : vector<16x128xf32>
    %69 = tpu.matmul %67, %68, %cst_33 {dimension_numbers = #tpu.dot_dimension_numbers<[1], [0], [0], [1], [0, 0, 1, 1], [], []>} : vector<16x512xbf16>, vector<512x128xbf16>, vector<16x128xf32> -> vector<16x128xf32>
    %c0_34 = arith.constant 0 : index
    %c0_35 = arith.constant 0 : index
    %70 = vector.load %arg11[%c0_34, %c0_35] : memref<1x128xf32, #tpu.memory_space<vmem>>, vector<1x128xf32>
    %71 = vector.broadcast %70 : vector<1x128xf32> to vector<16x128xf32>
    %72 = arith.addf %69, %71 : vector<16x128xf32>
    %c0_36 = arith.constant 0 : index
    %c0_37 = arith.constant 0 : index
    %73 = vector.load %arg12[%c0_36, %c0_37] : memref<1x128xf32, #tpu.memory_space<vmem>>, vector<1x128xf32>
    %c0_38 = arith.constant 0 : index
    %c0_39 = arith.constant 0 : index
    %74 = vector.load %arg13[%c0_38, %c0_39] : memref<1x128xf32, #tpu.memory_space<vmem>>, vector<1x128xf32>
    %cst_40 = arith.constant dense<0.000000e+00> : vector<16xf32>
    %75 = vector.multi_reduction <add>, %72, %cst_40 [1] : vector<16x128xf32> to vector<16xf32>
    %76 = vector.shape_cast %75 : vector<16xf32> to vector<16x1xf32>
    %cst_41 = arith.constant 1.280000e+02 : f32
    %77 = vector.broadcast %cst_41 : f32 to vector<16x1xf32>
    %78 = arith.divf %76, %77 : vector<16x1xf32>
    %79 = vector.broadcast %78 : vector<16x1xf32> to vector<16x128xf32>
    %80 = arith.subf %72, %79 : vector<16x128xf32>
    %81 = arith.mulf %80, %80 : vector<16x128xf32>
    %cst_42 = arith.constant dense<0.000000e+00> : vector<16xf32>
    %82 = vector.multi_reduction <add>, %81, %cst_42 [1] : vector<16x128xf32> to vector<16xf32>
    %83 = vector.shape_cast %82 : vector<16xf32> to vector<16x1xf32>
    %cst_43 = arith.constant 1.280000e+02 : f32
    %84 = vector.broadcast %cst_43 : f32 to vector<16x1xf32>
    %85 = arith.divf %83, %84 : vector<16x1xf32>
    %86 = vector.broadcast %78 : vector<16x1xf32> to vector<16x128xf32>
    %87 = arith.subf %72, %86 : vector<16x128xf32>
    %cst_44 = arith.constant 9.99999974E-6 : f32
    %88 = vector.broadcast %cst_44 : f32 to vector<16x1xf32>
    %89 = arith.addf %85, %88 : vector<16x1xf32>
    %90 = math.rsqrt %89 : vector<16x1xf32>
    %91 = vector.broadcast %90 : vector<16x1xf32> to vector<16x128xf32>
    %92 = arith.mulf %87, %91 : vector<16x128xf32>
    %93 = vector.broadcast %73 : vector<1x128xf32> to vector<16x128xf32>
    %94 = arith.mulf %92, %93 : vector<16x128xf32>
    %95 = vector.broadcast %74 : vector<1x128xf32> to vector<16x128xf32>
    %96 = arith.addf %94, %95 : vector<16x128xf32>
    %c0_45 = arith.constant 0 : index
    %c0_46 = arith.constant 0 : index
    %97 = vector.load %arg17[%c0_45, %c0_46] : memref<16x128xf32, #tpu.memory_space<vmem>>, vector<16x128xf32>
    tpu.vector_store %arg17[%c0_45, %c0_46], %96 {strides = array<i32>} : memref<16x128xf32, #tpu.memory_space<vmem>>, vector<16x128xf32>,
    %c0_47 = arith.constant 0 : index
    %c0_48 = arith.constant 0 : index
    %98 = vector.load %arg14[%c0_47, %c0_48] : memref<1x128xf32, #tpu.memory_space<vmem>>, vector<1x128xf32>
    %99 = vector.broadcast %98 : vector<1x128xf32> to vector<16x128xf32>
    %100 = arith.mulf %66, %99 : vector<16x128xf32>
    %cst_49 = arith.constant dense<0.000000e+00> : vector<16xf32>
    %101 = vector.multi_reduction <add>, %100, %cst_49 [1] : vector<16x128xf32> to vector<16xf32>
    %102 = vector.shape_cast %101 : vector<16xf32> to vector<16x1xf32>
    %c0_50 = arith.constant 0 : index
    %c0_51 = arith.constant 0 : index
    %103 = vector.load %arg15[%c0_50, %c0_51] : memref<1x1xf32, #tpu.memory_space<vmem>>, vector<1x1xf32>
    %104 = vector.broadcast %103 : vector<1x1xf32> to vector<16x1xf32>
    %105 = arith.addf %102, %104 : vector<16x1xf32>
    %c0_52 = arith.constant 0 : index
    %c0_53 = arith.constant 0 : index
    %106 = vector.load %arg18[%c0_52, %c0_53] : memref<16x1xf32, #tpu.memory_space<vmem>>, vector<16x1xf32>
    tpu.vector_store %arg18[%c0_52, %c0_53], %105 {strides = array<i32>} : memref<16x1xf32, #tpu.memory_space<vmem>>, vector<16x1xf32>,
    return
  }
  func.func @transform_0(%arg0: i32) -> (i32, i32) {
    %c0_i32 = arith.constant 0 : i32
    %c0_i32_0 = arith.constant 0 : i32
    return %arg0, %c0_i32 : i32, i32
  }
  func.func @transform_1(%arg0: i32) -> (i32, i32) {
    %c0_i32 = arith.constant 0 : i32
    %c0_i32_0 = arith.constant 0 : i32
    %c0_i32_1 = arith.constant 0 : i32
    return %c0_i32, %c0_i32_0 : i32, i32
  }
  func.func @transform_2(%arg0: i32) -> (i32, i32) {
    %c0_i32 = arith.constant 0 : i32
    %c0_i32_0 = arith.constant 0 : i32
    %c0_i32_1 = arith.constant 0 : i32
    return %c0_i32, %c0_i32_0 : i32, i32
  }
  func.func @transform_3(%arg0: i32) -> (i32, i32) {
    %c0_i32 = arith.constant 0 : i32
    %c0_i32_0 = arith.constant 0 : i32
    %c0_i32_1 = arith.constant 0 : i32
    return %c0_i32, %c0_i32_0 : i32, i32
  }
  func.func @transform_4(%arg0: i32) -> (i32, i32) {
    %c0_i32 = arith.constant 0 : i32
    %c0_i32_0 = arith.constant 0 : i32
    %c0_i32_1 = arith.constant 0 : i32
    return %c0_i32, %c0_i32_0 : i32, i32
  }
  func.func @transform_5(%arg0: i32) -> (i32, i32) {
    %c0_i32 = arith.constant 0 : i32
    %c0_i32_0 = arith.constant 0 : i32
    %c0_i32_1 = arith.constant 0 : i32
    return %c0_i32, %c0_i32_0 : i32, i32
  }
  func.func @transform_6(%arg0: i32) -> (i32, i32) {
    %c0_i32 = arith.constant 0 : i32
    %c0_i32_0 = arith.constant 0 : i32
    %c0_i32_1 = arith.constant 0 : i32
    return %c0_i32, %c0_i32_0 : i32, i32
  }
  func.func @transform_7(%arg0: i32) -> (i32, i32) {
    %c0_i32 = arith.constant 0 : i32
    %c0_i32_0 = arith.constant 0 : i32
    %c0_i32_1 = arith.constant 0 : i32
    return %c0_i32, %c0_i32_0 : i32, i32
  }
  func.func @transform_8(%arg0: i32) -> (i32, i32) {
    %c0_i32 = arith.constant 0 : i32
    %c0_i32_0 = arith.constant 0 : i32
    %c0_i32_1 = arith.constant 0 : i32
    return %c0_i32, %c0_i32_0 : i32, i32
  }
  func.func @transform_9(%arg0: i32) -> (i32, i32) {
    %c0_i32 = arith.constant 0 : i32
    %c0_i32_0 = arith.constant 0 : i32
    %c0_i32_1 = arith.constant 0 : i32
    return %c0_i32, %c0_i32_0 : i32, i32
  }
  func.func @transform_10(%arg0: i32) -> (i32, i32) {
    %c0_i32 = arith.constant 0 : i32
    %c0_i32_0 = arith.constant 0 : i32
    %c0_i32_1 = arith.constant 0 : i32
    return %c0_i32, %c0_i32_0 : i32, i32
  }
  func.func @transform_11(%arg0: i32) -> (i32, i32) {
    %c0_i32 = arith.constant 0 : i32
    %c0_i32_0 = arith.constant 0 : i32
    %c0_i32_1 = arith.constant 0 : i32
    return %c0_i32, %c0_i32_0 : i32, i32
  }
  func.func @transform_12(%arg0: i32) -> (i32, i32) {
    %c0_i32 = arith.constant 0 : i32
    %c0_i32_0 = arith.constant 0 : i32
    %c0_i32_1 = arith.constant 0 : i32
    return %c0_i32, %c0_i32_0 : i32, i32
  }
  func.func @transform_13(%arg0: i32) -> (i32, i32) {
    %c0_i32 = arith.constant 0 : i32
    %c0_i32_0 = arith.constant 0 : i32
    %c0_i32_1 = arith.constant 0 : i32
    return %c0_i32, %c0_i32_0 : i32, i32
  }
  func.func @transform_14(%arg0: i32) -> (i32, i32) {
    %c0_i32 = arith.constant 0 : i32
    %c0_i32_0 = arith.constant 0 : i32
    %c0_i32_1 = arith.constant 0 : i32
    return %c0_i32, %c0_i32_0 : i32, i32
  }
  func.func @transform_15(%arg0: i32) -> (i32, i32) {
    %c0_i32 = arith.constant 0 : i32
    %c0_i32_0 = arith.constant 0 : i32
    return %arg0, %c0_i32 : i32, i32
  }
  func.func @transform_16(%arg0: i32) -> (i32, i32) {
    %c0_i32 = arith.constant 0 : i32
    %c0_i32_0 = arith.constant 0 : i32
    return %arg0, %c0_i32 : i32, i32
  }
  func.func @transform_17(%arg0: i32) -> (i32, i32) {
    %c0_i32 = arith.constant 0 : i32
    %c0_i32_0 = arith.constant 0 : i32
    return %arg0, %c0_i32 : i32, i32
  }
}

module attributes {stable_mosaic.version = 11 : i64} {
  func.func @_bag_patient_kernel(%arg0: i32, %arg1: memref<1x1x8xf32, #tpu.memory_space<vmem>>, %arg2: memref<1x8x512xbf16, #tpu.memory_space<vmem>>, %arg3: memref<1x512xf32, #tpu.memory_space<vmem>>, %arg4: memref<1x512xf32, #tpu.memory_space<vmem>>, %arg5: memref<512x768xbf16, #tpu.memory_space<vmem>>, %arg6: memref<1x768xf32, #tpu.memory_space<vmem>>, %arg7: memref<1x512xf32, #tpu.memory_space<vmem>>, %arg8: memref<1x512xf32, #tpu.memory_space<vmem>>, %arg9: memref<1x256xf32, #tpu.memory_space<vmem>>, %arg10: memref<1x256xf32, #tpu.memory_space<vmem>>, %arg11: memref<512x128xbf16, #tpu.memory_space<vmem>>, %arg12: memref<1x128xf32, #tpu.memory_space<vmem>>, %arg13: memref<1x128xf32, #tpu.memory_space<vmem>>, %arg14: memref<1x128xf32, #tpu.memory_space<vmem>>, %arg15: memref<1x256xf32, #tpu.memory_space<vmem>>, %arg16: memref<1x1xf32, #tpu.memory_space<vmem>>, %arg17: memref<1x1x8xf32, #tpu.memory_space<vmem>>, %arg18: memref<1x1x128xf32, #tpu.memory_space<vmem>>, %arg19: memref<1x1x1xf32, #tpu.memory_space<vmem>>) attributes {dimension_semantics = [#tpu.dimension_semantics<parallel>], iteration_bounds = array<i64: 2>, scalar_prefetch = 0 : i64, scratch_operands = 0 : i64, tpu.core_type = #tpu.core_type<tc>, window_params = [{transform_indices = @transform_0, window_bounds = array<i64: 1, 1, 8>}, {transform_indices = @transform_1, window_bounds = array<i64: 1, 8, 512>}, {pipeline_mode = #tpu.pipeline_mode<synchronous>, transform_indices = @transform_2, window_bounds = array<i64: 1, 512>}, {pipeline_mode = #tpu.pipeline_mode<synchronous>, transform_indices = @transform_3, window_bounds = array<i64: 1, 512>}, {pipeline_mode = #tpu.pipeline_mode<synchronous>, transform_indices = @transform_4, window_bounds = array<i64: 512, 768>}, {pipeline_mode = #tpu.pipeline_mode<synchronous>, transform_indices = @transform_5, window_bounds = array<i64: 1, 768>}, {pipeline_mode = #tpu.pipeline_mode<synchronous>, transform_indices = @transform_6, window_bounds = array<i64: 1, 512>}, {pipeline_mode = #tpu.pipeline_mode<synchronous>, transform_indices = @transform_7, window_bounds = array<i64: 1, 512>}, {pipeline_mode = #tpu.pipeline_mode<synchronous>, transform_indices = @transform_8, window_bounds = array<i64: 1, 256>}, {pipeline_mode = #tpu.pipeline_mode<synchronous>, transform_indices = @transform_9, window_bounds = array<i64: 1, 256>}, {pipeline_mode = #tpu.pipeline_mode<synchronous>, transform_indices = @transform_10, window_bounds = array<i64: 512, 128>}, {pipeline_mode = #tpu.pipeline_mode<synchronous>, transform_indices = @transform_11, window_bounds = array<i64: 1, 128>}, {pipeline_mode = #tpu.pipeline_mode<synchronous>, transform_indices = @transform_12, window_bounds = array<i64: 1, 128>}, {pipeline_mode = #tpu.pipeline_mode<synchronous>, transform_indices = @transform_13, window_bounds = array<i64: 1, 128>}, {pipeline_mode = #tpu.pipeline_mode<synchronous>, transform_indices = @transform_14, window_bounds = array<i64: 1, 256>}, {pipeline_mode = #tpu.pipeline_mode<synchronous>, transform_indices = @transform_15, window_bounds = array<i64: 1, 1>}, {transform_indices = @transform_16, window_bounds = array<i64: 1, 1, 8>}, {transform_indices = @transform_17, window_bounds = array<i64: 1, 1, 128>}, {transform_indices = @transform_18, window_bounds = array<i64: 1, 1, 1>}]} {
    %c0 = arith.constant 0 : index
    %c0_0 = arith.constant 0 : index
    %c0_1 = arith.constant 0 : index
    %0 = vector.load %arg1[%c0, %c0_0, %c0_1] : memref<1x1x8xf32, #tpu.memory_space<vmem>>, vector<1x1x8xf32>
    %cst = arith.constant dense<0xFF800000> : vector<1x1xf32>
    %1 = vector.multi_reduction <maximumf>, %0, %cst [2] : vector<1x1x8xf32> to vector<1x1xf32>
    %2 = vector.shape_cast %1 : vector<1x1xf32> to vector<1x1x1xf32>
    %3 = vector.broadcast %2 : vector<1x1x1xf32> to vector<1x1x8xf32>
    %4 = arith.subf %0, %3 : vector<1x1x8xf32>
    %5 = math.exp %4 : vector<1x1x8xf32>
    %cst_2 = arith.constant dense<0.000000e+00> : vector<1x1xf32>
    %6 = vector.multi_reduction <add>, %5, %cst_2 [2] : vector<1x1x8xf32> to vector<1x1xf32>
    %7 = vector.shape_cast %6 : vector<1x1xf32> to vector<1x1x1xf32>
    %8 = vector.broadcast %7 : vector<1x1x1xf32> to vector<1x1x8xf32>
    %9 = arith.divf %5, %8 : vector<1x1x8xf32>
    %c0_3 = arith.constant 0 : index
    %c0_4 = arith.constant 0 : index
    %c0_5 = arith.constant 0 : index
    %10 = vector.load %arg17[%c0_3, %c0_4, %c0_5] : memref<1x1x8xf32, #tpu.memory_space<vmem>>, vector<1x1x8xf32>
    tpu.vector_store %arg17[%c0_3, %c0_4, %c0_5], %9 {strides = array<i32>} : memref<1x1x8xf32, #tpu.memory_space<vmem>>, vector<1x1x8xf32>,
    %11 = arith.truncf %9 : vector<1x1x8xf32> to vector<1x1x8xbf16>
    %c0_6 = arith.constant 0 : index
    %c0_7 = arith.constant 0 : index
    %c0_8 = arith.constant 0 : index
    %12 = vector.load %arg2[%c0_6, %c0_7, %c0_8] : memref<1x8x512xbf16, #tpu.memory_space<vmem>>, vector<1x8x512xbf16>
    "tpu.trace_start"() <{level = 10 : i32, message = "gon,gnf->gof"}> : () -> ()
    %cst_9 = arith.constant dense<0.000000e+00> : vector<1x1x512xf32>
    %13 = tpu.matmul %11, %12, %cst_9 {dimension_numbers = #tpu.dot_dimension_numbers<[2], [1], [1], [2], [0, 0, 0, 1, 1, 2], [0], [0]>} : vector<1x1x8xbf16>, vector<1x8x512xbf16>, vector<1x1x512xf32> -> vector<1x1x512xf32>
    "tpu.trace_stop"() : () -> ()
    %c0_10 = arith.constant 0 : index
    %c0_11 = arith.constant 0 : index
    %14 = vector.load %arg3[%c0_10, %c0_11] : memref<1x512xf32, #tpu.memory_space<vmem>>, vector<1x512xf32>
    %c0_12 = arith.constant 0 : index
    %c0_13 = arith.constant 0 : index
    %15 = vector.load %arg4[%c0_12, %c0_13] : memref<1x512xf32, #tpu.memory_space<vmem>>, vector<1x512xf32>
    %cst_14 = arith.constant dense<0.000000e+00> : vector<1x1xf32>
    %16 = vector.multi_reduction <add>, %13, %cst_14 [2] : vector<1x1x512xf32> to vector<1x1xf32>
    %17 = vector.shape_cast %16 : vector<1x1xf32> to vector<1x1x1xf32>
    %cst_15 = arith.constant 5.120000e+02 : f32
    %18 = vector.broadcast %cst_15 : f32 to vector<1x1x1xf32>
    %19 = arith.divf %17, %18 : vector<1x1x1xf32>
    %20 = vector.broadcast %19 : vector<1x1x1xf32> to vector<1x1x512xf32>
    %21 = arith.subf %13, %20 : vector<1x1x512xf32>
    %22 = arith.mulf %21, %21 : vector<1x1x512xf32>
    %cst_16 = arith.constant dense<0.000000e+00> : vector<1x1xf32>
    %23 = vector.multi_reduction <add>, %22, %cst_16 [2] : vector<1x1x512xf32> to vector<1x1xf32>
    %24 = vector.shape_cast %23 : vector<1x1xf32> to vector<1x1x1xf32>
    %cst_17 = arith.constant 5.120000e+02 : f32
    %25 = vector.broadcast %cst_17 : f32 to vector<1x1x1xf32>
    %26 = arith.divf %24, %25 : vector<1x1x1xf32>
    %27 = vector.broadcast %19 : vector<1x1x1xf32> to vector<1x1x512xf32>
    %28 = arith.subf %13, %27 : vector<1x1x512xf32>
    %cst_18 = arith.constant 9.99999974E-6 : f32
    %29 = vector.broadcast %cst_18 : f32 to vector<1x1x1xf32>
    %30 = arith.addf %26, %29 : vector<1x1x1xf32>
    %31 = math.rsqrt %30 : vector<1x1x1xf32>
    %32 = vector.broadcast %31 : vector<1x1x1xf32> to vector<1x1x512xf32>
    %33 = arith.mulf %28, %32 : vector<1x1x512xf32>
    %34 = vector.shape_cast %14 : vector<1x512xf32> to vector<1x1x512xf32>
    %35 = arith.mulf %33, %34 : vector<1x1x512xf32>
    %36 = vector.shape_cast %15 : vector<1x512xf32> to vector<1x1x512xf32>
    %37 = arith.addf %35, %36 : vector<1x1x512xf32>
    %38 = arith.truncf %37 : vector<1x1x512xf32> to vector<1x1x512xbf16>
    %c0_19 = arith.constant 0 : index
    %c0_20 = arith.constant 0 : index
    %39 = vector.load %arg5[%c0_19, %c0_20] : memref<512x768xbf16, #tpu.memory_space<vmem>>, vector<512x768xbf16>
    "tpu.trace_start"() <{level = 10 : i32, message = "gof,fd->god"}> : () -> ()
    %cst_21 = arith.constant dense<0.000000e+00> : vector<1x1x768xf32>
    %40 = tpu.matmul %38, %39, %cst_21 {dimension_numbers = #tpu.dot_dimension_numbers<[2], [0], [0, 1], [1], [0, 0, 0, 1, 1, 1], [], []>} : vector<1x1x512xbf16>, vector<512x768xbf16>, vector<1x1x768xf32> -> vector<1x1x768xf32>
    "tpu.trace_stop"() : () -> ()
    %c0_22 = arith.constant 0 : index
    %c0_23 = arith.constant 0 : index
    %41 = vector.load %arg6[%c0_22, %c0_23] : memref<1x768xf32, #tpu.memory_space<vmem>>, vector<1x768xf32>
    %42 = vector.shape_cast %41 : vector<1x768xf32> to vector<1x1x768xf32>
    %43 = arith.addf %40, %42 : vector<1x1x768xf32>
    %44 = vector.extract_strided_slice %43 {offsets = [0, 0, 0], sizes = [1, 1, 512], strides = [1, 1, 1]} : vector<1x1x768xf32> to vector<1x1x512xf32>
    %c0_24 = arith.constant 0 : index
    %c0_25 = arith.constant 0 : index
    %45 = vector.load %arg7[%c0_24, %c0_25] : memref<1x512xf32, #tpu.memory_space<vmem>>, vector<1x512xf32>
    %c0_26 = arith.constant 0 : index
    %c0_27 = arith.constant 0 : index
    %46 = vector.load %arg8[%c0_26, %c0_27] : memref<1x512xf32, #tpu.memory_space<vmem>>, vector<1x512xf32>
    %cst_28 = arith.constant dense<0.000000e+00> : vector<1x1xf32>
    %47 = vector.multi_reduction <add>, %44, %cst_28 [2] : vector<1x1x512xf32> to vector<1x1xf32>
    %48 = vector.shape_cast %47 : vector<1x1xf32> to vector<1x1x1xf32>
    %cst_29 = arith.constant 5.120000e+02 : f32
    %49 = vector.broadcast %cst_29 : f32 to vector<1x1x1xf32>
    %50 = arith.divf %48, %49 : vector<1x1x1xf32>
    %51 = vector.broadcast %50 : vector<1x1x1xf32> to vector<1x1x512xf32>
    %52 = arith.subf %44, %51 : vector<1x1x512xf32>
    %53 = arith.mulf %52, %52 : vector<1x1x512xf32>
    %cst_30 = arith.constant dense<0.000000e+00> : vector<1x1xf32>
    %54 = vector.multi_reduction <add>, %53, %cst_30 [2] : vector<1x1x512xf32> to vector<1x1xf32>
    %55 = vector.shape_cast %54 : vector<1x1xf32> to vector<1x1x1xf32>
    %cst_31 = arith.constant 5.120000e+02 : f32
    %56 = vector.broadcast %cst_31 : f32 to vector<1x1x1xf32>
    %57 = arith.divf %55, %56 : vector<1x1x1xf32>
    %58 = vector.broadcast %50 : vector<1x1x1xf32> to vector<1x1x512xf32>
    %59 = arith.subf %44, %58 : vector<1x1x512xf32>
    %cst_32 = arith.constant 9.99999974E-6 : f32
    %60 = vector.broadcast %cst_32 : f32 to vector<1x1x1xf32>
    %61 = arith.addf %57, %60 : vector<1x1x1xf32>
    %62 = math.rsqrt %61 : vector<1x1x1xf32>
    %63 = vector.broadcast %62 : vector<1x1x1xf32> to vector<1x1x512xf32>
    %64 = arith.mulf %59, %63 : vector<1x1x512xf32>
    %65 = vector.shape_cast %45 : vector<1x512xf32> to vector<1x1x512xf32>
    %66 = arith.mulf %64, %65 : vector<1x1x512xf32>
    %67 = vector.shape_cast %46 : vector<1x512xf32> to vector<1x1x512xf32>
    %68 = arith.addf %66, %67 : vector<1x1x512xf32>
    %cst_33 = arith.constant 0.000000e+00 : f32
    %69 = vector.broadcast %cst_33 : f32 to vector<1x1x512xf32>
    %70 = arith.maximumf %68, %69 : vector<1x1x512xf32>
    %71 = vector.extract_strided_slice %43 {offsets = [0, 0, 512], sizes = [1, 1, 256], strides = [1, 1, 1]} : vector<1x1x768xf32> to vector<1x1x256xf32>
    %c0_34 = arith.constant 0 : index
    %c0_35 = arith.constant 0 : index
    %72 = vector.load %arg9[%c0_34, %c0_35] : memref<1x256xf32, #tpu.memory_space<vmem>>, vector<1x256xf32>
    %c0_36 = arith.constant 0 : index
    %c0_37 = arith.constant 0 : index
    %73 = vector.load %arg10[%c0_36, %c0_37] : memref<1x256xf32, #tpu.memory_space<vmem>>, vector<1x256xf32>
    %cst_38 = arith.constant dense<0.000000e+00> : vector<1x1xf32>
    %74 = vector.multi_reduction <add>, %71, %cst_38 [2] : vector<1x1x256xf32> to vector<1x1xf32>
    %75 = vector.shape_cast %74 : vector<1x1xf32> to vector<1x1x1xf32>
    %cst_39 = arith.constant 2.560000e+02 : f32
    %76 = vector.broadcast %cst_39 : f32 to vector<1x1x1xf32>
    %77 = arith.divf %75, %76 : vector<1x1x1xf32>
    %78 = vector.broadcast %77 : vector<1x1x1xf32> to vector<1x1x256xf32>
    %79 = arith.subf %71, %78 : vector<1x1x256xf32>
    %80 = arith.mulf %79, %79 : vector<1x1x256xf32>
    %cst_40 = arith.constant dense<0.000000e+00> : vector<1x1xf32>
    %81 = vector.multi_reduction <add>, %80, %cst_40 [2] : vector<1x1x256xf32> to vector<1x1xf32>
    %82 = vector.shape_cast %81 : vector<1x1xf32> to vector<1x1x1xf32>
    %cst_41 = arith.constant 2.560000e+02 : f32
    %83 = vector.broadcast %cst_41 : f32 to vector<1x1x1xf32>
    %84 = arith.divf %82, %83 : vector<1x1x1xf32>
    %85 = vector.broadcast %77 : vector<1x1x1xf32> to vector<1x1x256xf32>
    %86 = arith.subf %71, %85 : vector<1x1x256xf32>
    %cst_42 = arith.constant 9.99999974E-6 : f32
    %87 = vector.broadcast %cst_42 : f32 to vector<1x1x1xf32>
    %88 = arith.addf %84, %87 : vector<1x1x1xf32>
    %89 = math.rsqrt %88 : vector<1x1x1xf32>
    %90 = vector.broadcast %89 : vector<1x1x1xf32> to vector<1x1x256xf32>
    %91 = arith.mulf %86, %90 : vector<1x1x256xf32>
    %92 = vector.shape_cast %72 : vector<1x256xf32> to vector<1x1x256xf32>
    %93 = arith.mulf %91, %92 : vector<1x1x256xf32>
    %94 = vector.shape_cast %73 : vector<1x256xf32> to vector<1x1x256xf32>
    %95 = arith.addf %93, %94 : vector<1x1x256xf32>
    %cst_43 = arith.constant 0.000000e+00 : f32
    %96 = vector.broadcast %cst_43 : f32 to vector<1x1x256xf32>
    %97 = arith.maximumf %95, %96 : vector<1x1x256xf32>
    %98 = arith.truncf %70 : vector<1x1x512xf32> to vector<1x1x512xbf16>
    %c0_44 = arith.constant 0 : index
    %c0_45 = arith.constant 0 : index
    %99 = vector.load %arg11[%c0_44, %c0_45] : memref<512x128xbf16, #tpu.memory_space<vmem>>, vector<512x128xbf16>
    "tpu.trace_start"() <{level = 10 : i32, message = "goh,hp->gop"}> : () -> ()
    %cst_46 = arith.constant dense<0.000000e+00> : vector<1x1x128xf32>
    %100 = tpu.matmul %98, %99, %cst_46 {dimension_numbers = #tpu.dot_dimension_numbers<[2], [0], [0, 1], [1], [0, 0, 0, 1, 1, 1], [], []>} : vector<1x1x512xbf16>, vector<512x128xbf16>, vector<1x1x128xf32> -> vector<1x1x128xf32>
    "tpu.trace_stop"() : () -> ()
    %c0_47 = arith.constant 0 : index
    %c0_48 = arith.constant 0 : index
    %101 = vector.load %arg12[%c0_47, %c0_48] : memref<1x128xf32, #tpu.memory_space<vmem>>, vector<1x128xf32>
    %102 = vector.shape_cast %101 : vector<1x128xf32> to vector<1x1x128xf32>
    %103 = arith.addf %100, %102 : vector<1x1x128xf32>
    %c0_49 = arith.constant 0 : index
    %c0_50 = arith.constant 0 : index
    %104 = vector.load %arg13[%c0_49, %c0_50] : memref<1x128xf32, #tpu.memory_space<vmem>>, vector<1x128xf32>
    %c0_51 = arith.constant 0 : index
    %c0_52 = arith.constant 0 : index
    %105 = vector.load %arg14[%c0_51, %c0_52] : memref<1x128xf32, #tpu.memory_space<vmem>>, vector<1x128xf32>
    %cst_53 = arith.constant dense<0.000000e+00> : vector<1x1xf32>
    %106 = vector.multi_reduction <add>, %103, %cst_53 [2] : vector<1x1x128xf32> to vector<1x1xf32>
    %107 = vector.shape_cast %106 : vector<1x1xf32> to vector<1x1x1xf32>
    %cst_54 = arith.constant 1.280000e+02 : f32
    %108 = vector.broadcast %cst_54 : f32 to vector<1x1x1xf32>
    %109 = arith.divf %107, %108 : vector<1x1x1xf32>
    %110 = vector.broadcast %109 : vector<1x1x1xf32> to vector<1x1x128xf32>
    %111 = arith.subf %103, %110 : vector<1x1x128xf32>
    %112 = arith.mulf %111, %111 : vector<1x1x128xf32>
    %cst_55 = arith.constant dense<0.000000e+00> : vector<1x1xf32>
    %113 = vector.multi_reduction <add>, %112, %cst_55 [2] : vector<1x1x128xf32> to vector<1x1xf32>
    %114 = vector.shape_cast %113 : vector<1x1xf32> to vector<1x1x1xf32>
    %cst_56 = arith.constant 1.280000e+02 : f32
    %115 = vector.broadcast %cst_56 : f32 to vector<1x1x1xf32>
    %116 = arith.divf %114, %115 : vector<1x1x1xf32>
    %117 = vector.broadcast %109 : vector<1x1x1xf32> to vector<1x1x128xf32>
    %118 = arith.subf %103, %117 : vector<1x1x128xf32>
    %cst_57 = arith.constant 9.99999974E-6 : f32
    %119 = vector.broadcast %cst_57 : f32 to vector<1x1x1xf32>
    %120 = arith.addf %116, %119 : vector<1x1x1xf32>
    %121 = math.rsqrt %120 : vector<1x1x1xf32>
    %122 = vector.broadcast %121 : vector<1x1x1xf32> to vector<1x1x128xf32>
    %123 = arith.mulf %118, %122 : vector<1x1x128xf32>
    %124 = vector.shape_cast %104 : vector<1x128xf32> to vector<1x1x128xf32>
    %125 = arith.mulf %123, %124 : vector<1x1x128xf32>
    %126 = vector.shape_cast %105 : vector<1x128xf32> to vector<1x1x128xf32>
    %127 = arith.addf %125, %126 : vector<1x1x128xf32>
    %c0_58 = arith.constant 0 : index
    %c0_59 = arith.constant 0 : index
    %c0_60 = arith.constant 0 : index
    %128 = vector.load %arg18[%c0_58, %c0_59, %c0_60] : memref<1x1x128xf32, #tpu.memory_space<vmem>>, vector<1x1x128xf32>
    tpu.vector_store %arg18[%c0_58, %c0_59, %c0_60], %127 {strides = array<i32>} : memref<1x1x128xf32, #tpu.memory_space<vmem>>, vector<1x1x128xf32>,
    %c0_61 = arith.constant 0 : index
    %c0_62 = arith.constant 0 : index
    %129 = vector.load %arg15[%c0_61, %c0_62] : memref<1x256xf32, #tpu.memory_space<vmem>>, vector<1x256xf32>
    %130 = vector.shape_cast %129 : vector<1x256xf32> to vector<1x1x256xf32>
    %131 = arith.mulf %97, %130 : vector<1x1x256xf32>
    %cst_63 = arith.constant dense<0.000000e+00> : vector<1x1xf32>
    %132 = vector.multi_reduction <add>, %131, %cst_63 [2] : vector<1x1x256xf32> to vector<1x1xf32>
    %133 = vector.shape_cast %132 : vector<1x1xf32> to vector<1x1x1xf32>
    %c0_64 = arith.constant 0 : index
    %c0_65 = arith.constant 0 : index
    %134 = vector.load %arg16[%c0_64, %c0_65] : memref<1x1xf32, #tpu.memory_space<vmem>>, vector<1x1xf32>
    %135 = vector.shape_cast %134 : vector<1x1xf32> to vector<1x1x1xf32>
    %136 = arith.addf %133, %135 : vector<1x1x1xf32>
    %c0_66 = arith.constant 0 : index
    %c0_67 = arith.constant 0 : index
    %c0_68 = arith.constant 0 : index
    %137 = vector.load %arg19[%c0_66, %c0_67, %c0_68] : memref<1x1x1xf32, #tpu.memory_space<vmem>>, vector<1x1x1xf32>
    tpu.vector_store %arg19[%c0_66, %c0_67, %c0_68], %136 {strides = array<i32>} : memref<1x1x1xf32, #tpu.memory_space<vmem>>, vector<1x1x1xf32>,
    return
  }
  func.func @transform_0(%arg0: i32) -> (i32, i32, i32) {
    %c0_i32 = arith.constant 0 : i32
    %c0_i32_0 = arith.constant 0 : i32
    %c0_i32_1 = arith.constant 0 : i32
    return %arg0, %c0_i32, %c0_i32_0 : i32, i32, i32
  }
  func.func @transform_1(%arg0: i32) -> (i32, i32, i32) {
    %c0_i32 = arith.constant 0 : i32
    %c0_i32_0 = arith.constant 0 : i32
    %c0_i32_1 = arith.constant 0 : i32
    return %arg0, %c0_i32, %c0_i32_0 : i32, i32, i32
  }
  func.func @transform_2(%arg0: i32) -> (i32, i32) {
    %c0_i32 = arith.constant 0 : i32
    %c0_i32_0 = arith.constant 0 : i32
    %c0_i32_1 = arith.constant 0 : i32
    return %c0_i32, %c0_i32_0 : i32, i32
  }
  func.func @transform_3(%arg0: i32) -> (i32, i32) {
    %c0_i32 = arith.constant 0 : i32
    %c0_i32_0 = arith.constant 0 : i32
    %c0_i32_1 = arith.constant 0 : i32
    return %c0_i32, %c0_i32_0 : i32, i32
  }
  func.func @transform_4(%arg0: i32) -> (i32, i32) {
    %c0_i32 = arith.constant 0 : i32
    %c0_i32_0 = arith.constant 0 : i32
    %c0_i32_1 = arith.constant 0 : i32
    return %c0_i32, %c0_i32_0 : i32, i32
  }
  func.func @transform_5(%arg0: i32) -> (i32, i32) {
    %c0_i32 = arith.constant 0 : i32
    %c0_i32_0 = arith.constant 0 : i32
    %c0_i32_1 = arith.constant 0 : i32
    return %c0_i32, %c0_i32_0 : i32, i32
  }
  func.func @transform_6(%arg0: i32) -> (i32, i32) {
    %c0_i32 = arith.constant 0 : i32
    %c0_i32_0 = arith.constant 0 : i32
    %c0_i32_1 = arith.constant 0 : i32
    return %c0_i32, %c0_i32_0 : i32, i32
  }
  func.func @transform_7(%arg0: i32) -> (i32, i32) {
    %c0_i32 = arith.constant 0 : i32
    %c0_i32_0 = arith.constant 0 : i32
    %c0_i32_1 = arith.constant 0 : i32
    return %c0_i32, %c0_i32_0 : i32, i32
  }
  func.func @transform_8(%arg0: i32) -> (i32, i32) {
    %c0_i32 = arith.constant 0 : i32
    %c0_i32_0 = arith.constant 0 : i32
    %c0_i32_1 = arith.constant 0 : i32
    return %c0_i32, %c0_i32_0 : i32, i32
  }
  func.func @transform_9(%arg0: i32) -> (i32, i32) {
    %c0_i32 = arith.constant 0 : i32
    %c0_i32_0 = arith.constant 0 : i32
    %c0_i32_1 = arith.constant 0 : i32
    return %c0_i32, %c0_i32_0 : i32, i32
  }
  func.func @transform_10(%arg0: i32) -> (i32, i32) {
    %c0_i32 = arith.constant 0 : i32
    %c0_i32_0 = arith.constant 0 : i32
    %c0_i32_1 = arith.constant 0 : i32
    return %c0_i32, %c0_i32_0 : i32, i32
  }
  func.func @transform_11(%arg0: i32) -> (i32, i32) {
    %c0_i32 = arith.constant 0 : i32
    %c0_i32_0 = arith.constant 0 : i32
    %c0_i32_1 = arith.constant 0 : i32
    return %c0_i32, %c0_i32_0 : i32, i32
  }
  func.func @transform_12(%arg0: i32) -> (i32, i32) {
    %c0_i32 = arith.constant 0 : i32
    %c0_i32_0 = arith.constant 0 : i32
    %c0_i32_1 = arith.constant 0 : i32
    return %c0_i32, %c0_i32_0 : i32, i32
  }
  func.func @transform_13(%arg0: i32) -> (i32, i32) {
    %c0_i32 = arith.constant 0 : i32
    %c0_i32_0 = arith.constant 0 : i32
    %c0_i32_1 = arith.constant 0 : i32
    return %c0_i32, %c0_i32_0 : i32, i32
  }
  func.func @transform_14(%arg0: i32) -> (i32, i32) {
    %c0_i32 = arith.constant 0 : i32
    %c0_i32_0 = arith.constant 0 : i32
    %c0_i32_1 = arith.constant 0 : i32
    return %c0_i32, %c0_i32_0 : i32, i32
  }
  func.func @transform_15(%arg0: i32) -> (i32, i32) {
    %c0_i32 = arith.constant 0 : i32
    %c0_i32_0 = arith.constant 0 : i32
    %c0_i32_1 = arith.constant 0 : i32
    return %c0_i32, %c0_i32_0 : i32, i32
  }
  func.func @transform_16(%arg0: i32) -> (i32, i32, i32) {
    %c0_i32 = arith.constant 0 : i32
    %c0_i32_0 = arith.constant 0 : i32
    %c0_i32_1 = arith.constant 0 : i32
    return %arg0, %c0_i32, %c0_i32_0 : i32, i32, i32
  }
  func.func @transform_17(%arg0: i32) -> (i32, i32, i32) {
    %c0_i32 = arith.constant 0 : i32
    %c0_i32_0 = arith.constant 0 : i32
    %c0_i32_1 = arith.constant 0 : i32
    return %arg0, %c0_i32, %c0_i32_0 : i32, i32, i32
  }
  func.func @transform_18(%arg0: i32) -> (i32, i32, i32) {
    %c0_i32 = arith.constant 0 : i32
    %c0_i32_0 = arith.constant 0 : i32
    %c0_i32_1 = arith.constant 0 : i32
    return %arg0, %c0_i32, %c0_i32_0 : i32, i32, i32
  }
}

</mosaic_0001>

<bundles_post_ra>
// kernel: mil_forward.3
= control target key start
LH: loop header
LB: loop body
LE: loop exit
PB: predicated region body
PF: predicated region fallthrough
CT: control target
= control target key end

     0   :  { %s4825_s0 = inlined_call_operand.vmem [shape: f32[2,1,8], index: 0, kind: input, shape index: {}]   ;;  %s4826_s1 = inlined_call_operand.vmem [shape: bf16[2,8,512], index: 1, kind: input, shape index: {}]   ;;  %s4827_s2 = inlined_call_operand.vmem [shape: f32[1,512], index: 2, kind: input, shape index: {}]   ;;  %s4828_s3 = inlined_call_operand.vmem [shape: f32[1,512], index: 3, kind: input, shape index: {}]   ;;  %s4829_s4 = inlined_call_operand.vmem [shape: bf16[512,768], index: 4, kind: input, shape index: {}]   ;;  %s4830_s5 = inlined_call_operand.vmem [shape: f32[1,768], index: 5, kind: input, shape index: {}]   ;;  %s4831_s6 = inlined_call_operand.vmem [shape: f32[1,512], index: 6, kind: input, shape index: {}]   ;;  %s4832_s7 = inlined_call_operand.vmem [shape: f32[1,512], index: 7, kind: input, shape index: {}]   ;;  %s4833_s8 = inlined_call_operand.vmem [shape: f32[1,256], index: 8, kind: input, shape index: {}]   ;;  %s4834_s9 = inlined_call_operand.vmem [shape: f32[1,256], index: 9, kind: input, shape index: {}]   ;;  %s4835_s10 = inlined_call_operand.vmem [shape: bf16[512,128], index: 10, kind: input, shape index: {}]   ;;  %s4836_s11 = inlined_call_operand.vmem [shape: f32[1,128], index: 11, kind: input, shape index: {}]   ;;  %s4837_s12 = inlined_call_operand.vmem [shape: f32[1,128], index: 12, kind: input, shape index: {}]   ;;  %s4838_s13 = inlined_call_operand.vmem [shape: f32[1,128], index: 13, kind: input, shape index: {}]   ;;  %s4839_s14 = inlined_call_operand.vmem [shape: f32[1,256], index: 14, kind: input, shape index: {}]   ;;  %s4840_s15 = inlined_call_operand.<no memory space> [shape: f32[1,1], index: 15, kind: input, shape index: {}]   ;;  %s4841_s16 = inlined_call_operand.hbm [shape: f32[2,1,8], index: 16, kind: output, shape index: {0}]   ;;  %s4842_s17 = inlined_call_operand.hbm [shape: f32[2,1,128], index: 17, kind: output, shape index: {1}]   ;;  %s4843_s18 = inlined_call_operand.vmem [shape: f32[2,1,1], index: 18, kind: output, shape index: {2}]  }
   0x1   :  { %4851 = sst [smem:[#allocation14_spill]] %s4825_s0  ;;  %v24_v0 = vstv %s4840_s15 }
   0x2   :  { %4852 = sst [smem:[#allocation15_spill]] %s4826_s1  ;;  %25 = vst [vmem:[#allocation2] sm:$0x1] %v24_v0 }
   0x3   :  { %4853 = sst [smem:[#allocation16_spill]] %s4827_s2 }
   0x4   :  { %26 = vsyncpa [#allocation4], 0 }
   0x5   :  { %28 = vsyncpa [#allocation4 + $0x1], 0 }
   0x6   :  { %29 = vsyncpa [#allocation6], 0 }
   0x7   :  { %31 = vsyncpa [#allocation6 + $0x1], 0  ;;  %s3810_s29 = smov 0   ;;  %s3812_s30 = smov 0  }
   0x8   :  { %s3814_s0 = smov 0   ;;  %s3816_s19 = smov 0  }
   0x9 LB: > { %4854 = sst [smem:[#allocation9_spill]] %s3699_s30  ;;  %s3831_s15 = sadd.s32 4294967295, %s3707_s19   ;;  %s3707_s19 = sphi %s3816_s19, %s4867_s19   ;;  %s3703_s0 = sphi %s3814_s0, %s4870_s0   ;;  %s3699_s30 = sphi %s3812_s30, %s4869_s30   ;;  %s3695_s29 = sphi %s3810_s29, %s4868_s29  }
   0xa   : > { %4855 = sst [smem:[#allocation10_spill]] %s3703_s0  ;;  %s2927_s1 = sadd.s32 4294967294, %s3707_s19  }
   0xb   : > { %s3835_s20 = sadd.s32 1, %s3707_s19   ;;  %s390_s21 = sadd.s32 1, %s3703_s0 }
   0xc   : > { %4856 = sst [smem:[#allocation11_spill]] %s3835_s20  ;;  %s387_s22 = ssub.s32 %s3707_s19, %s3835_s20 }
   0xd   : > { %p400_p0 = scmp.ne.s32.totalorder %s3703_s0, %s3699_s30  ;;  %p388_p1 = scmp.eq.s32.totalorder %s387_s22, 0 }
   0xe   : > { %p401_p2 = scmp.eq.s32.totalorder %s3831_s15, 1  ;;  %p406_p3 = scmp.ne.s32.totalorder %s3699_s30, %s3695_s29 }
   0xf   : > { %p407_p4 = scmp.eq.s32.totalorder %s2927_s1, 1  ;;  %p2930_p7 = scmp.ge.s32.totalorder %s3707_s19, 1 }
  0x10   : > { %s3846_s2 = scalar_select %p388_p1, %s3703_s0, %s390_s21  }
  0x11   : > { %p3848_p5 = por %p401_p2, %p400_p0  ;;  %p3852_p6 = por %p407_p4, %p406_p3 }
  0x12   : > { %4857 = sst [smem:[#allocation12_spill]] %s3846_s2  ;;  %p533_p8 = scmp.lt.s32.totalorder %s3707_s19, 3 }
  0x13   : > { %s4859_s24 = scalar_select %p3852_p6, 1, 0 }
  0x14   : > { %p534_p9 = pnand %p2930_p7, %p533_p8 }
  0x15   : > { %4860 = sst [smem:[#allocation13_spill]] %s4859_s24  ;;  %p596_p10 = scmp.lt.s32.totalorder (!%p534_p9), %s3831_s15, 1  ;;  %vm609_vm0 = vcmask (!%p534_p9), 57344   ;;  %v3709_v8 = vmov (!%p534_p9), 0   ;;  %vm639_vm1 = vcmask (!%p534_p9), 1043456   ;;  %vm635_vm2 = vcmask (!%p534_p9), 64512  }
  0x16   : > { %537 = sbr.rel (%p534_p9) target bundleno = 2080 (0x820), region = 84  ;;  %s4861_s28 = sld [smem:[#allocation14_spill]] (!%p534_p9)  ;;  %684 = vmatprep.mubr.bf16.mxu1 (!%p534_p9), %v3709_v8  ;;  %vm736_vm3 = vcmask (!%p534_p9), 1040384   ;;  %v3281_v36 = vld [vmem:[%s4829_s4 + $0x4] ss:$24 sps:$4 sm:$0xff] (!%p534_p9)   ;;  %vm2778_vm4 = vcmask (!%p534_p9), 0  }
  0x17   : > { %s4862_s0 = sld [smem:[#allocation15_spill]] (!%p534_p9)  ;;  %s3873_s26 = sand.u32 (!%p534_p9), 1, %s3699_s30   ;;  %v3283_v37 = vld [vmem:[%s4829_s4 + $0x8] ss:$24 sps:$4 sm:$0xff] (!%p534_p9)   ;;  %v3285_v38 = vld [vmem:[%s4829_s4 + $0xc] ss:$24 sps:$4 sm:$0xff] (!%p534_p9)   ;;  %2010 = vmatprep.subr.bf16.mxu0 (!%p534_p9), %v3281_v36 }
  0x18   : > { %v3286_v39 = vld [vmem:[%s4829_s4] ss:$24 sps:$4 sm:$0xff] (!%p534_p9)   ;;  %v3287_v40 = vld [vmem:[%s4829_s4 + $0x34] ss:$24 sps:$4 sm:$0xff] (!%p534_p9)   ;;  %v3292_v43 = vld [vmem:[%s4829_s4 + $0x30] ss:$24 sps:$4 sm:$0xff] (!%p534_p9)  }
  0x19   : > { %v3291_v41 = vld [vmem:[%s4829_s4 + $0x3c] ss:$24 sps:$4 sm:$0xff] (!%p534_p9)   ;;  %2011 = vmatpush1.bf16.msra.mxu0 (!%p534_p9), %v3286_v39  ;;  %v3289_v42 = vld [vmem:[%s4829_s4 + $0x38] ss:$24 sps:$4 sm:$0xff] (!%p534_p9)   ;;  %v3297_v45 = vld [vmem:[%s4829_s4 + $0x6c] ss:$24 sps:$4 sm:$0xff] (!%p534_p9)  }
  0x1a   : > { %2012 = vmatprep.subr.bf16.mxu0 (!%p534_p9), %v3287_v40  ;;  %v3293_v44 = vld [vmem:[%s4829_s4 + $0x64] ss:$24 sps:$4 sm:$0xff] (!%p534_p9)   ;;  %v3295_v46 = vld [vmem:[%s4829_s4 + $0x68] ss:$24 sps:$4 sm:$0xff] (!%p534_p9)   ;;  %v3299_v48 = vld [vmem:[%s4829_s4 + $0x94] ss:$24 sps:$4 sm:$0xff] (!%p534_p9)  }
  0x1b   : > { %v3298_v47 = vld [vmem:[%s4829_s4 + $0x60] ss:$24 sps:$4 sm:$0xff] (!%p534_p9)   ;;  %v3303_v49 = vld [vmem:[%s4829_s4 + $0x9c] ss:$24 sps:$4 sm:$0xff] (!%p534_p9)   ;;  %v3304_v51 = vld [vmem:[%s4829_s4 + $0x90] ss:$24 sps:$4 sm:$0xff] (!%p534_p9)  }
  0x1c   : > { %v3301_v50 = vld [vmem:[%s4829_s4 + $0x98] ss:$24 sps:$4 sm:$0xff] (!%p534_p9)   ;;  %v3305_v52 = vld [vmem:[%s4829_s4 + $0xc4] ss:$24 sps:$4 sm:$0xff] (!%p534_p9)   ;;  %v3307_v54 = vld [vmem:[%s4829_s4 + $0xc8] ss:$24 sps:$4 sm:$0xff] (!%p534_p9)  }
  0x1d   : > { %s3860_s25 = scalar_select %p596_p10, %s3831_s15, 1  ;;  %2013 = vmatpush1.bf16.msra.mxu0 %v3292_v43  ;;  %v3309_v53 = vld [vmem:[%s4829_s4 + $0xcc] ss:$24 sps:$4 sm:$0xff]   ;;  %v3310_v55 = vld [vmem:[%s4829_s4 + $0xc0] ss:$24 sps:$4 sm:$0xff]  }
  0x1e   : > { %2014 = vmatprep.subr.bf16.mxu0 %v3293_v44  ;;  %v3311_v56 = vld [vmem:[%s4829_s4 + $0xf4] ss:$24 sps:$4 sm:$0xff]   ;;  %v3313_v58 = vld [vmem:[%s4829_s4 + $0xf8] ss:$24 sps:$4 sm:$0xff]   ;;  %v3317_v60 = vld [vmem:[%s4829_s4 + $0x124] ss:$24 sps:$4 sm:$0xff]  }
  0x1f   : > { %s598_s1 = scalar_lea.vmem %s4861_s28, %s3860_s25  ;;  %s3169_s21 = sshll.u32 %s3860_s25, 4  ;;  %v3315_v57 = vld [vmem:[%s4829_s4 + $0xfc] ss:$24 sps:$4 sm:$0xff]   ;;  %v3316_v59 = vld [vmem:[%s4829_s4 + $0xf0] ss:$24 sps:$4 sm:$0xff]  }
  0x20   : > { %v608_v1 = vld [vmem:[%s598_s1] sm:$0x1]  ;;  %s603_s20 = scalar_lea.vmem %s4862_s0, %s3169_s21  ;;  %s4847_s0 = scalar_lea.vmem [#allocation3], %s3873_s26  ;;  %v3321_v61 = vld [vmem:[%s4829_s4 + $0x12c] ss:$24 sps:$4 sm:$0xff]  }
  0x21   : > { %v610_v2 = vsel %vm609_vm0, %v608_v1, -inf  ;;  %v623_v9 = vld [vmem:[%s603_s20] sm:$0xff]  ;;  %v624_v10 = vld [vmem:[%s603_s20 + $0x8] sm:$0xff]  ;;  %2015 = vmatpush1.bf16.msra.mxu0 %v3298_v47  ;;  %v3361_v43 = vld [vmem:[%s4829_s4 + $0x278] ss:$24 sps:$4 sm:$0xff]   ;;  %s4863_s1 = sld [smem:[#allocation16_spill]]  ;;  %s606_s22 = scalar_lea.vmem %s4843_s18, %s3860_s25 }
  0x22   : > { %611 = vmax.xlane.f32.xlu0 %v610_v2  ;;  %v2934_v11 = vcombine.high %v623_v9, %v623_v9  ;;  %v2936_v12 = vcombine.high %v624_v10, %v624_v10  ;;  %v2933_v13 = vcombine.low %v623_v9, %v623_v9  ;;  %v2935_v15 = vcombine.low %v624_v10, %v624_v10  ;;  %v3319_v62 = vld [vmem:[%s4829_s4 + $0x128] ss:$24 sps:$4 sm:$0xff]   ;;  %v3323_v0 = vld [vmem:[%s4829_s4 + $0x154] ss:$24 sps:$4 sm:$0xff]   ;;  %v3325_v2 = vld [vmem:[%s4829_s4 + $0x158] ss:$24 sps:$4 sm:$0xff]  }
  0x23   : > { %2016 = vmatprep.subr.bf16.mxu0 %v3299_v48  ;;  %v3322_v63 = vld [vmem:[%s4829_s4 + $0x120] ss:$24 sps:$4 sm:$0xff]   ;;  %v3339_v9 = vld [vmem:[%s4829_s4 + $0x1bc] ss:$24 sps:$4 sm:$0xff]   ;;  %v3352_v36 = vld [vmem:[%s4829_s4 + $0x210] ss:$24 sps:$4 sm:$0xff]  }
  0x24   : > { %2937 = vmatprep.subr.msk.bf16.mxu1 %vm639_vm1, %v2934_v11  ;;  %v641_v14 = vsel %vm639_vm1, %v2933_v13, 0  ;;  %v647_v16 = vsel %vm639_vm1, %v2935_v15, 0  ;;  %v3337_v10 = vld [vmem:[%s4829_s4 + $0x1b8] ss:$24 sps:$4 sm:$0xff]   ;;  %v3345_v13 = vld [vmem:[%s4829_s4 + $0x1ec] ss:$24 sps:$4 sm:$0xff]  }
  0x25   : > { %653 = vmatpush1.bf16.msra.mxu1 %v641_v14  ;;  %2017 = vmatpush1.bf16.msra.mxu0 %v3304_v51  ;;  %v3340_v11 = vld [vmem:[%s4829_s4 + $0x1b0] ss:$24 sps:$4 sm:$0xff]   ;;  %v3357_v39 = vld [vmem:[%s4829_s4 + $0x24c] ss:$24 sps:$4 sm:$0xff]   ;;  %v3358_v40 = vld [vmem:[%s4829_s4 + $0x240] ss:$24 sps:$4 sm:$0xff]  }
  0x26   : > { %2939 = vmatprep.subr.msk.bf16.mxu1 %vm639_vm1, %v2936_v12  ;;  %2018 = vmatprep.subr.bf16.mxu0 %v3305_v52  ;;  %v3341_v12 = vld [vmem:[%s4829_s4 + $0x1e4] ss:$24 sps:$4 sm:$0xff]   ;;  %v3343_v14 = vld [vmem:[%s4829_s4 + $0x1e8] ss:$24 sps:$4 sm:$0xff]   ;;  %v3373_v51 = vld [vmem:[%s4829_s4 + $0x2d8] ss:$24 sps:$4 sm:$0xff]  }
  0x27   : > { %v3364_v44 = vld [vmem:[%s4829_s4 + $0x270] ss:$24 sps:$4 sm:$0xff]   ;;  %v3370_v48 = vld [vmem:[%s4829_s4 + $0x2a0] ss:$24 sps:$4 sm:$0xff]   ;;  %s4850_s20 = sshll.u32 %s3831_s15, 4  ;;  %s2781_s30 = scalar_lea.sflag [#allocation4], %s3873_s26 }
  0x28   : > { %v3367_v47 = vld [vmem:[%s4829_s4 + $0x2a8] ss:$24 sps:$4 sm:$0xff]   ;;  %s4748_s28 = scalar_lea.hbm %s4841_s16, %s4850_s20  ;;  %s3710_s24 = smov [#allocation3]  }
  0x29   : > { %2019 = vmatpush1.bf16.msra.mxu0 %v3310_v55  ;;  %v3376_v52 = vld [vmem:[%s4829_s4 + $0x2d0] ss:$24 sps:$4 sm:$0xff]  }
  0x2a   : > { %2020 = vmatprep.subr.bf16.mxu0 %v3311_v56 }
  0x2d   : > { %2021 = vmatpush1.bf16.msra.mxu0 %v3316_v59 }
  0x2e   : > { %2022 = vmatprep.subr.bf16.mxu0 %v3317_v60 }
  0x31   : > { %2023 = vmatpush1.bf16.msra.mxu0 %v3322_v63 }
  0x32   : > { %2024 = vmatprep.subr.bf16.mxu0 %v3323_v0  ;;  %v734_v0 = vld [vmem:[%s4863_s1] sm:$0xf]  ;;  %s4864_s1 = scalar_lea.vmem [#allocation3], %s3873_s26 }
  0x33   : > { %s2800_s21 = sshll.u32 %s4864_s1, 4  ;;  %s2801_s21 = int_to_ptr.vmem [resolvable:$true] %s2800_s21 }
  0x34   : > { %s3613_s25 = scalar_lea.vmem %s2801_s21, 16 }
  0x35   : > { %p3614_p11 = scmp.ne.s32.totalorder %s2801_s21, %s3613_s25 }
  0x37   : > { %p3615_p12 = pnand %p3614_p11, %p3848_p5 }
  0x39   : > { %p3616_p13 = pneg %p3615_p12 }
  0xaf   : > { %v612_v3 = vpop.xlane.xlu0 %611 }
  0xb0   : > { %v613_v4 = vsub.f32 %v608_v1, %v612_v3  ;;  %v3327_v1 = vld [vmem:[%s4829_s4 + $0x15c] ss:$24 sps:$4 sm:$0xff]   ;;  %v3328_v3 = vld [vmem:[%s4829_s4 + $0x150] ss:$24 sps:$4 sm:$0xff]  }
  0xb1   : > { %2025 = vmatpush1.bf16.msra.mxu0 %v3328_v3 }
  0xb2   : > { %v614_v5 = vmul.f32 1.442695, %v613_v4  ;;  %v3329_v4 = vld [vmem:[%s4829_s4 + $0x184] ss:$24 sps:$4 sm:$0xff]  }
  0xb3   : > { %2026 = vmatprep.subr.bf16.mxu0 %v3329_v4 }
  0xb4   : > { %3601 = vpow2.f32 %v614_v5  ;;  %v3333_v5 = vld [vmem:[%s4829_s4 + $0x18c] ss:$24 sps:$4 sm:$0xff]  }
  0xbe   : > { %v3602_v6 = vpop.eup %3601 }
  0xbf   : > { %v616_v7 = vsel %vm609_vm0, %v3602_v6, 0.0 }
  0xc0   : > { %617 = vadd.xlane.f32.xlu0 %v616_v7  ;;  %v3334_v7 = vld [vmem:[%s4829_s4 + $0x180] ss:$24 sps:$4 sm:$0xff]  }
  0xc1   : > { %2027 = vmatpush1.bf16.msra.mxu0 %v3334_v7 }
 0x14d   : > { %v618_v17 = vpop.xlane.xlu0 %617 }
 0x14e   : > { %3603 = vrcp.f32 %v618_v17 }
 0x158   : > { %v3604_v18 = vpop.eup %3603 }
 0x159   : > { %v620_v19 = vmul.f32 %v3604_v18, %v3602_v6  ;;  %v3331_v6 = vld [vmem:[%s4829_s4 + $0x188] ss:$24 sps:$4 sm:$0xff]  }
 0x15b   : > { %v622_v20 = vpack.c.bf16 %v620_v19, %v620_v19  ;;  %621 = vst.msk [vmem:[%s4847_s0] sm:$0x1] %vm609_vm0, %v620_v19  ;;  %s3617_s0 = sshll.u32 %s3710_s24, 4  ;;  %s3618_s0 = int_to_ptr.vmem [resolvable:$false] %s3617_s0 }
 0x15c   : > { %p3620_p0 = scmp.lt.s32.totalorder %s2801_s21, %s3618_s0 }
 0x15d   : > { %2938 = vmatmul.mubr.msk.bf16.vlgmr.msra.gmra.mrb[0].mxu1 %vm635_vm2, %v622_v20 }
 0x15e   : > { %694 = vmatpush1.bf16.msra.mxu1 %v647_v16  ;;  %725 = vmatprep.mubr.bf16.mxu1 %v3709_v8  ;;  %v3335_v8 = vld [vmem:[%s4829_s4 + $0x1b4] ss:$24 sps:$4 sm:$0xff]  }
 0x15f   : > { %2092 = vmatprep.subr.bf16.mxu1 %v3285_v38  ;;  %2028 = vmatprep.subr.bf16.mxu0 %v3335_v8  ;;  %v3355_v38 = vld [vmem:[%s4829_s4 + $0x248] ss:$24 sps:$4 sm:$0xff]  }
 0x160   : > { %2029 = vmatpush1.bf16.msra.mxu0 %v3340_v11 }
 0x161   : > { %2030 = vmatprep.subr.bf16.mxu0 %v3341_v12 }
 0x165   : > { %2940 = vmatmul.mubr.msk.bf16.vlgmr.msra.gmra.mrb[4].mxu1 %vm635_vm2, %v622_v20 }
 0x166   : > { %2093 = vmatpush1.bf16.msra.mxu1 %v3283_v37  ;;  %v3353_v37 = vld [vmem:[%s4829_s4 + $0x244] ss:$24 sps:$4 sm:$0xff]  }
 0x167   : > { %2094 = vmatprep.subr.bf16.mxu1 %v3291_v41  ;;  %v3359_v41 = vld [vmem:[%s4829_s4 + $0x274] ss:$24 sps:$4 sm:$0xff]  }
 0x16a   : > { %2095 = vmatpush1.bf16.msra.mxu1 %v3289_v42  ;;  %v3363_v42 = vld [vmem:[%s4829_s4 + $0x27c] ss:$24 sps:$4 sm:$0xff]  }
 0x16b   : > { %2096 = vmatprep.subr.bf16.mxu1 %v3297_v45  ;;  %v3365_v45 = vld [vmem:[%s4829_s4 + $0x2a4] ss:$24 sps:$4 sm:$0xff]  }
 0x16e   : > { %2097 = vmatpush1.bf16.msra.mxu1 %v3295_v46  ;;  %v3369_v46 = vld [vmem:[%s4829_s4 + $0x2ac] ss:$24 sps:$4 sm:$0xff]  }
 0x16f   : > { %2098 = vmatprep.subr.bf16.mxu1 %v3303_v49  ;;  %v3371_v49 = vld [vmem:[%s4829_s4 + $0x2d4] ss:$24 sps:$4 sm:$0xff]  }
 0x172   : > { %2099 = vmatpush1.bf16.msra.mxu1 %v3301_v50  ;;  %v3375_v50 = vld [vmem:[%s4829_s4 + $0x2dc] ss:$24 sps:$4 sm:$0xff]  }
 0x173   : > { %2100 = vmatprep.subr.bf16.mxu1 %v3309_v53  ;;  %v3379_v53 = vld [vmem:[%s4829_s4 + $0x304] ss:$24 sps:$4 sm:$0xff]  }
 0x176   : > { %2101 = vmatpush1.bf16.msra.mxu1 %v3307_v54  ;;  %v3382_v54 = vld [vmem:[%s4829_s4 + $0x30c] ss:$24 sps:$4 sm:$0xff]  }
 0x177   : > { %2102 = vmatprep.subr.bf16.mxu1 %v3315_v57  ;;  %v773_v57 = vlaneseq }
 0x179   : > { %v4117_v59 = vshrl.u32 %v773_v57, 7  ;;  %v3430_v57 = vld [vmem:[%s4829_s4 + $0x48c] ss:$24 sps:$4 sm:$0xff]  }
 0x17a   : > { %2103 = vmatpush1.bf16.msra.mxu1 %v3313_v58 }
 0x17b   : > { %2104 = vmatprep.subr.bf16.mxu1 %v3321_v61  ;;  %v4120_v60 = vsub.s32 1, %v4117_v59  ;;  %v4123_v61 = vsub.s32 0, %v4117_v59  ;;  %v4129_v63 = vsub.s32 2, %v4117_v59 }
 0x17d   : > { %v776_v3 = vrot.slane %v734_v0, %v4123_v61 }
 0x17e   : > { %2105 = vmatpush1.bf16.msra.mxu1 %v3319_v62  ;;  %v4126_v62 = vsub.s32 3, %v4117_v59 }
 0x17f   : > { %2106 = vmatprep.subr.bf16.mxu1 %v3327_v1  ;;  %v735_v1 = vld [vmem:[%s4828_s3] sm:$0xf] }
 0x180   : > { %v788_v4 = vrot.slane %v734_v0, %v4126_v62  ;;  %v805_v7 = vrot.slane %v735_v1, %v4120_v60  ;;  %v801_v8 = vrot.slane %v735_v1, %v4123_v61 }
 0x182   : > { %2107 = vmatpush1.bf16.msra.mxu1 %v3325_v2  ;;  %v780_v2 = vrot.slane %v734_v0, %v4120_v60 }
 0x183   : > { %2108 = vmatprep.subr.bf16.mxu1 %v3333_v5  ;;  %v784_v5 = vrot.slane %v734_v0, %v4129_v63  ;;  %v3428_v0 = vld [vmem:[%s4829_s4 + $0x488] ss:$24 sps:$4 sm:$0xff]  }
 0x186   : > { %2109 = vmatpush1.bf16.msra.mxu1 %v3331_v6 }
 0x187   : > { %2110 = vmatprep.subr.bf16.mxu1 %v3339_v9  ;;  %v809_v9 = vrot.slane %v735_v1, %v4129_v63 }
 0x18a   : > { %2111 = vmatpush1.bf16.msra.mxu1 %v3337_v10 }
 0x18b   : > { %2112 = vmatprep.subr.bf16.mxu1 %v3345_v13 }
 0x18e   : > { %2113 = vmatpush1.bf16.msra.mxu1 %v3343_v14  ;;  %v813_v14 = vrot.slane %v735_v1, %v4126_v62  ;;  %v3433_v1 = vld [vmem:[%s4829_s4 + $0x4b4] ss:$24 sps:$4 sm:$0xff]  }
 0x230   : > { %v3879_v21 = vpop.f32.mrb[0].mxu1 }
 0x231   : > { %v737_v22 = vsel %vm736_vm3, %v3879_v21, 0.0  ;;  %v3883_v23 = vpop.f32.mrb[1].mxu1 }
 0x232   : > { %v738_v24 = vsel %vm736_vm3, %v3883_v23, 0.0  ;;  %v690_v25 = vpop.f32.mrb[2].mxu1 }
 0x233   : > { %v739_v26 = vadd.f32 %v738_v24, %v737_v22  ;;  %v691_v27 = vpop.f32.mrb[3].mxu1 }
 0x238   : > { %v3887_v28 = vpop.f32.mrb[4].mxu1 }
 0x239   : > { %v740_v29 = vsel %vm736_vm3, %v3887_v28, 0.0  ;;  %v3891_v30 = vpop.f32.mrb[5].mxu1 }
 0x23a   : > { %v731_v31 = vpop.f32.mrb[6].mxu1  ;;  %v741_v32 = vadd.f32 %v740_v29, %v739_v26  ;;  %v742_v33 = vsel %vm736_vm3, %v3891_v30, 0.0 }
 0x23b   : > { %v732_v34 = vpop.f32.mrb[7].mxu1 }
 0x23c   : > { %v743_v35 = vadd.f32 %v742_v33, %v741_v32  ;;  %v3346_v32 = vld [vmem:[%s4829_s4 + $0x1e0] ss:$24 sps:$4 sm:$0xff]   ;;  %v3347_v33 = vld [vmem:[%s4829_s4 + $0x214] ss:$24 sps:$4 sm:$0xff]  }
 0x23d   : > { %2031 = vmatpush1.bf16.msra.mxu0 %v3346_v32  ;;  %v3351_v34 = vld [vmem:[%s4829_s4 + $0x21c] ss:$24 sps:$4 sm:$0xff]  }
 0x23e   : > { %744 = vadd.xlane.f32.xlu1 %v743_v35  ;;  %v3349_v35 = vld [vmem:[%s4829_s4 + $0x218] ss:$24 sps:$4 sm:$0xff]   ;;  %2032 = vmatprep.subr.bf16.mxu0 %v3347_v33  ;;  %v3391_v32 = vld [vmem:[%s4829_s4 + $0x364] ss:$24 sps:$4 sm:$0xff]  }
 0x23f   : > { %2114 = vmatprep.subr.bf16.mxu1 %v3351_v34  ;;  %v3394_v33 = vld [vmem:[%s4829_s4 + $0x36c] ss:$24 sps:$4 sm:$0xff]   ;;  %v3389_v34 = vld [vmem:[%s4829_s4 + $0x360] ss:$24 sps:$4 sm:$0xff]  }
 0x240   : > { %2115 = vmatpush1.bf16.msra.mxu1 %v3349_v35  ;;  %v3392_v35 = vld [vmem:[%s4829_s4 + $0x368] ss:$24 sps:$4 sm:$0xff]  }
 0x241   : > { %2033 = vmatpush1.bf16.msra.mxu0 %v3352_v36  ;;  %2116 = vmatprep.subr.bf16.mxu1 %v3357_v39  ;;  %v3397_v36 = vld [vmem:[%s4829_s4 + $0x394] ss:$24 sps:$4 sm:$0xff]   ;;  %v3398_v39 = vld [vmem:[%s4829_s4 + $0x398] ss:$24 sps:$4 sm:$0xff]  }
 0x242   : > { %2034 = vmatprep.subr.bf16.mxu0 %v3353_v37  ;;  %v3400_v37 = vld [vmem:[%s4829_s4 + $0x39c] ss:$24 sps:$4 sm:$0xff]  }
 0x244   : > { %2117 = vmatpush1.bf16.msra.mxu1 %v3355_v38  ;;  %v3395_v38 = vld [vmem:[%s4829_s4 + $0x390] ss:$24 sps:$4 sm:$0xff]  }
 0x245   : > { %2035 = vmatpush1.bf16.msra.mxu0 %v3358_v40  ;;  %2118 = vmatprep.subr.bf16.mxu1 %v3363_v42  ;;  %v3403_v40 = vld [vmem:[%s4829_s4 + $0x3c4] ss:$24 sps:$4 sm:$0xff]   ;;  %v3401_v42 = vld [vmem:[%s4829_s4 + $0x3c0] ss:$24 sps:$4 sm:$0xff]  }
 0x246   : > { %2036 = vmatprep.subr.bf16.mxu0 %v3359_v41  ;;  %v3406_v41 = vld [vmem:[%s4829_s4 + $0x3cc] ss:$24 sps:$4 sm:$0xff]  }
 0x248   : > { %2119 = vmatpush1.bf16.msra.mxu1 %v3361_v43  ;;  %v3404_v43 = vld [vmem:[%s4829_s4 + $0x3c8] ss:$24 sps:$4 sm:$0xff]  }
 0x249   : > { %2037 = vmatpush1.bf16.msra.mxu0 %v3364_v44  ;;  %2120 = vmatprep.subr.bf16.mxu1 %v3369_v46  ;;  %v3409_v44 = vld [vmem:[%s4829_s4 + $0x3f4] ss:$24 sps:$4 sm:$0xff]   ;;  %v3407_v46 = vld [vmem:[%s4829_s4 + $0x3f0] ss:$24 sps:$4 sm:$0xff]  }
 0x24a   : > { %2038 = vmatprep.subr.bf16.mxu0 %v3365_v45  ;;  %v3412_v45 = vld [vmem:[%s4829_s4 + $0x3fc] ss:$24 sps:$4 sm:$0xff]  }
 0x24c   : > { %2121 = vmatpush1.bf16.msra.mxu1 %v3367_v47  ;;  %v3410_v47 = vld [vmem:[%s4829_s4 + $0x3f8] ss:$24 sps:$4 sm:$0xff]  }
 0x24d   : > { %2039 = vmatpush1.bf16.msra.mxu0 %v3370_v48  ;;  %2122 = vmatprep.subr.bf16.mxu1 %v3375_v50  ;;  %v3415_v48 = vld [vmem:[%s4829_s4 + $0x424] ss:$24 sps:$4 sm:$0xff]   ;;  %v3413_v50 = vld [vmem:[%s4829_s4 + $0x420] ss:$24 sps:$4 sm:$0xff]  }
 0x24e   : > { %2040 = vmatprep.subr.bf16.mxu0 %v3371_v49  ;;  %v3418_v49 = vld [vmem:[%s4829_s4 + $0x42c] ss:$24 sps:$4 sm:$0xff]  }
 0x250   : > { %2123 = vmatpush1.bf16.msra.mxu1 %v3373_v51  ;;  %v3416_v51 = vld [vmem:[%s4829_s4 + $0x428] ss:$24 sps:$4 sm:$0xff]  }
 0x251   : > { %2041 = vmatpush1.bf16.msra.mxu0 %v3376_v52  ;;  %2133 = vmatprep.subr.bf16.mxu1 %v3382_v54  ;;  %v3421_v52 = vld [vmem:[%s4829_s4 + $0x454] ss:$24 sps:$4 sm:$0xff]   ;;  %v3419_v54 = vld [vmem:[%s4829_s4 + $0x450] ss:$24 sps:$4 sm:$0xff]  }
 0x252   : > { %2051 = vmatprep.subr.bf16.mxu0 %v3379_v53  ;;  %v3424_v53 = vld [vmem:[%s4829_s4 + $0x45c] ss:$24 sps:$4 sm:$0xff]  }
 0x2cb   : > { %v745_v15 = vpop.xlane.xlu1 %744 }
 0x2cc   : > { %v747_v16 = vmul.f32 0.001953125, %v745_v15 }
 0x2ce   : > { %v4025_v17 = vsub.f32 %v3879_v21, %v747_v16  ;;  %v4028_v18 = vsub.f32 %v3883_v23, %v747_v16  ;;  %v4031_v19 = vsub.f32 %v3887_v28, %v747_v16  ;;  %v4034_v20 = vsub.f32 %v3891_v30, %v747_v16 }
 0x2d0   : > { %v752_v22 = vmul.f32 %v4025_v17, %v4025_v17  ;;  %v753_v24 = vmul.f32 %v4028_v18, %v4028_v18  ;;  %v754_v25 = vmul.f32 %v4031_v19, %v4031_v19  ;;  %v755_v21 = vmul.f32 %v4034_v20, %v4034_v20 }
 0x2d2   : > { %v756_v23 = vsel %vm736_vm3, %v752_v22, 0.0  ;;  %v757_v26 = vsel %vm736_vm3, %v753_v24, 0.0  ;;  %v759_v28 = vsel %vm736_vm3, %v754_v25, 0.0  ;;  %v761_v30 = vsel %vm736_vm3, %v755_v21, 0.0 }
 0x2d3   : > { %v758_v27 = vadd.f32 %v757_v26, %v756_v23 }
 0x2d5   : > { %v760_v29 = vadd.f32 %v759_v28, %v758_v27  ;;  %v3388_v28 = vld [vmem:[%s4829_s4 + $0x33c] ss:$24 sps:$4 sm:$0xff]  }
 0x2d7   : > { %v762_v31 = vadd.f32 %v761_v30, %v760_v29  ;;  %v3383_v30 = vld [vmem:[%s4829_s4 + $0x330] ss:$24 sps:$4 sm:$0xff]  }
 0x2d9   : > { %763 = vadd.xlane.f32.xlu1 %v762_v31  ;;  %v3386_v31 = vld [vmem:[%s4829_s4 + $0x338] ss:$24 sps:$4 sm:$0xff]  }
 0x366   : > { %v764_v55 = vpop.xlane.xlu1 %763 }
 0x367   : > { %v765_v56 = vmul.f32 0.001953125, %v764_v55  ;;  %v3422_v55 = vld [vmem:[%s4829_s4 + $0x458] ss:$24 sps:$4 sm:$0xff]  }
 0x369   : > { %v766_v58 = vadd.f32 1e-05, %v765_v56  ;;  %v3427_v56 = vld [vmem:[%s4829_s4 + $0x484] ss:$24 sps:$4 sm:$0xff]  }
 0x36b   : > { %3605 = vrsqrt.f32 %v766_v58  ;;  %v3425_v58 = vld [vmem:[%s4829_s4 + $0x480] ss:$24 sps:$4 sm:$0xff]  }
 0x375   : > { %v3606_v6 = vpop.eup %3605 }
 0x376   : > { %v769_v10 = vmul.f32 %v3606_v6, %v4028_v18  ;;  %v768_v11 = vmul.f32 %v3606_v6, %v4025_v17  ;;  %v771_v12 = vmul.f32 %v3606_v6, %v4034_v20  ;;  %v770_v13 = vmul.f32 %v3606_v6, %v4031_v19  ;;  %v3377_v17 = vld [vmem:[%s4829_s4 + $0x300] ss:$24 sps:$4 sm:$0xff]   ;;  %v3385_v20 = vld [vmem:[%s4829_s4 + $0x334] ss:$24 sps:$4 sm:$0xff]  }
 0x377   : > { %v3380_v18 = vld [vmem:[%s4829_s4 + $0x308] ss:$24 sps:$4 sm:$0xff]   ;;  %v3442_v6 = vld [vmem:[%s4829_s4 + $0x4ec] ss:$24 sps:$4 sm:$0xff]  }
 0x378   : > { %v794_v15 = vmul.f32 %v780_v2, %v769_v10  ;;  %v793_v16 = vmul.f32 %v776_v3, %v768_v11  ;;  %v796_v22 = vmul.f32 %v788_v4, %v771_v12  ;;  %v795_v24 = vmul.f32 %v784_v5, %v770_v13  ;;  %v3436_v2 = vld [vmem:[%s4829_s4 + $0x4bc] ss:$24 sps:$4 sm:$0xff]   ;;  %v3431_v3 = vld [vmem:[%s4829_s4 + $0x4b0] ss:$24 sps:$4 sm:$0xff]  }
 0x379   : > { %v3434_v4 = vld [vmem:[%s4829_s4 + $0x4b8] ss:$24 sps:$4 sm:$0xff]   ;;  %v3439_v5 = vld [vmem:[%s4829_s4 + $0x4e4] ss:$24 sps:$4 sm:$0xff]  }
 0x37a   : > { %v819_v25 = vadd.f32 %v805_v7, %v794_v15  ;;  %v818_v21 = vadd.f32 %v801_v8, %v793_v16  ;;  %v4149_v23 = vadd.f32 %v809_v9, %v795_v24  ;;  %v821_v26 = vadd.f32 %v813_v14, %v796_v22  ;;  %v3437_v7 = vld [vmem:[%s4829_s4 + $0x4e0] ss:$24 sps:$4 sm:$0xff]   ;;  %v3445_v9 = vld [vmem:[%s4829_s4 + $0x514] ss:$24 sps:$4 sm:$0xff]   ;;  %v3443_v11 = vld [vmem:[%s4829_s4 + $0x510] ss:$24 sps:$4 sm:$0xff]  }
 0x37b   : > { %v3440_v8 = vld [vmem:[%s4829_s4 + $0x4e8] ss:$24 sps:$4 sm:$0xff]   ;;  %v3448_v10 = vld [vmem:[%s4829_s4 + $0x51c] ss:$24 sps:$4 sm:$0xff]   ;;  %v3446_v12 = vld [vmem:[%s4829_s4 + $0x518] ss:$24 sps:$4 sm:$0xff]  }
 0x37c   : > { %v4151_v27 = vpack.c.bf16 %v819_v25, %v819_v25  ;;  %v4159_v19 = vpack.c.bf16 %v818_v21, %v818_v21  ;;  %v4171_v29 = vpack.c.bf16 %v821_v26, %v821_v26  ;;  %v3451_v13 = vld [vmem:[%s4829_s4 + $0x544] ss:$24 sps:$4 sm:$0xff]   ;;  %v3449_v15 = vld [vmem:[%s4829_s4 + $0x540] ss:$24 sps:$4 sm:$0xff]   ;;  %v3457_v22 = vld [vmem:[%s4829_s4 + $0x574] ss:$24 sps:$4 sm:$0xff]  }
 0x37d   : > { %v3454_v14 = vld [vmem:[%s4829_s4 + $0x54c] ss:$24 sps:$4 sm:$0xff]   ;;  %v3452_v16 = vld [vmem:[%s4829_s4 + $0x548] ss:$24 sps:$4 sm:$0xff]   ;;  %v3460_v24 = vld [vmem:[%s4829_s4 + $0x57c] ss:$24 sps:$4 sm:$0xff]  }
 0x37e   : > { %2042 = vmatprep.mubr.bf16.mxu0 %v4151_v27  ;;  %2124 = vmatprep.mubr.bf16.mxu1 %v4151_v27  ;;  %v3455_v25 = vld [vmem:[%s4829_s4 + $0x570] ss:$24 sps:$4 sm:$0xff]   ;;  %v3463_v26 = vld [vmem:[%s4829_s4 + $0x5a4] ss:$24 sps:$4 sm:$0xff]  }
 0x37f   : > { %2043 = vmatmul.mubr.bf16.vlgmr.msra.gmra.mrb[0].mxu0 %v4159_v19  ;;  %2125 = vmatmul.mubr.bf16.vlgmr.msra.gmra.mrb[8].mxu1 %v4159_v19  ;;  %v3458_v21 = vld [vmem:[%s4829_s4 + $0x578] ss:$24 sps:$4 sm:$0xff]  }
 0x380   : > { %2052 = vmatpush1.bf16.msra.mxu0 %v3377_v17  ;;  %2134 = vmatpush1.bf16.msra.mxu1 %v3380_v18  ;;  %v3466_v17 = vld [vmem:[%s4829_s4 + $0x5ac] ss:$24 sps:$4 sm:$0xff]   ;;  %v3461_v18 = vld [vmem:[%s4829_s4 + $0x5a0] ss:$24 sps:$4 sm:$0xff]  }
 0x381   : > { %2083 = vmatprep.mubr.bf16.mxu0 %v4171_v29  ;;  %2165 = vmatprep.mubr.bf16.mxu1 %v4171_v29 }
 0x382   : > { %2053 = vmatprep.subr.bf16.mxu0 %v3385_v20  ;;  %2135 = vmatprep.subr.bf16.mxu1 %v3388_v28  ;;  %v3464_v20 = vld [vmem:[%s4829_s4 + $0x5a8] ss:$24 sps:$4 sm:$0xff]   ;;  %v3469_v28 = vld [vmem:[%s4829_s4 + $0x5d4] ss:$24 sps:$4 sm:$0xff]  }
 0x384   : > { %2054 = vmatpush1.bf16.msra.mxu0 %v3383_v30  ;;  %2136 = vmatpush1.bf16.msra.mxu1 %v3386_v31  ;;  %v3472_v30 = vld [vmem:[%s4829_s4 + $0x5dc] ss:$24 sps:$4 sm:$0xff]   ;;  %v3467_v31 = vld [vmem:[%s4829_s4 + $0x5d0] ss:$24 sps:$4 sm:$0xff]  }
 0x385   : > { %2055 = vmatprep.subr.bf16.mxu0 %v3391_v32  ;;  %2137 = vmatprep.subr.bf16.mxu1 %v3394_v33  ;;  %v3470_v32 = vld [vmem:[%s4829_s4 + $0x5d8] ss:$24 sps:$4 sm:$0xff]   ;;  %v3475_v33 = vld [vmem:[%s4829_s4 + $0x14] ss:$24 sps:$4 sm:$0xff]  }
 0x388   : > { %2056 = vmatpush1.bf16.msra.mxu0 %v3389_v34  ;;  %2138 = vmatpush1.bf16.msra.mxu1 %v3392_v35  ;;  %v3473_v34 = vld [vmem:[%s4829_s4 + $0x10] ss:$24 sps:$4 sm:$0xff]   ;;  %v4357_v35 = vpack.c.bf16 %v4149_v23, %v4149_v23  ;;  %v3481_v23 = vld [vmem:[%s4829_s4 + $0x74] ss:$24 sps:$4 sm:$0xff]  }
 0x389   : > { %2057 = vmatprep.subr.bf16.mxu0 %v3397_v36  ;;  %2139 = vmatprep.subr.bf16.mxu1 %v3400_v37  ;;  %v3478_v36 = vld [vmem:[%s4829_s4 + $0x44] ss:$24 sps:$4 sm:$0xff]   ;;  %v3476_v37 = vld [vmem:[%s4829_s4 + $0x40] ss:$24 sps:$4 sm:$0xff]  }
 0x38c   : > { %2058 = vmatpush1.bf16.msra.mxu0 %v3395_v38  ;;  %2140 = vmatpush1.bf16.msra.mxu1 %v3398_v39  ;;  %v3479_v38 = vld [vmem:[%s4829_s4 + $0x70] ss:$24 sps:$4 sm:$0xff]   ;;  %v3484_v39 = vld [vmem:[%s4829_s4 + $0xa4] ss:$24 sps:$4 sm:$0xff]  }
 0x38d   : > { %2059 = vmatprep.subr.bf16.mxu0 %v3403_v40  ;;  %2141 = vmatprep.subr.bf16.mxu1 %v3406_v41  ;;  %v3487_v40 = vld [vmem:[%s4829_s4 + $0xd4] ss:$24 sps:$4 sm:$0xff]   ;;  %v3485_v41 = vld [vmem:[%s4829_s4 + $0xd0] ss:$24 sps:$4 sm:$0xff]  }
 0x390   : > { %2060 = vmatpush1.bf16.msra.mxu0 %v3401_v42  ;;  %2142 = vmatpush1.bf16.msra.mxu1 %v3404_v43  ;;  %v3490_v42 = vld [vmem:[%s4829_s4 + $0x104] ss:$24 sps:$4 sm:$0xff]   ;;  %v3488_v43 = vld [vmem:[%s4829_s4 + $0x100] ss:$24 sps:$4 sm:$0xff]  }
 0x391   : > { %2061 = vmatprep.subr.bf16.mxu0 %v3409_v44  ;;  %2143 = vmatprep.subr.bf16.mxu1 %v3412_v45  ;;  %v3493_v44 = vld [vmem:[%s4829_s4 + $0x134] ss:$24 sps:$4 sm:$0xff]   ;;  %v3491_v45 = vld [vmem:[%s4829_s4 + $0x130] ss:$24 sps:$4 sm:$0xff]  }
 0x394   : > { %2062 = vmatpush1.bf16.msra.mxu0 %v3407_v46  ;;  %2144 = vmatpush1.bf16.msra.mxu1 %v3410_v47  ;;  %v3496_v46 = vld [vmem:[%s4829_s4 + $0x164] ss:$24 sps:$4 sm:$0xff]   ;;  %v3494_v47 = vld [vmem:[%s4829_s4 + $0x160] ss:$24 sps:$4 sm:$0xff]  }
 0x395   : > { %2063 = vmatprep.subr.bf16.mxu0 %v3415_v48  ;;  %2145 = vmatprep.subr.bf16.mxu1 %v3418_v49  ;;  %v3499_v48 = vld [vmem:[%s4829_s4 + $0x194] ss:$24 sps:$4 sm:$0xff]   ;;  %v3497_v49 = vld [vmem:[%s4829_s4 + $0x190] ss:$24 sps:$4 sm:$0xff]  }
 0x398   : > { %2064 = vmatpush1.bf16.msra.mxu0 %v3413_v50  ;;  %2146 = vmatpush1.bf16.msra.mxu1 %v3416_v51  ;;  %v3502_v50 = vld [vmem:[%s4829_s4 + $0x1c4] ss:$24 sps:$4 sm:$0xff]   ;;  %v3500_v51 = vld [vmem:[%s4829_s4 + $0x1c0] ss:$24 sps:$4 sm:$0xff]  }
 0x399   : > { %2065 = vmatprep.subr.bf16.mxu0 %v3421_v52  ;;  %2147 = vmatprep.subr.bf16.mxu1 %v3424_v53  ;;  %v3505_v52 = vld [vmem:[%s4829_s4 + $0x1f4] ss:$24 sps:$4 sm:$0xff]   ;;  %v3503_v53 = vld [vmem:[%s4829_s4 + $0x1f0] ss:$24 sps:$4 sm:$0xff]  }
 0x39c   : > { %2066 = vmatpush1.bf16.msra.mxu0 %v3419_v54  ;;  %2148 = vmatpush1.bf16.msra.mxu1 %v3422_v55  ;;  %v3508_v54 = vld [vmem:[%s4829_s4 + $0x224] ss:$24 sps:$4 sm:$0xff]   ;;  %v3506_v55 = vld [vmem:[%s4829_s4 + $0x220] ss:$24 sps:$4 sm:$0xff]  }
 0x39d   : > { %2067 = vmatprep.subr.bf16.mxu0 %v3427_v56  ;;  %2149 = vmatprep.subr.bf16.mxu1 %v3430_v57  ;;  %v3511_v56 = vld [vmem:[%s4829_s4 + $0x254] ss:$24 sps:$4 sm:$0xff]   ;;  %v3509_v57 = vld [vmem:[%s4829_s4 + $0x250] ss:$24 sps:$4 sm:$0xff]  }
 0x3a0   : > { %2068 = vmatpush1.bf16.msra.mxu0 %v3425_v58  ;;  %2150 = vmatpush1.bf16.msra.mxu1 %v3428_v0  ;;  %v3514_v58 = vld [vmem:[%s4829_s4 + $0x284] ss:$24 sps:$4 sm:$0xff]   ;;  %v3512_v0 = vld [vmem:[%s4829_s4 + $0x280] ss:$24 sps:$4 sm:$0xff]  }
 0x3a1   : > { %2069 = vmatprep.subr.bf16.mxu0 %v3433_v1  ;;  %2151 = vmatprep.subr.bf16.mxu1 %v3436_v2  ;;  %v3517_v1 = vld [vmem:[%s4829_s4 + $0x2b4] ss:$24 sps:$4 sm:$0xff]   ;;  %v3515_v2 = vld [vmem:[%s4829_s4 + $0x2b0] ss:$24 sps:$4 sm:$0xff]  }
 0x3a4   : > { %2070 = vmatpush1.bf16.msra.mxu0 %v3431_v3  ;;  %2152 = vmatpush1.bf16.msra.mxu1 %v3434_v4  ;;  %v3520_v3 = vld [vmem:[%s4829_s4 + $0x2e4] ss:$24 sps:$4 sm:$0xff]   ;;  %v3518_v4 = vld [vmem:[%s4829_s4 + $0x2e0] ss:$24 sps:$4 sm:$0xff]  }
 0x3a5   : > { %2071 = vmatprep.subr.bf16.mxu0 %v3439_v5  ;;  %2153 = vmatprep.subr.bf16.mxu1 %v3442_v6  ;;  %v3523_v5 = vld [vmem:[%s4829_s4 + $0x314] ss:$24 sps:$4 sm:$0xff]   ;;  %v3521_v6 = vld [vmem:[%s4829_s4 + $0x310] ss:$24 sps:$4 sm:$0xff]  }
 0x3a8   : > { %2072 = vmatpush1.bf16.msra.mxu0 %v3437_v7  ;;  %2154 = vmatpush1.bf16.msra.mxu1 %v3440_v8  ;;  %v3526_v7 = vld [vmem:[%s4829_s4 + $0x344] ss:$24 sps:$4 sm:$0xff]   ;;  %v3524_v8 = vld [vmem:[%s4829_s4 + $0x340] ss:$24 sps:$4 sm:$0xff]  }
 0x3a9   : > { %2073 = vmatprep.subr.bf16.mxu0 %v3445_v9  ;;  %2155 = vmatprep.subr.bf16.mxu1 %v3448_v10  ;;  %v3529_v9 = vld [vmem:[%s4829_s4 + $0x374] ss:$24 sps:$4 sm:$0xff]   ;;  %v3527_v10 = vld [vmem:[%s4829_s4 + $0x370] ss:$24 sps:$4 sm:$0xff]  }
 0x3ac   : > { %2074 = vmatpush1.bf16.msra.mxu0 %v3443_v11  ;;  %2156 = vmatpush1.bf16.msra.mxu1 %v3446_v12  ;;  %v3535_v11 = vld [vmem:[%s4829_s4 + $0x3d4] ss:$24 sps:$4 sm:$0xff]   ;;  %v3533_v12 = vld [vmem:[%s4829_s4 + $0x3d0] ss:$24 sps:$4 sm:$0xff]  }
 0x3ad   : > { %2075 = vmatprep.subr.bf16.mxu0 %v3451_v13  ;;  %2157 = vmatprep.subr.bf16.mxu1 %v3454_v14  ;;  %v3538_v13 = vld [vmem:[%s4829_s4 + $0x404] ss:$24 sps:$4 sm:$0xff]   ;;  %v3536_v14 = vld [vmem:[%s4829_s4 + $0x400] ss:$24 sps:$4 sm:$0xff]  }
 0x3b0   : > { %2076 = vmatpush1.bf16.msra.mxu0 %v3449_v15  ;;  %2158 = vmatpush1.bf16.msra.mxu1 %v3452_v16  ;;  %v3541_v15 = vld [vmem:[%s4829_s4 + $0x434] ss:$24 sps:$4 sm:$0xff]   ;;  %v3539_v16 = vld [vmem:[%s4829_s4 + $0x430] ss:$24 sps:$4 sm:$0xff]  }
 0x3b1   : > { %2077 = vmatprep.subr.bf16.mxu0 %v3457_v22  ;;  %2159 = vmatprep.subr.bf16.mxu1 %v3460_v24  ;;  %v3544_v22 = vld [vmem:[%s4829_s4 + $0x464] ss:$24 sps:$4 sm:$0xff]   ;;  %v3542_v24 = vld [vmem:[%s4829_s4 + $0x460] ss:$24 sps:$4 sm:$0xff]  }
 0x3b4   : > { %2078 = vmatpush1.bf16.msra.mxu0 %v3455_v25  ;;  %2160 = vmatpush1.bf16.msra.mxu1 %v3458_v21  ;;  %v3547_v25 = vld [vmem:[%s4829_s4 + $0x494] ss:$24 sps:$4 sm:$0xff]   ;;  %v3545_v21 = vld [vmem:[%s4829_s4 + $0x490] ss:$24 sps:$4 sm:$0xff]  }
 0x3b5   : > { %2079 = vmatprep.subr.bf16.mxu0 %v3463_v26  ;;  %2161 = vmatprep.subr.bf16.mxu1 %v3466_v17  ;;  %v3550_v26 = vld [vmem:[%s4829_s4 + $0x4c4] ss:$24 sps:$4 sm:$0xff]   ;;  %v3548_v17 = vld [vmem:[%s4829_s4 + $0x4c0] ss:$24 sps:$4 sm:$0xff]  }
 0x3b8   : > { %2080 = vmatpush1.bf16.msra.mxu0 %v3461_v18  ;;  %2162 = vmatpush1.bf16.msra.mxu1 %v3464_v20  ;;  %v3553_v18 = vld [vmem:[%s4829_s4 + $0x4f4] ss:$24 sps:$4 sm:$0xff]   ;;  %v3551_v20 = vld [vmem:[%s4829_s4 + $0x4f0] ss:$24 sps:$4 sm:$0xff]  }
 0x3b9   : > { %2081 = vmatprep.subr.bf16.mxu0 %v3469_v28  ;;  %2163 = vmatprep.subr.bf16.mxu1 %v3472_v30  ;;  %v3556_v28 = vld [vmem:[%s4829_s4 + $0x524] ss:$24 sps:$4 sm:$0xff]   ;;  %v3554_v30 = vld [vmem:[%s4829_s4 + $0x520] ss:$24 sps:$4 sm:$0xff]  }
 0x3bc   : > { %2082 = vmatpush1.bf16.msra.mxu0 %v3467_v31  ;;  %2164 = vmatpush1.bf16.msra.mxu1 %v3470_v32  ;;  %v3559_v31 = vld [vmem:[%s4829_s4 + $0x554] ss:$24 sps:$4 sm:$0xff]   ;;  %v3557_v32 = vld [vmem:[%s4829_s4 + $0x550] ss:$24 sps:$4 sm:$0xff]  }
 0x3bd   : > { %2174 = vmatprep.subr.bf16.mxu0 %v3475_v33  ;;  %v3562_v33 = vld [vmem:[%s4829_s4 + $0x584] ss:$24 sps:$4 sm:$0xff]  }
 0x3bf   : > { %2084 = vmatmul.mubr.bf16.vlgmr.msra.gmra.mrb[0].mxu0 %v4357_v35  ;;  %2166 = vmatmul.mubr.bf16.vlgmr.msra.gmra.mrb[8].mxu1 %v4357_v35 }
 0x3c0   : > { %2175 = vmatpush1.bf16.msra.mxu0 %v3473_v34  ;;  %2206 = vmatprep.mubr.bf16.mxu0 %v4151_v27  ;;  %v3482_v27 = vld [vmem:[%s4829_s4 + $0xa0] ss:$24 sps:$4 sm:$0xff]  }
 0x3c1   : > { %2176 = vmatprep.subr.bf16.mxu0 %v3478_v36  ;;  %v3560_v34 = vld [vmem:[%s4829_s4 + $0x580] ss:$24 sps:$4 sm:$0xff]   ;;  %v3565_v36 = vld [vmem:[%s4829_s4 + $0x5b4] ss:$24 sps:$4 sm:$0xff]  }
 0x3c4   : > { %2177 = vmatpush1.bf16.msra.mxu0 %v3476_v37  ;;  %v3563_v37 = vld [vmem:[%s4829_s4 + $0x5b0] ss:$24 sps:$4 sm:$0xff]  }
 0x3c5   : > { %2178 = vmatprep.subr.bf16.mxu0 %v3481_v23  ;;  %v3568_v23 = vld [vmem:[%s4829_s4 + $0x5e4] ss:$24 sps:$4 sm:$0xff]  }
 0x3c8   : > { %2179 = vmatpush1.bf16.msra.mxu0 %v3479_v38  ;;  %v3566_v38 = vld [vmem:[%s4829_s4 + $0x5e0] ss:$24 sps:$4 sm:$0xff]  }
 0x3c9   : > { %2180 = vmatprep.subr.bf16.mxu0 %v3484_v39  ;;  %v1018_v39 = vld [vmem:[%s4830_s5] sm:$0x3f] }
 0x3cc   : > { %2181 = vmatpush1.bf16.msra.mxu0 %v3482_v27  ;;  %v1983_v27 = vrot.slane %v1018_v39, %v4123_v61 }
 0x3cd   : > { %2182 = vmatprep.subr.bf16.mxu0 %v3487_v40  ;;  %v1991_v40 = vrot.slane %v1018_v39, %v4129_v63 }
 0x3d0   : > { %2183 = vmatpush1.bf16.msra.mxu0 %v3485_v41  ;;  %v1987_v41 = vrot.slane %v1018_v39, %v4120_v60 }
 0x3d1   : > { %2184 = vmatprep.subr.bf16.mxu0 %v3490_v42 }
 0x3d4   : > { %2185 = vmatpush1.bf16.msra.mxu0 %v3488_v43 }
 0x3d5   : > { %2186 = vmatprep.subr.bf16.mxu0 %v3493_v44  ;;  %v1995_v44 = vrot.slane %v1018_v39, %v4126_v62 }
 0x3d8   : > { %2187 = vmatpush1.bf16.msra.mxu0 %v3491_v45 }
 0x3d9   : > { %2188 = vmatprep.subr.bf16.mxu0 %v3496_v46 }
 0x3dc   : > { %2189 = vmatpush1.bf16.msra.mxu0 %v3494_v47 }
 0x3dd   : > { %2190 = vmatprep.subr.bf16.mxu0 %v3499_v48 }
 0x3e0   : > { %2191 = vmatpush1.bf16.msra.mxu0 %v3497_v49 }
 0x3e1   : > { %2192 = vmatprep.subr.bf16.mxu0 %v3502_v50 }
 0x3e4   : > { %2193 = vmatpush1.bf16.msra.mxu0 %v3500_v51 }
 0x3e5   : > { %2194 = vmatprep.subr.bf16.mxu0 %v3505_v52 }
 0x3e8   : > { %2195 = vmatpush1.bf16.msra.mxu0 %v3503_v53 }
 0x3e9   : > { %2196 = vmatprep.subr.bf16.mxu0 %v3508_v54 }
 0x3ec   : > { %2197 = vmatpush1.bf16.msra.mxu0 %v3506_v55 }
 0x3ed   : > { %2198 = vmatprep.subr.bf16.mxu0 %v3511_v56 }
 0x3f0   : > { %2199 = vmatpush1.bf16.msra.mxu0 %v3509_v57 }
 0x3f1   : > { %2200 = vmatprep.subr.bf16.mxu0 %v3514_v58 }
 0x3f4   : > { %2201 = vmatpush1.bf16.msra.mxu0 %v3512_v0 }
 0x3f5   : > { %2202 = vmatprep.subr.bf16.mxu0 %v3517_v1 }
 0x3f8   : > { %2203 = vmatpush1.bf16.msra.mxu0 %v3515_v2  ;;  %v1998_v2 = vsub.s32 4, %v4117_v59 }
 0x3f9   : > { %2204 = vmatprep.subr.bf16.mxu0 %v3520_v3  ;;  %v2002_v3 = vsub.s32 5, %v4117_v59 }
 0x3fc   : > { %2205 = vmatpush1.bf16.msra.mxu0 %v3518_v4  ;;  %v1999_v4 = vrot.slane %v1018_v39, %v1998_v2  ;;  %v2257_v2 = vld [vmem:[%s4832_s7] sm:$0xf] }
 0x3fd   : > { %2215 = vmatprep.subr.bf16.mxu0 %v3523_v5  ;;  %v2003_v5 = vrot.slane %v1018_v39, %v2002_v3  ;;  %v3575_v39 = vld [vmem:[%s4835_s10 + $0x58] sm:$0xff]  }
 0x3ff   : > { %2207 = vmatmul.mubr.bf16.vlgmr.msra.gmra.mrb[4].mxu0 %v4159_v19  ;;  %v3532_v19 = vld [vmem:[%s4829_s4 + $0x3a4] ss:$24 sps:$4 sm:$0xff]  }
 0x400   : > { %2216 = vmatpush1.bf16.msra.mxu0 %v3521_v6  ;;  %2247 = vmatprep.mubr.bf16.mxu0 %v4171_v29  ;;  %v3530_v29 = vld [vmem:[%s4829_s4 + $0x3a0] ss:$24 sps:$4 sm:$0xff]  }
 0x401   : > { %2217 = vmatprep.subr.bf16.mxu0 %v3526_v7 }
 0x404   : > { %2218 = vmatpush1.bf16.msra.mxu0 %v3524_v8 }
 0x405   : > { %2219 = vmatprep.subr.bf16.mxu0 %v3529_v9 }
 0x408   : > { %2220 = vmatpush1.bf16.msra.mxu0 %v3527_v10 }
 0x409   : > { %2221 = vmatprep.subr.bf16.mxu0 %v3532_v19 }
 0x40c   : > { %2222 = vmatpush1.bf16.msra.mxu0 %v3530_v29 }
 0x40d   : > { %2223 = vmatprep.subr.bf16.mxu0 %v3535_v11 }
 0x410   : > { %2224 = vmatpush1.bf16.msra.mxu0 %v3533_v12 }
 0x411   : > { %2225 = vmatprep.subr.bf16.mxu0 %v3538_v13 }
 0x414   : > { %2226 = vmatpush1.bf16.msra.mxu0 %v3536_v14 }
 0x415   : > { %2227 = vmatprep.subr.bf16.mxu0 %v3541_v15 }
 0x418   : > { %2228 = vmatpush1.bf16.msra.mxu0 %v3539_v16 }
 0x419   : > { %2229 = vmatprep.subr.bf16.mxu0 %v3544_v22 }
 0x41c   : > { %2230 = vmatpush1.bf16.msra.mxu0 %v3542_v24 }
 0x41d   : > { %2231 = vmatprep.subr.bf16.mxu0 %v3547_v25 }
 0x420   : > { %2232 = vmatpush1.bf16.msra.mxu0 %v3545_v21 }
 0x421   : > { %2233 = vmatprep.subr.bf16.mxu0 %v3550_v26  ;;  %v3569_v26 = vld [vmem:[%s4835_s10 + $0x40] sm:$0xff]  }
 0x422   : > { %3170 = vmatprep.subr.bf16.mxu1 %v3569_v26 }
 0x424   : > { %2234 = vmatpush1.bf16.msra.mxu0 %v3548_v17  ;;  %v3570_v17 = vld [vmem:[%s4835_s10] sm:$0xff]  }
 0x425   : > { %2235 = vmatprep.subr.bf16.mxu0 %v3553_v18  ;;  %v3571_v18 = vld [vmem:[%s4835_s10 + $0x48] sm:$0xff]   ;;  %3171 = vmatpush3.bf16.msra.mxu1 %v3570_v17 }
 0x426   : > { %3172 = vmatprep.subr.bf16.mxu1 %v3571_v18 }
 0x428   : > { %2236 = vmatpush1.bf16.msra.mxu0 %v3551_v20 }
 0x429   : > { %2237 = vmatprep.subr.bf16.mxu0 %v3556_v28 }
 0x42c   : > { %2238 = vmatpush1.bf16.msra.mxu0 %v3554_v30 }
 0x42d   : > { %2239 = vmatprep.subr.bf16.mxu0 %v3559_v31 }
 0x430   : > { %2240 = vmatpush1.bf16.msra.mxu0 %v3557_v32 }
 0x431   : > { %2241 = vmatprep.subr.bf16.mxu0 %v3562_v33  ;;  %v3572_v33 = vld [vmem:[%s4835_s10 + $0x8] sm:$0xff]  }
 0x432   : > { %3173 = vmatpush3.bf16.msra.mxu1 %v3572_v33  ;;  %v3593_v33 = vld [vmem:[%s4835_s10 + $0xe0] sm:$0xff]  }
 0x434   : > { %2242 = vmatpush1.bf16.msra.mxu0 %v3560_v34 }
 0x435   : > { %2243 = vmatprep.subr.bf16.mxu0 %v3565_v36 }
 0x438   : > { %2244 = vmatpush1.bf16.msra.mxu0 %v3563_v37 }
 0x439   : > { %2245 = vmatprep.subr.bf16.mxu0 %v3568_v23  ;;  %v3573_v23 = vld [vmem:[%s4835_s10 + $0x50] sm:$0xff]  }
 0x43a   : > { %3174 = vmatprep.subr.bf16.mxu1 %v3573_v23 }
 0x43c   : > { %2246 = vmatpush1.bf16.msra.mxu0 %v3566_v38  ;;  %v3574_v38 = vld [vmem:[%s4835_s10 + $0x10] sm:$0xff]  }
 0x43d   : > { %3175 = vmatpush3.bf16.msra.mxu1 %v3574_v38  ;;  %v3596_v38 = vld [vmem:[%s4835_s10 + $0xa8] sm:$0xff]  }
 0x43e   : > { %3176 = vmatprep.subr.bf16.mxu1 %v3575_v39  ;;  %v3597_v39 = vld [vmem:[%s4835_s10 + $0xf0] sm:$0xff]  }
 0x43f   : > { %2248 = vmatmul.mubr.bf16.vlgmr.msra.gmra.mrb[4].mxu0 %v4357_v35 }
 0x492   : > { %v2085_v42 = vpop.f32.mrb[0].mxu0  ;;  %v2167_v43 = vpop.f32.mrb[8].mxu1 }
 0x493   : > { %v3214_v45 = vadd.f32 %v2085_v42, %v1983_v27  ;;  %v2087_v46 = vpop.f32.mrb[1].mxu0  ;;  %v2169_v47 = vpop.f32.mrb[9].mxu1  ;;  %v3216_v48 = vadd.f32 %v2167_v43, %v1991_v40  ;;  %v3576_v27 = vld [vmem:[%s4835_s10 + $0x18] sm:$0xff]   ;;  %v3577_v40 = vld [vmem:[%s4835_s10 + $0x60] sm:$0xff]   ;;  %v3579_v42 = vld [vmem:[%s4835_s10 + $0x68] sm:$0xff]  }
 0x494   : > { %v3215_v49 = vadd.f32 %v2087_v46, %v1987_v41  ;;  %v2089_v35 = vpop.f32.mrb[2].mxu0  ;;  %v2171_v50 = vpop.f32.mrb[10].mxu1  ;;  %v3217_v55 = vadd.f32 %v2169_v47, %v1995_v44  ;;  %3177 = vmatpush3.bf16.msra.mxu1 %v3576_v27  ;;  %v3578_v41 = vld [vmem:[%s4835_s10 + $0x20] sm:$0xff]   ;;  %v3580_v43 = vld [vmem:[%s4835_s10 + $0x28] sm:$0xff]   ;;  %v3581_v44 = vld [vmem:[%s4835_s10 + $0x70] sm:$0xff]  }
 0x495   : > { %v2258_v51 = vsel %vm736_vm3, %v3214_v45, 0.0  ;;  %v2090_v52 = vpop.f32.mrb[3].mxu0  ;;  %v2172_v53 = vpop.f32.mrb[11].mxu1  ;;  %v2261_v57 = vsel %vm736_vm3, %v3216_v48, 0.0  ;;  %3178 = vmatprep.subr.bf16.mxu1 %v3577_v40  ;;  %v3583_v46 = vld [vmem:[%s4835_s10 + $0x78] sm:$0xff]   ;;  %v2329_v40 = vrot.slane %v2257_v2, %v4129_v63 }
 0x496   : > { %v2259_v54 = vsel %vm736_vm3, %v3215_v49, 0.0  ;;  %v2263_v0 = vsel %vm736_vm3, %v3217_v55, 0.0  ;;  %v3584_v47 = vld [vmem:[%s4835_s10 + $0x38] sm:$0xff]  }
 0x497   : > { %v2260_v56 = vadd.f32 %v2259_v54, %v2258_v51 }
 0x498   : > { %3179 = vmatpush3.bf16.msra.mxu1 %v3578_v41  ;;  %v3599_v41 = vld [vmem:[%s4835_s10 + $0xf8] sm:$0xff]  }
 0x499   : > { %v2262_v58 = vadd.f32 %v2261_v57, %v2260_v56  ;;  %3180 = vmatprep.subr.bf16.mxu1 %v3579_v42 }
 0x49b   : > { %v2264_v1 = vadd.f32 %v2263_v0, %v2262_v58 }
 0x49c   : > { %3181 = vmatpush3.bf16.msra.mxu1 %v3580_v43  ;;  %v3600_v43 = vld [vmem:[%s4835_s10 + $0xb8] sm:$0xff]  }
 0x49d   : > { %2265 = vadd.xlane.f32.xlu0 %v2264_v1  ;;  %3182 = vmatprep.subr.bf16.mxu1 %v3581_v44  ;;  %v2256_v1 = vld [vmem:[%s4831_s6] sm:$0xf] }
 0x49e   : > { %v2300_v3 = vrot.slane %v2256_v1, %v4120_v60  ;;  %v2304_v23 = vrot.slane %v2256_v1, %v4129_v63 }
 0x512   : > { %v2249_v6 = vpop.f32.mrb[4].mxu0 }
 0x513   : > { %v4564_v7 = vadd.f32 %v2249_v6, %v1999_v4  ;;  %v2251_v8 = vpop.f32.mrb[5].mxu0  ;;  %v2296_v4 = vrot.slane %v2256_v1, %v4123_v61 }
 0x514   : > { %v3219_v9 = vadd.f32 %v2251_v8, %v2003_v5  ;;  %v2253_v10 = vpop.f32.mrb[6].mxu0  ;;  %v2308_v5 = vrot.slane %v2256_v1, %v4126_v62  ;;  %v2321_v8 = vrot.slane %v2257_v2, %v4123_v61  ;;  %v2347_v1 = vld [vmem:[%s4834_s9] sm:$0x3] }
 0x515   : > { %v2254_v19 = vpop.f32.mrb[7].mxu0  ;;  %v2348_v29 = vsel %vm736_vm3, %v4564_v7, 0.0 }
 0x516   : > { %v2349_v11 = vsel %vm736_vm3, %v3219_v9, 0.0 }
 0x517   : > { %v2350_v12 = vadd.f32 %v2349_v11, %v2348_v29  ;;  %v2333_v29 = vrot.slane %v2257_v2, %v4126_v62 }
 0x519   : > { %2351 = vadd.xlane.f32.xlu0 %v2350_v12 }
 0x52a   : > { %v2266_v13 = vpop.xlane.xlu0 %2265 }
 0x52b   : > { %v2267_v14 = vmul.f32 0.001953125, %v2266_v13 }
 0x52d   : > { %v4569_v15 = vsub.f32 %v3214_v45, %v2267_v14  ;;  %v4571_v59 = vsub.f32 %v3215_v49, %v2267_v14  ;;  %v4573_v16 = vsub.f32 %v3216_v48, %v2267_v14  ;;  %v4575_v22 = vsub.f32 %v3217_v55, %v2267_v14  ;;  %v3582_v45 = vld [vmem:[%s4835_s10 + $0x30] sm:$0xff]   ;;  %v3585_v48 = vld [vmem:[%s4835_s10 + $0xc0] sm:$0xff]  }
 0x52e   : > { %3183 = vmatpush3.bf16.msra.mxu1 %v3582_v45 }
 0x52f   : > { %v2272_v24 = vmul.f32 %v4569_v15, %v4569_v15  ;;  %v2273_v25 = vmul.f32 %v4571_v59, %v4571_v59  ;;  %v2274_v21 = vmul.f32 %v4573_v16, %v4573_v16  ;;  %v2275_v20 = vmul.f32 %v4575_v22, %v4575_v22  ;;  %3184 = vmatprep.subr.bf16.mxu1 %v3583_v46 }
 0x531   : > { %v2276_v28 = vsel %vm736_vm3, %v2272_v24, 0.0  ;;  %v2277_v30 = vsel %vm736_vm3, %v2273_v25, 0.0  ;;  %v2279_v32 = vsel %vm736_vm3, %v2274_v21, 0.0  ;;  %v2281_v36 = vsel %vm736_vm3, %v2275_v20, 0.0 }
 0x532   : > { %v2278_v31 = vadd.f32 %v2277_v30, %v2276_v28  ;;  %3185 = vmatpush3.bf16.msra.mxu1 %v3584_v47  ;;  %v3589_v28 = vld [vmem:[%s4835_s10 + $0xd0] sm:$0xff]  }
 0x533   : > { %3192 = vmatprep.subr.bf16.mxu1 %v3585_v48  ;;  %v3590_v30 = vld [vmem:[%s4835_s10 + $0x90] sm:$0xff]  }
 0x534   : > { %v2280_v34 = vadd.f32 %v2279_v32, %v2278_v31  ;;  %v3591_v31 = vld [vmem:[%s4835_s10 + $0xd8] sm:$0xff]  }
 0x535   : > { %v3592_v32 = vld [vmem:[%s4835_s10 + $0x98] sm:$0xff]  }
 0x536   : > { %v2282_v37 = vadd.f32 %v2281_v36, %v2280_v34  ;;  %v3594_v34 = vld [vmem:[%s4835_s10 + $0xa0] sm:$0xff]   ;;  %v3595_v36 = vld [vmem:[%s4835_s10 + $0xe8] sm:$0xff]  }
 0x538   : > { %2283 = vadd.xlane.f32.xlu1 %v2282_v37 }
 0x5a6   : > { %v2352_v49 = vpop.xlane.xlu0 %2351 }
 0x5a7   : > { %v2354_v35 = vmul.f32 0.00390625, %v2352_v49 }
 0x5a9   : > { %v4641_v50 = vsub.f32 %v4564_v7, %v2354_v35  ;;  %v4643_v51 = vsub.f32 %v3219_v9, %v2354_v35  ;;  %v2325_v7 = vrot.slane %v2257_v2, %v4120_v60 }
 0x5ab   : > { %v2357_v52 = vmul.f32 %v4641_v50, %v4641_v50  ;;  %v2358_v53 = vmul.f32 %v4643_v51, %v4643_v51 }
 0x5ad   : > { %v2359_v54 = vsel %vm736_vm3, %v2357_v52, 0.0  ;;  %v2360_v55 = vsel %vm736_vm3, %v2358_v53, 0.0 }
 0x5ae   : > { %v2361_v56 = vadd.f32 %v2360_v55, %v2359_v54  ;;  %v2346_v55 = vld [vmem:[%s4833_s8] sm:$0x3] }
 0x5b0   : > { %2362 = vadd.xlane.f32.xlu1 %v2361_v56 }
 0x5c5   : > { %v2284_v57 = vpop.xlane.xlu1 %2283 }
 0x5c6   : > { %v2285_v58 = vmul.f32 0.001953125, %v2284_v57 }
 0x5c8   : > { %v2286_v0 = vadd.f32 1e-05, %v2285_v58  ;;  %v2373_v58 = vrot.slane %v2346_v55, %v4123_v61 }
 0x5ca   : > { %3607 = vrsqrt.f32 %v2286_v0  ;;  %v2377_v0 = vrot.slane %v2346_v55, %v4120_v60 }
 0x5d4   : > { %v3608_v6 = vpop.eup %3607 }
 0x5d5   : > { %v2289_v9 = vmul.f32 %v3608_v6, %v4571_v59  ;;  %v2288_v10 = vmul.f32 %v3608_v6, %v4569_v15  ;;  %v2291_v19 = vmul.f32 %v3608_v6, %v4575_v22  ;;  %v3586_v59 = vld [vmem:[%s4835_s10 + $0x80] sm:$0xff]   ;;  %v3587_v15 = vld [vmem:[%s4835_s10 + $0xc8] sm:$0xff]   ;;  %v2290_v37 = vmul.f32 %v3608_v6, %v4573_v16  ;;  %v3598_v16 = vld [vmem:[%s4835_s10 + $0xb0] sm:$0xff]  }
 0x5d6   : > { %v3588_v22 = vld [vmem:[%s4835_s10 + $0x88] sm:$0xff]  }
 0x5d7   : > { %v2314_v11 = vmul.f32 %v2300_v3, %v2289_v9  ;;  %v2313_v12 = vmul.f32 %v2296_v4, %v2288_v10  ;;  %v2316_v13 = vmul.f32 %v2308_v5, %v2291_v19  ;;  %v2315_v27 = vmul.f32 %v2304_v23, %v2290_v37  ;;  %v2465_v19 = vld [vmem:[%s4836_s11] sm:$0x1] }
 0x5d8   : > { %v2386_v4 = vrot.slane %v2347_v1, %v4123_v61  ;;  %v2390_v5 = vrot.slane %v2347_v1, %v4120_v60 }
 0x5d9   : > { %v2339_v14 = vadd.f32 %v2325_v7, %v2314_v11  ;;  %v2338_v24 = vadd.f32 %v2321_v8, %v2313_v12  ;;  %v2341_v25 = vadd.f32 %v2333_v29, %v2316_v13  ;;  %v2340_v42 = vadd.f32 %v2329_v40, %v2315_v27 }
 0x5db   : > { %v2343_v21 = vmax.f32 %v2339_v14, 0.0  ;;  %v2342_v26 = vmax.f32 %v2338_v24, 0.0  ;;  %v2345_v17 = vmax.f32 %v2341_v25, 0.0  ;;  %v2344_v44 = vmax.f32 %v2340_v42, 0.0 }
 0x5dd   : > { %v2398_v18 = vpack.c.bf16 %v2343_v21, %v2343_v21  ;;  %v2397_v20 = vpack.c.bf16 %v2342_v26, %v2342_v26  ;;  %v2400_v62 = vpack.c.bf16 %v2345_v17, %v2345_v17  ;;  %v2399_v63 = vpack.c.bf16 %v2344_v44, %v2344_v44 }
 0x5df   : > { %2690 = vmatprep.mubr.bf16.mxu1 %v2398_v18 }
 0x5e0   : > { %2691 = vmatmul.mubr.bf16.vlgmr.msra.gmra.mrb[12].mxu1 %v2397_v20 }
 0x5e1   : > { %3193 = vmatpush3.bf16.msra.mxu1 %v3586_v59  ;;  %2730 = vmatprep.mubr.bf16.mxu1 %v2400_v62 }
 0x5e2   : > { %3194 = vmatprep.subr.bf16.mxu1 %v3587_v15  ;;  %v2776_v15 = vld [vmem:[#allocation2] sm:$0x1] }
 0x5e5   : > { %3195 = vmatpush3.bf16.msra.mxu1 %v3588_v22 }
 0x5e6   : > { %3196 = vmatprep.subr.bf16.mxu1 %v3589_v28 }
 0x5e9   : > { %3197 = vmatpush3.bf16.msra.mxu1 %v3590_v30 }
 0x5ea   : > { %3198 = vmatprep.subr.bf16.mxu1 %v3591_v31 }
 0x5ed   : > { %3199 = vmatpush3.bf16.msra.mxu1 %v3592_v32 }
 0x5ee   : > { %3200 = vmatprep.subr.bf16.mxu1 %v3593_v33 }
 0x5f1   : > { %3201 = vmatpush3.bf16.msra.mxu1 %v3594_v34 }
 0x5f2   : > { %3202 = vmatprep.subr.bf16.mxu1 %v3595_v36 }
 0x5f5   : > { %3203 = vmatpush3.bf16.msra.mxu1 %v3596_v38 }
 0x5f6   : > { %3204 = vmatprep.subr.bf16.mxu1 %v3597_v39 }
 0x5f9   : > { %3205 = vmatpush3.bf16.msra.mxu1 %v3598_v16 }
 0x5fa   : > { %3206 = vmatprep.subr.bf16.mxu1 %v3599_v41 }
 0x5fd   : > { %3207 = vmatpush3.bf16.msra.mxu1 %v3600_v43 }
 0x600   : > { %2731 = vmatmul.mubr.bf16.vlgmr.msra.gmra.mrb[16].mxu1 %v2399_v63 }
 0x63d   : > { %v2363_v45 = vpop.xlane.xlu1 %2362 }
 0x63e   : > { %v2364_v46 = vmul.f32 0.00390625, %v2363_v45 }
 0x640   : > { %v2365_v48 = vadd.f32 1e-05, %v2364_v46 }
 0x642   : > { %3609 = vrsqrt.f32 %v2365_v48 }
 0x64c   : > { %v3610_v54 = vpop.eup %3609 }
 0x64d   : > { %v2367_v56 = vmul.f32 %v3610_v54, %v4641_v50  ;;  %v2368_v57 = vmul.f32 %v3610_v54, %v4643_v51  ;;  %v2757_v50 = vld [vmem:[%s4839_s14] sm:$0x3] }
 0x64e   : > { %v2762_v9 = vrot.slane %v2757_v50, %v4123_v61  ;;  %v2766_v10 = vrot.slane %v2757_v50, %v4120_v60 }
 0x64f   : > { %v2380_v2 = vmul.f32 %v2373_v58, %v2367_v56  ;;  %v2381_v3 = vmul.f32 %v2377_v0, %v2368_v57 }
 0x651   : > { %v2393_v6 = vadd.f32 %v2386_v4, %v2380_v2  ;;  %v2394_v7 = vadd.f32 %v2390_v5, %v2381_v3 }
 0x653   : > { %v2395_v51 = vmax.f32 %v2393_v6, 0.0  ;;  %v2396_v8 = vmax.f32 %v2394_v7, 0.0 }
 0x655   : > { %v2769_v24 = vmul.f32 %v2762_v9, %v2395_v51  ;;  %v2770_v25 = vmul.f32 %v2766_v10, %v2396_v8 }
 0x657   : > { %v2771_v61 = vsel %vm736_vm3, %v2769_v24, 0.0  ;;  %v2772_v60 = vsel %vm736_vm3, %v2770_v25, 0.0 }
 0x658   : > { %v2773_v18 = vadd.f32 %v2772_v60, %v2771_v61 }
 0x6b3   : > { %v3186_v47 = vpop.f32.mrb[12].mxu1 }
 0x6b4   : > { %v3187_v49 = vpop.f32.mrb[13].mxu1 }
 0x6b5   : > { %v3188_v35 = vadd.f32 %v3187_v49, %v3186_v47  ;;  %v3189_v52 = vpop.f32.mrb[14].mxu1 }
 0x6b6   : > { %v3190_v53 = vpop.f32.mrb[15].mxu1 }
 0x6b7   : > { %v2693_v12 = vadd.f32 %v3188_v35, %v2465_v19 }
 0x6d3   : > { %v3208_v29 = vpop.f32.mrb[16].mxu1 }
 0x6d4   : > { %v3209_v11 = vpop.f32.mrb[17].mxu1 }
 0x6d5   : > { %v3210_v13 = vadd.f32 %v3209_v11, %v3208_v29  ;;  %v3211_v14 = vpop.f32.mrb[18].mxu1 }
 0x6d6   : > { %v3212_v21 = vpop.f32.mrb[19].mxu1 }
 0x6d7   : > { %v2733_v26 = vadd.f32 %v3210_v13, %v2693_v12 }
 0x6d9   : > { %v2740_v17 = vsel %vm736_vm3, %v2733_v26, 0.0 }
 0x6da   : > { %2741 = vadd.xlane.f32.xlu0 %v2740_v17 }
 0x6de   : > { %2774 = vadd.xlane.f32.xlu0 %v2773_v18 }
 0x767   : > { %v2742_v20 = vpop.xlane.xlu0 %2741 }
 0x768   : > { %v2744_v59 = vmul.f32 0.0078125, %v2742_v20 }
 0x76a   : > { %v2745_v62 = vsub.f32 %v2733_v26, %v2744_v59 }
 0x76b   : > { %v2775_v22 = vpop.xlane.xlu0 %2774 }
 0x76c   : > { %v2777_v28 = vadd.f32 %v2776_v15, %v2775_v22  ;;  %v2746_v30 = vmul.f32 %v2745_v62, %v2745_v62 }
 0x76e   : > { %2779 = vst.msk [vmem:[%s606_s22] sm:$0x1] %vm2778_vm4, %v2777_v28  ;;  %v2747_v31 = vsel %vm736_vm3, %v2746_v30, 0.0  ;;  %s3619_s22 = scalar_lea.vmem %s3618_s0, 32 }
 0x76f   : > { %2748 = vadd.xlane.f32.xlu1 %v2747_v31  ;;  %p3621_p1 = scmp.lt.s32.totalorder %s3619_s22, %s3613_s25 }
 0x771   : > { %p3622_p2 = por %p3621_p1, %p3620_p0 }
 0x773   : > { %p3623_p3 = pnand %p3622_p2, %p3616_p13 }
 0x775   : > { %3626 = shalt.err (!%p3623_p3)
}
 0x776   : > { %s3627_s2 = scalar_lea.hbm %s4748_s28, 16  ;;  %s3631_s24 = scalar_lea.hbm %s4841_s16, 32 }
 0x777   : > { %p3628_p4 = scmp.ne.s32.totalorder %s4748_s28, %s3627_s2  ;;  %p3632_p9 = scmp.lt.u32.totalorder %s4748_s28, %s4841_s16 }
 0x778   : > { %p3633_p10 = scmp.lt.u32.totalorder %s3631_s24, %s3627_s2  ;;  %p3635_p12 = scmp.lt.u32.totalorder %s3627_s2, %s4748_s28 }
 0x779   : > { %p3629_p7 = pnand %p3628_p4, %p3848_p5 }
 0x77a   : > { %p3634_p11 = por %p3633_p10, %p3632_p9 }
 0x77b   : > { %p3630_p8 = pneg %p3629_p7 }
 0x77c   : > { %p3636_p13 = por %p3635_p12, %p3634_p11 }
 0x77e   : > { %p3637_p0 = pnand %p3636_p13, %p3630_p8 }
 0x780   : > { %3640 = shalt.err (!%p3637_p0)
}
 0x781   : > { %3232 = dma.vmem_to_hbm [thread:$0]  (%p3848_p5), %s2801_s21, 16, %s4748_s28, %s2781_s30   ;;  %v2738_v37 = vld [vmem:[%s4837_s12] sm:$0x1] }
 0x782   : > { %v2739_v38 = vld [vmem:[%s4838_s13] sm:$0x1]  ;;  %s590_s27 = scalar_lea.vmem [#allocation5], %s3873_s26  ;;  %s4865_s28 = sshll.u32 %s3831_s15, 4 }
 0x783   : > { %s2813_s1 = sshll.u32 %s590_s27, 4  ;;  %s4782_s24 = scalar_lea.hbm %s4842_s17, %s4865_s28  ;;  %s4784_s1 = int_to_ptr.vmem [resolvable:$true] %s2813_s1 }
 0x784   : > { %s2785_s0 = scalar_lea.sflag [#allocation6], %s3873_s26  ;;  %s3641_s20 = scalar_lea.vmem %s4784_s1, 16 }
 0x785   : > { %p3642_p1 = scmp.ne.s32.totalorder %s4784_s1, %s3641_s20  ;;  %s3711_s25 = smov [#allocation5]  }
 0x786   : > { %s3645_s22 = sshll.u32 %s3711_s25, 4  ;;  %s3646_s22 = int_to_ptr.vmem [resolvable:$false] %s3645_s22 }
 0x787   : > { %p3643_p2 = pnand %p3642_p1, %p3848_p5  ;;  %s3647_s15 = scalar_lea.vmem %s3646_s22, 32 }
 0x788   : > { %p3648_p4 = scmp.lt.s32.totalorder %s4784_s1, %s3646_s22  ;;  %p3649_p7 = scmp.lt.s32.totalorder %s3647_s15, %s3641_s20 }
 0x789   : > { %p3644_p3 = pneg %p3643_p2 }
 0x78a   : > { %p3650_p8 = por %p3649_p7, %p3648_p4 }
 0x78c   : > { %p3651_p9 = pnand %p3650_p8, %p3644_p3 }
 0x7fc   : > { %v2749_v32 = vpop.xlane.xlu1 %2748 }
 0x7fd   : > { %v2750_v33 = vmul.f32 0.0078125, %v2749_v32 }
 0x7ff   : > { %v2751_v34 = vadd.f32 1e-05, %v2750_v33 }
 0x801   : > { %3611 = vrsqrt.f32 %v2751_v34 }
 0x80b   : > { %v3612_v36 = vpop.eup %3611 }
 0x80c   : > { %v2753_v23 = vmul.f32 %v3612_v36, %v2745_v62 }
 0x80e   : > { %v2754_v39 = vmul.f32 %v2753_v23, %v2738_v37 }
 0x810   : > { %v2755_v27 = vadd.f32 %v2754_v39, %v2739_v38 }
 0x812   : > { %2756 = vst [vmem:[%s590_s27] sm:$0x1] %v2755_v27 }
 0x813   : > { %3654 = shalt.err (!%p3651_p9)
}
 0x814   : > { %s3655_s26 = scalar_lea.hbm %s4782_s24, 16  ;;  %s3659_s28 = scalar_lea.hbm %s4842_s17, 32 }
 0x815   : > { %p3656_p10 = scmp.ne.s32.totalorder %s4782_s24, %s3655_s26  ;;  %p3660_p13 = scmp.lt.u32.totalorder %s4782_s24, %s4842_s17 }
 0x816   : > { %p3661_p0 = scmp.lt.u32.totalorder %s3659_s28, %s3655_s26  ;;  %p3663_p2 = scmp.lt.u32.totalorder %s3655_s26, %s4782_s24 }
 0x817   : > { %p3657_p11 = pnand %p3656_p10, %p3848_p5 }
 0x818   : > { %p3662_p1 = por %p3661_p0, %p3660_p13 }
 0x819   : > { %p3658_p12 = pneg %p3657_p11 }
 0x81a   : > { %p3664_p3 = por %p3663_p2, %p3662_p1 }
 0x81c   : > { %p3665_p4 = pnand %p3664_p3, %p3658_p12 }
 0x81e   : > { %3668 = shalt.err (!%p3665_p4)
}
 0x81f   : > { %3233 = dma.vmem_to_hbm [thread:$0]  (%p3848_p5), %s4784_s1, 16, %s4782_s24, %s2785_s0  }
 0x820 PF: > { %p3243_p7 = scmp.ge.s32.totalorder %s3707_s19, 2  ;;  %s2828_s25 = sand.u32 1, %s3695_s29  }
 0x821   : > { %s2829_s22 = scalar_lea.sflag [#allocation4], %s2828_s25 }
 0x822   : > { %p3237_p8 = pnand %p3243_p7, %p3852_p6 }
 0x824   : > { %3686 = dma.done.wait (!%p3237_p8), %s2829_s22, 16  }
 0x825   : > { %3688 = vsyncadd (!%p3237_p8), %s2829_s22, 4294967280  ;;  %s2837_s15 = scalar_lea.sflag [#allocation6], %s2828_s25 }
 0x826   : > { %3690 = dma.done.wait (!%p3237_p8), %s2837_s15, 16  }
 0x827   : > { %3692 = vsyncadd (!%p3237_p8), %s2837_s15, 4294967280  ;;  %s4867_s19 = sld [smem:[#allocation11_spill]]  ;;  %s4868_s29 = sld [smem:[#allocation9_spill]] }
 0x828   : > { %s4869_s30 = sld [smem:[#allocation10_spill]]  ;;  %s4870_s0 = sld [smem:[#allocation12_spill]] }
 0x82d   : > { %p34_p5 = scmp.ge.s32.totalorder %s4867_s19, 4  }
 0x82f   :  { %36 = sbr.rel (!%p34_p5) target bundleno = 9 (0x9), region = 151 }
 0x836   :  { %2847 = vsyncpa [#allocation4], 1 }
 0x837   :  { %2849 = vsyncpa [#allocation4 + $0x1], 1 }
 0x838   :  { %2850 = vsyncpa [#allocation6], 1 }
 0x839   :  { %2852 = vsyncpa [#allocation6 + $0x1], 1 }

// kernel: mil_forward.2
= control target key start
LH: loop header
LB: loop body
LE: loop exit
PB: predicated region body
PF: predicated region fallthrough
CT: control target
= control target key end

     0   :  { %s5065_s0 = inlined_call_operand.vmem [shape: f32[16,768], index: 0, kind: input, shape index: {}]   ;;  %s5066_s1 = inlined_call_operand.hbm [shape: bf16[768,512], index: 1, kind: input, shape index: {}]   ;;  %s5067_s2 = inlined_call_operand.vmem [shape: f32[1,512], index: 2, kind: input, shape index: {}]   ;;  %s5068_s3 = inlined_call_operand.hbm [shape: bf16[512,640], index: 3, kind: input, shape index: {}]   ;;  %s5069_s4 = inlined_call_operand.vmem [shape: f32[1,640], index: 4, kind: input, shape index: {}]   ;;  %s5070_s5 = inlined_call_operand.vmem [shape: f32[1,512], index: 5, kind: input, shape index: {}]   ;;  %s5071_s6 = inlined_call_operand.vmem [shape: f32[1,512], index: 6, kind: input, shape index: {}]   ;;  %s5072_s7 = inlined_call_operand.vmem [shape: f32[1,128], index: 7, kind: input, shape index: {}]   ;;  %s5073_s8 = inlined_call_operand.vmem [shape: f32[1,128], index: 8, kind: input, shape index: {}]   ;;  %s5074_s9 = inlined_call_operand.vmem [shape: bf16[512,128], index: 9, kind: input, shape index: {}]   ;;  %s5075_s10 = inlined_call_operand.vmem [shape: f32[1,128], index: 10, kind: input, shape index: {}]   ;;  %s5076_s11 = inlined_call_operand.vmem [shape: f32[1,128], index: 11, kind: input, shape index: {}]   ;;  %s5077_s12 = inlined_call_operand.vmem [shape: f32[1,128], index: 12, kind: input, shape index: {}]   ;;  %s5078_s13 = inlined_call_operand.vmem [shape: f32[1,128], index: 13, kind: input, shape index: {}]   ;;  %s5079_s14 = inlined_call_operand.<no memory space> [shape: f32[1,1], index: 14, kind: input, shape index: {}]   ;;  %s5080_s15 = inlined_call_operand.vmem [shape: bf16[16,512], index: 15, kind: output, shape index: {0}]   ;;  %s5081_s16 = inlined_call_operand.hbm [shape: f32[16,128], index: 16, kind: output, shape index: {1}]   ;;  %s5082_s17 = inlined_call_operand.vmem [shape: f32[16,1], index: 17, kind: output, shape index: {2}]  }
   0x1   :  { %5085 = sst [smem:[#allocation12_spill]] %s5065_s0  ;;  %v23_v0 = vstv %s5079_s14 }
   0x2   :  { %5086 = sst [smem:[#allocation13_spill]] %s5066_s1  ;;  %24 = vst [vmem:[#allocation2] sm:$0x1] %v23_v0 }
   0x3   :  { %25 = vsyncpa [#allocation4], 0 }
   0x4   :  { %26 = vsyncpa [#allocation7], 0 }
   0x5   :  { %27 = vsyncpa [#allocation5], 0  ;;  %s4642_s26 = smov [#allocation3]   ;;  %s5087_s0 = sld [smem:[#allocation13_spill]] }
   0x6   :  { %s35_s27 = sshll.u32 %s4642_s26, 4  ;;  %s36_s27 = int_to_ptr.vmem [resolvable:$true] %s35_s27 }
   0xb   :  { %s4570_s30 = scalar_lea.hbm %s5087_s0, 24576 }
   0xc   :  { %p4571_p0 = scmp.ne.s32.totalorder %s5087_s0, %s4570_s30  ;;  %p4574_p1 = scmp.lt.u32.totalorder %s4570_s30, %s5087_s0 }
   0xe   :  { %p4576_p2 = pnand %p4574_p1, %p4571_p0 }
  0x10   :  { %4579 = shalt.err (!%p4576_p2)
}
  0x11   :  { %s4580_s14 = scalar_lea.vmem %s36_s27, 24576  ;;  %p4585_p4 = scmp.lt.s32.totalorder %s36_s27, %s36_s27 }
  0x12   :  { %p4581_p3 = scmp.ne.s32.totalorder %s36_s27, %s4580_s14  ;;  %p4586_p5 = scmp.lt.s32.totalorder %s4580_s14, %s4580_s14 }
  0x14   :  { %p4587_p6 = por %p4586_p5, %p4585_p4 }
  0x16   :  { %p4588_p7 = pnand %p4587_p6, %p4581_p3 }
  0x18   :  { %4591 = shalt.err (!%p4588_p7)
}
  0x19   :  { %s4643_s21 = smov 256   ;;  %s4644_s22 = smov 16  }
  0x1a   :  { %41 = dma.hbm_to_vmem [thread:$0]  %s5087_s0, 24576, %s36_s27, [#allocation4], %s4643_s21, %s4643_s21, %s4644_s22  }
  0x1b   :  { %s4645_s25 = smov [#allocation6]   ;;  %s4592_s30 = scalar_lea.hbm %s5068_s3, 20480 }
  0x1c   :  { %s49_s26 = sshll.u32 %s4645_s25, 4  ;;  %p4593_p8 = scmp.ne.s32.totalorder %s5068_s3, %s4592_s30  ;;  %s50_s26 = int_to_ptr.vmem [resolvable:$true] %s49_s26 }
  0x1d   :  { %p4596_p9 = scmp.lt.u32.totalorder %s4592_s30, %s5068_s3 }
  0x1f   :  { %p4598_p10 = pnand %p4596_p9, %p4593_p8 }
  0x21   :  { %4601 = shalt.err (!%p4598_p10)
}
  0x22   :  { %s4602_s14 = scalar_lea.vmem %s50_s26, 20480  ;;  %p4607_p12 = scmp.lt.s32.totalorder %s50_s26, %s50_s26 }
  0x23   :  { %p4603_p11 = scmp.ne.s32.totalorder %s50_s26, %s4602_s14  ;;  %p4608_p13 = scmp.lt.s32.totalorder %s4602_s14, %s4602_s14 }
  0x25   :  { %p4609_p0 = por %p4608_p13, %p4607_p12 }
  0x27   :  { %p4610_p1 = pnand %p4609_p0, %p4603_p11 }
  0x29   :  { %4613 = shalt.err (!%p4610_p1)
}
  0x2a   :  { %s4646_s27 = smov 320   ;;  %s4647_s0 = smov 20  }
  0x2b   :  { %55 = dma.hbm_to_vmem [thread:$0]  %s5068_s3, 20480, %s50_s26, [#allocation7], %s4646_s27, %s4646_s27, %s4647_s0  }
  0x2c   :  { %4636 = dma.done.wait [#allocation4], 24576  }
  0x2d   :  { %4637 = vsyncadd [#allocation4], 4294942720 }
  0x2e   :  { %4638 = dma.done.wait [#allocation7], 20480  }
  0x2f   :  { %4639 = vsyncadd [#allocation7], 4294946816  ;;  %v4010_v1 = vld [vmem:[#allocation3 + $0x4] ss:$16 sps:$4 sm:$0xff]   ;;  %v4012_v2 = vld [vmem:[#allocation3 + $0xc] ss:$16 sps:$4 sm:$0xff]  }
  0x30   :  { %1277 = vmatprep.subr.bf16.mxu0 %v4010_v1  ;;  %v4014_v3 = vld [vmem:[#allocation3] ss:$16 sps:$4 sm:$0xff]   ;;  %v4015_v4 = vld [vmem:[#allocation3 + $0x8] ss:$16 sps:$4 sm:$0xff]   ;;  %1406 = vmatprep.subr.bf16.mxu1 %v4012_v2  ;;  %v4016_v5 = vld [vmem:[#allocation3 + $0x24] ss:$16 sps:$4 sm:$0xff]  }
  0x31   :  { %1278 = vmatpush1.bf16.msra.mxu0 %v4014_v3  ;;  %1407 = vmatpush1.bf16.msra.mxu1 %v4015_v4  ;;  %v4018_v6 = vld [vmem:[#allocation3 + $0x2c] ss:$16 sps:$4 sm:$0xff]   ;;  %v4020_v7 = vld [vmem:[#allocation3 + $0x20] ss:$16 sps:$4 sm:$0xff]   ;;  %v4021_v8 = vld [vmem:[#allocation3 + $0x28] ss:$16 sps:$4 sm:$0xff]  }
  0x32   :  { %1279 = vmatprep.subr.bf16.mxu0 %v4016_v5  ;;  %1408 = vmatprep.subr.bf16.mxu1 %v4018_v6  ;;  %v4022_v9 = vld [vmem:[#allocation3 + $0x44] ss:$16 sps:$4 sm:$0xff]   ;;  %v4024_v10 = vld [vmem:[#allocation3 + $0x4c] ss:$16 sps:$4 sm:$0xff]   ;;  %v4026_v11 = vld [vmem:[#allocation3 + $0x40] ss:$16 sps:$4 sm:$0xff]  }
  0x33   :  { %v4027_v12 = vld [vmem:[#allocation3 + $0x48] ss:$16 sps:$4 sm:$0xff]   ;;  %v4028_v13 = vld [vmem:[#allocation3 + $0x64] ss:$16 sps:$4 sm:$0xff]   ;;  %v4030_v14 = vld [vmem:[#allocation3 + $0x6c] ss:$16 sps:$4 sm:$0xff]  }
  0x34   :  { %v4032_v15 = vld [vmem:[#allocation3 + $0x60] ss:$16 sps:$4 sm:$0xff]   ;;  %v4033_v16 = vld [vmem:[#allocation3 + $0x68] ss:$16 sps:$4 sm:$0xff]   ;;  %v4034_v17 = vld [vmem:[#allocation3 + $0x84] ss:$16 sps:$4 sm:$0xff]  }
  0x35   :  { %1280 = vmatpush1.bf16.msra.mxu0 %v4020_v7  ;;  %1409 = vmatpush1.bf16.msra.mxu1 %v4021_v8  ;;  %v4036_v18 = vld [vmem:[#allocation3 + $0x8c] ss:$16 sps:$4 sm:$0xff]   ;;  %v4038_v19 = vld [vmem:[#allocation3 + $0x80] ss:$16 sps:$4 sm:$0xff]   ;;  %v4039_v20 = vld [vmem:[#allocation3 + $0x88] ss:$16 sps:$4 sm:$0xff]  }
  0x36   :  { %1281 = vmatprep.subr.bf16.mxu0 %v4022_v9  ;;  %1410 = vmatprep.subr.bf16.mxu1 %v4024_v10  ;;  %v4040_v21 = vld [vmem:[#allocation3 + $0xa4] ss:$16 sps:$4 sm:$0xff]   ;;  %v4042_v22 = vld [vmem:[#allocation3 + $0xac] ss:$16 sps:$4 sm:$0xff]   ;;  %v4044_v23 = vld [vmem:[#allocation3 + $0xa0] ss:$16 sps:$4 sm:$0xff]  }
  0x37   :  { %v4045_v24 = vld [vmem:[#allocation3 + $0xa8] ss:$16 sps:$4 sm:$0xff]   ;;  %v4046_v25 = vld [vmem:[#allocation3 + $0xc4] ss:$16 sps:$4 sm:$0xff]   ;;  %v4048_v26 = vld [vmem:[#allocation3 + $0xcc] ss:$16 sps:$4 sm:$0xff]  }
  0x38   :  { %v4050_v27 = vld [vmem:[#allocation3 + $0xc0] ss:$16 sps:$4 sm:$0xff]   ;;  %v4051_v28 = vld [vmem:[#allocation3 + $0xc8] ss:$16 sps:$4 sm:$0xff]   ;;  %v4052_v29 = vld [vmem:[#allocation3 + $0xe4] ss:$16 sps:$4 sm:$0xff]  }
  0x39   :  { %1282 = vmatpush1.bf16.msra.mxu0 %v4026_v11  ;;  %1411 = vmatpush1.bf16.msra.mxu1 %v4027_v12  ;;  %v4054_v30 = vld [vmem:[#allocation3 + $0xec] ss:$16 sps:$4 sm:$0xff]   ;;  %v4056_v31 = vld [vmem:[#allocation3 + $0xe0] ss:$16 sps:$4 sm:$0xff]   ;;  %v4057_v32 = vld [vmem:[#allocation3 + $0xe8] ss:$16 sps:$4 sm:$0xff]  }
  0x3a   :  { %1283 = vmatprep.subr.bf16.mxu0 %v4028_v13  ;;  %1412 = vmatprep.subr.bf16.mxu1 %v4030_v14  ;;  %v4058_v33 = vld [vmem:[#allocation3 + $0x104] ss:$16 sps:$4 sm:$0xff]   ;;  %v4060_v34 = vld [vmem:[#allocation3 + $0x10c] ss:$16 sps:$4 sm:$0xff]   ;;  %v4062_v35 = vld [vmem:[#allocation3 + $0x100] ss:$16 sps:$4 sm:$0xff]  }
  0x3b   :  { %v4063_v36 = vld [vmem:[#allocation3 + $0x108] ss:$16 sps:$4 sm:$0xff]   ;;  %v4064_v37 = vld [vmem:[#allocation3 + $0x124] ss:$16 sps:$4 sm:$0xff]   ;;  %v4066_v38 = vld [vmem:[#allocation3 + $0x12c] ss:$16 sps:$4 sm:$0xff]  }
  0x3c   :  { %v4068_v39 = vld [vmem:[#allocation3 + $0x120] ss:$16 sps:$4 sm:$0xff]   ;;  %v4069_v40 = vld [vmem:[#allocation3 + $0x128] ss:$16 sps:$4 sm:$0xff]   ;;  %v4070_v41 = vld [vmem:[#allocation3 + $0x144] ss:$16 sps:$4 sm:$0xff]  }
  0x3d   :  { %1284 = vmatpush1.bf16.msra.mxu0 %v4032_v15  ;;  %1413 = vmatpush1.bf16.msra.mxu1 %v4033_v16  ;;  %v4072_v42 = vld [vmem:[#allocation3 + $0x14c] ss:$16 sps:$4 sm:$0xff]   ;;  %v4074_v43 = vld [vmem:[#allocation3 + $0x140] ss:$16 sps:$4 sm:$0xff]   ;;  %v4075_v44 = vld [vmem:[#allocation3 + $0x148] ss:$16 sps:$4 sm:$0xff]  }
  0x3e   :  { %1285 = vmatprep.subr.bf16.mxu0 %v4034_v17  ;;  %1414 = vmatprep.subr.bf16.mxu1 %v4036_v18  ;;  %v4076_v45 = vld [vmem:[#allocation3 + $0x164] ss:$16 sps:$4 sm:$0xff]   ;;  %v4078_v46 = vld [vmem:[#allocation3 + $0x16c] ss:$16 sps:$4 sm:$0xff]   ;;  %s5088_s24 = sld [smem:[#allocation12_spill]]  ;;  %vm3445_vm0 = vcmask 7168  }
  0x3f   :  { %v4080_v49 = vld [vmem:[#allocation3 + $0x160] ss:$16 sps:$4 sm:$0xff]   ;;  %v4081_v50 = vld [vmem:[#allocation3 + $0x168] ss:$16 sps:$4 sm:$0xff]   ;;  %v4082_v52 = vld [vmem:[#allocation3 + $0x184] ss:$16 sps:$4 sm:$0xff]  }
  0x40   :  { %v4084_v53 = vld [vmem:[#allocation3 + $0x18c] ss:$16 sps:$4 sm:$0xff]   ;;  %v4086_v54 = vld [vmem:[#allocation3 + $0x180] ss:$16 sps:$4 sm:$0xff]   ;;  %v4087_v55 = vld [vmem:[#allocation3 + $0x188] ss:$16 sps:$4 sm:$0xff]  }
  0x41   :  { %1286 = vmatpush1.bf16.msra.mxu0 %v4038_v19  ;;  %1415 = vmatpush1.bf16.msra.mxu1 %v4039_v20  ;;  %v4088_v56 = vld [vmem:[#allocation3 + $0x1a4] ss:$16 sps:$4 sm:$0xff]   ;;  %v4090_v57 = vld [vmem:[#allocation3 + $0x1ac] ss:$16 sps:$4 sm:$0xff]   ;;  %v4092_v58 = vld [vmem:[#allocation3 + $0x1a0] ss:$16 sps:$4 sm:$0xff]  }
  0x42   :  { %1287 = vmatprep.subr.bf16.mxu0 %v4040_v21  ;;  %1416 = vmatprep.subr.bf16.mxu1 %v4042_v22  ;;  %v4093_v59 = vld [vmem:[#allocation3 + $0x1a8] ss:$16 sps:$4 sm:$0xff]   ;;  %v4094_v60 = vld [vmem:[#allocation3 + $0x1c4] ss:$16 sps:$4 sm:$0xff]   ;;  %v4096_v61 = vld [vmem:[#allocation3 + $0x1cc] ss:$16 sps:$4 sm:$0xff]  }
  0x43   :  { %v4098_v62 = vld [vmem:[#allocation3 + $0x1c0] ss:$16 sps:$4 sm:$0xff]   ;;  %v4099_v63 = vld [vmem:[#allocation3 + $0x1c8] ss:$16 sps:$4 sm:$0xff]   ;;  %v4100_v0 = vld [vmem:[#allocation3 + $0x1e4] ss:$16 sps:$4 sm:$0xff]  }
  0x44   :  { %v86_v47 = vld [vmem:[%s5088_s24 + $0x8] sm:$0xff]  ;;  %v92_v48 = vld [vmem:[%s5088_s24 + $0x38] sm:$0xff]  ;;  %v4104_v2 = vld [vmem:[#allocation3 + $0x1e0] ss:$16 sps:$4 sm:$0xff]   ;;  %s4648_s22 = smov [#allocation8]  }
  0x45   :  { %1288 = vmatpush1.bf16.msra.mxu0 %v4044_v23  ;;  %1417 = vmatpush1.bf16.msra.mxu1 %v4045_v24  ;;  %v98_v51 = vpack.c.bf16 %v92_v48, %v86_v47  ;;  %v4102_v1 = vld [vmem:[#allocation3 + $0x1ec] ss:$16 sps:$4 sm:$0xff]   ;;  %v4105_v3 = vld [vmem:[#allocation3 + $0x1e8] ss:$16 sps:$4 sm:$0xff]   ;;  %v4108_v4 = vld [vmem:[#allocation3 + $0x204] ss:$16 sps:$4 sm:$0xff]  }
  0x46   :  { %1289 = vmatprep.subr.bf16.mxu0 %v4046_v25  ;;  %1418 = vmatprep.subr.bf16.mxu1 %v4048_v26  ;;  %v85_v5 = vld [vmem:[%s5088_s24] sm:$0xff]  ;;  %v91_v6 = vld [vmem:[%s5088_s24 + $0x30] sm:$0xff]  ;;  %v4109_v9 = vld [vmem:[#allocation3 + $0x208] ss:$16 sps:$4 sm:$0xff]  }
  0x47   :  { %1309 = vmatprep.mubr.bf16.mxu0 %v98_v51  ;;  %1438 = vmatprep.mubr.bf16.mxu1 %v98_v51  ;;  %v4111_v7 = vld [vmem:[#allocation3 + $0x20c] ss:$16 sps:$4 sm:$0xff]   ;;  %v4106_v8 = vld [vmem:[#allocation3 + $0x200] ss:$16 sps:$4 sm:$0xff]   ;;  %v97_v10 = vpack.c.bf16 %v91_v6, %v85_v5  ;;  %v4114_v11 = vld [vmem:[#allocation3 + $0x224] ss:$16 sps:$4 sm:$0xff]  }
  0x48   :  { %v4117_v12 = vld [vmem:[#allocation3 + $0x22c] ss:$16 sps:$4 sm:$0xff]   ;;  %v4112_v13 = vld [vmem:[#allocation3 + $0x220] ss:$16 sps:$4 sm:$0xff]   ;;  %v4115_v14 = vld [vmem:[#allocation3 + $0x228] ss:$16 sps:$4 sm:$0xff]  }
  0x49   :  { %1290 = vmatpush1.bf16.msra.mxu0 %v4050_v27  ;;  %1419 = vmatpush1.bf16.msra.mxu1 %v4051_v28  ;;  %v4120_v15 = vld [vmem:[#allocation3 + $0x244] ss:$16 sps:$4 sm:$0xff]   ;;  %v4123_v16 = vld [vmem:[#allocation3 + $0x24c] ss:$16 sps:$4 sm:$0xff]   ;;  %v4118_v17 = vld [vmem:[#allocation3 + $0x240] ss:$16 sps:$4 sm:$0xff]  }
  0x4a   :  { %1291 = vmatprep.subr.bf16.mxu0 %v4052_v29  ;;  %1420 = vmatprep.subr.bf16.mxu1 %v4054_v30  ;;  %v4121_v18 = vld [vmem:[#allocation3 + $0x248] ss:$16 sps:$4 sm:$0xff]   ;;  %v4126_v19 = vld [vmem:[#allocation3 + $0x264] ss:$16 sps:$4 sm:$0xff]   ;;  %v4129_v20 = vld [vmem:[#allocation3 + $0x26c] ss:$16 sps:$4 sm:$0xff]  }
  0x4b   :  { %v4124_v21 = vld [vmem:[#allocation3 + $0x260] ss:$16 sps:$4 sm:$0xff]   ;;  %v4127_v22 = vld [vmem:[#allocation3 + $0x268] ss:$16 sps:$4 sm:$0xff]   ;;  %v4132_v23 = vld [vmem:[#allocation3 + $0x284] ss:$16 sps:$4 sm:$0xff]  }
  0x4c   :  { %v4135_v24 = vld [vmem:[#allocation3 + $0x28c] ss:$16 sps:$4 sm:$0xff]   ;;  %v4130_v25 = vld [vmem:[#allocation3 + $0x280] ss:$16 sps:$4 sm:$0xff]   ;;  %v4133_v26 = vld [vmem:[#allocation3 + $0x288] ss:$16 sps:$4 sm:$0xff]  }
  0x4d   :  { %1292 = vmatpush1.bf16.msra.mxu0 %v4056_v31  ;;  %1421 = vmatpush1.bf16.msra.mxu1 %v4057_v32  ;;  %v4138_v27 = vld [vmem:[#allocation3 + $0x2a4] ss:$16 sps:$4 sm:$0xff]   ;;  %v4141_v28 = vld [vmem:[#allocation3 + $0x2ac] ss:$16 sps:$4 sm:$0xff]   ;;  %v4136_v29 = vld [vmem:[#allocation3 + $0x2a0] ss:$16 sps:$4 sm:$0xff]  }
  0x4e   :  { %1293 = vmatprep.subr.bf16.mxu0 %v4058_v33  ;;  %1422 = vmatprep.subr.bf16.mxu1 %v4060_v34  ;;  %v4139_v30 = vld [vmem:[#allocation3 + $0x2a8] ss:$16 sps:$4 sm:$0xff]   ;;  %v4144_v31 = vld [vmem:[#allocation3 + $0x2c4] ss:$16 sps:$4 sm:$0xff]   ;;  %v4147_v32 = vld [vmem:[#allocation3 + $0x2cc] ss:$16 sps:$4 sm:$0xff]  }
  0x4f   :  { %v88_v33 = vld [vmem:[%s5088_s24 + $0x18] sm:$0xff]  ;;  %v94_v34 = vld [vmem:[%s5088_s24 + $0x48] sm:$0xff]  ;;  %v4160_v48 = vld [vmem:[#allocation3 + $0x320] ss:$16 sps:$4 sm:$0xff]  }
  0x50   :  { %v4165_v47 = vld [vmem:[#allocation3 + $0x32c] ss:$16 sps:$4 sm:$0xff]   ;;  %v4193_v5 = vld [vmem:[#allocation3 + $0x3c8] ss:$16 sps:$4 sm:$0xff]   ;;  %v4198_v6 = vld [vmem:[#allocation3 + $0x3e4] ss:$16 sps:$4 sm:$0xff]  }
  0x51   :  { %1294 = vmatpush1.bf16.msra.mxu0 %v4062_v35  ;;  %1423 = vmatpush1.bf16.msra.mxu1 %v4063_v36  ;;  %v4142_v35 = vld [vmem:[#allocation3 + $0x2c0] ss:$16 sps:$4 sm:$0xff]   ;;  %v4145_v36 = vld [vmem:[#allocation3 + $0x2c8] ss:$16 sps:$4 sm:$0xff]   ;;  %v4171_v51 = vld [vmem:[#allocation3 + $0x34c] ss:$16 sps:$4 sm:$0xff]  }
  0x52   :  { %1295 = vmatprep.subr.bf16.mxu0 %v4064_v37  ;;  %1424 = vmatprep.subr.bf16.mxu1 %v4066_v38  ;;  %v100_v37 = vpack.c.bf16 %v94_v34, %v88_v33  ;;  %v4150_v38 = vld [vmem:[#allocation3 + $0x2e4] ss:$16 sps:$4 sm:$0xff]   ;;  %v4231_v33 = vld [vmem:[#allocation3 + $0x48c] ss:$16 sps:$4 sm:$0xff]   ;;  %v4226_v34 = vld [vmem:[#allocation3 + $0x480] ss:$16 sps:$4 sm:$0xff]  }
  0x55   :  { %1296 = vmatpush1.bf16.msra.mxu0 %v4068_v39  ;;  %1425 = vmatpush1.bf16.msra.mxu1 %v4069_v40  ;;  %v4153_v39 = vld [vmem:[#allocation3 + $0x2ec] ss:$16 sps:$4 sm:$0xff]   ;;  %v4148_v40 = vld [vmem:[#allocation3 + $0x2e0] ss:$16 sps:$4 sm:$0xff]  }
  0x56   :  { %1297 = vmatprep.subr.bf16.mxu0 %v4070_v41  ;;  %1426 = vmatprep.subr.bf16.mxu1 %v4072_v42  ;;  %v4151_v41 = vld [vmem:[#allocation3 + $0x2e8] ss:$16 sps:$4 sm:$0xff]   ;;  %v4156_v42 = vld [vmem:[#allocation3 + $0x304] ss:$16 sps:$4 sm:$0xff]  }
  0x59   :  { %1298 = vmatpush1.bf16.msra.mxu0 %v4074_v43  ;;  %1427 = vmatpush1.bf16.msra.mxu1 %v4075_v44  ;;  %v4159_v43 = vld [vmem:[#allocation3 + $0x30c] ss:$16 sps:$4 sm:$0xff]   ;;  %v4154_v44 = vld [vmem:[#allocation3 + $0x300] ss:$16 sps:$4 sm:$0xff]  }
  0x5a   :  { %1299 = vmatprep.subr.bf16.mxu0 %v4076_v45  ;;  %1428 = vmatprep.subr.bf16.mxu1 %v4078_v46  ;;  %v4157_v45 = vld [vmem:[#allocation3 + $0x308] ss:$16 sps:$4 sm:$0xff]   ;;  %v4162_v46 = vld [vmem:[#allocation3 + $0x324] ss:$16 sps:$4 sm:$0xff]  }
  0x5d   :  { %1300 = vmatpush1.bf16.msra.mxu0 %v4080_v49  ;;  %1429 = vmatpush1.bf16.msra.mxu1 %v4081_v50  ;;  %v4163_v49 = vld [vmem:[#allocation3 + $0x328] ss:$16 sps:$4 sm:$0xff]   ;;  %v4168_v50 = vld [vmem:[#allocation3 + $0x344] ss:$16 sps:$4 sm:$0xff]  }
  0x5e   :  { %1301 = vmatprep.subr.bf16.mxu0 %v4082_v52  ;;  %1430 = vmatprep.subr.bf16.mxu1 %v4084_v53  ;;  %v4166_v52 = vld [vmem:[#allocation3 + $0x340] ss:$16 sps:$4 sm:$0xff]   ;;  %v4169_v53 = vld [vmem:[#allocation3 + $0x348] ss:$16 sps:$4 sm:$0xff]  }
  0x61   :  { %1302 = vmatpush1.bf16.msra.mxu0 %v4086_v54  ;;  %1431 = vmatpush1.bf16.msra.mxu1 %v4087_v55  ;;  %v4174_v54 = vld [vmem:[#allocation3 + $0x364] ss:$16 sps:$4 sm:$0xff]   ;;  %v4177_v55 = vld [vmem:[#allocation3 + $0x36c] ss:$16 sps:$4 sm:$0xff]  }
  0x62   :  { %1303 = vmatprep.subr.bf16.mxu0 %v4088_v56  ;;  %1432 = vmatprep.subr.bf16.mxu1 %v4090_v57  ;;  %v4172_v56 = vld [vmem:[#allocation3 + $0x360] ss:$16 sps:$4 sm:$0xff]   ;;  %v4175_v57 = vld [vmem:[#allocation3 + $0x368] ss:$16 sps:$4 sm:$0xff]  }
  0x65   :  { %1304 = vmatpush1.bf16.msra.mxu0 %v4092_v58  ;;  %1433 = vmatpush1.bf16.msra.mxu1 %v4093_v59  ;;  %v4180_v58 = vld [vmem:[#allocation3 + $0x384] ss:$16 sps:$4 sm:$0xff]   ;;  %v4183_v59 = vld [vmem:[#allocation3 + $0x38c] ss:$16 sps:$4 sm:$0xff]  }
  0x66   :  { %1305 = vmatprep.subr.bf16.mxu0 %v4094_v60  ;;  %1434 = vmatprep.subr.bf16.mxu1 %v4096_v61  ;;  %v4178_v60 = vld [vmem:[#allocation3 + $0x380] ss:$16 sps:$4 sm:$0xff]   ;;  %v4181_v61 = vld [vmem:[#allocation3 + $0x388] ss:$16 sps:$4 sm:$0xff]  }
  0x69   :  { %1306 = vmatpush1.bf16.msra.mxu0 %v4098_v62  ;;  %1435 = vmatpush1.bf16.msra.mxu1 %v4099_v63  ;;  %v4186_v62 = vld [vmem:[#allocation3 + $0x3a4] ss:$16 sps:$4 sm:$0xff]   ;;  %v4189_v63 = vld [vmem:[#allocation3 + $0x3ac] ss:$16 sps:$4 sm:$0xff]  }
  0x6a   :  { %1307 = vmatprep.subr.bf16.mxu0 %v4100_v0  ;;  %1436 = vmatprep.subr.bf16.mxu1 %v4102_v1  ;;  %v4184_v0 = vld [vmem:[#allocation3 + $0x3a0] ss:$16 sps:$4 sm:$0xff]   ;;  %v4187_v1 = vld [vmem:[#allocation3 + $0x3a8] ss:$16 sps:$4 sm:$0xff]  }
  0x6d   :  { %1308 = vmatpush1.bf16.msra.mxu0 %v4104_v2  ;;  %1437 = vmatpush1.bf16.msra.mxu1 %v4105_v3  ;;  %v4192_v2 = vld [vmem:[#allocation3 + $0x3c4] ss:$16 sps:$4 sm:$0xff]   ;;  %v4195_v3 = vld [vmem:[#allocation3 + $0x3cc] ss:$16 sps:$4 sm:$0xff]  }
  0x6e   :  { %1320 = vmatprep.subr.bf16.mxu0 %v4108_v4  ;;  %1449 = vmatprep.subr.bf16.mxu1 %v4111_v7  ;;  %v4190_v4 = vld [vmem:[#allocation3 + $0x3c0] ss:$16 sps:$4 sm:$0xff]   ;;  %v4201_v7 = vld [vmem:[#allocation3 + $0x3ec] ss:$16 sps:$4 sm:$0xff]  }
  0x70   :  { %1310 = vmatmul.mubr.bf16.vlgmr.msra.gmra.mrb[0].mxu0 %v97_v10  ;;  %1439 = vmatmul.mubr.bf16.vlgmr.msra.gmra.mrb[0].mxu1 %v97_v10  ;;  %v4204_v10 = vld [vmem:[#allocation3 + $0x404] ss:$16 sps:$4 sm:$0xff]  }
  0x71   :  { %1321 = vmatpush1.bf16.msra.mxu0 %v4106_v8  ;;  %1450 = vmatpush1.bf16.msra.mxu1 %v4109_v9  ;;  %v4196_v8 = vld [vmem:[#allocation3 + $0x3e0] ss:$16 sps:$4 sm:$0xff]   ;;  %v4199_v9 = vld [vmem:[#allocation3 + $0x3e8] ss:$16 sps:$4 sm:$0xff]  }
  0x72   :  { %1322 = vmatprep.subr.bf16.mxu0 %v4114_v11  ;;  %1451 = vmatprep.subr.bf16.mxu1 %v4117_v12  ;;  %v87_v11 = vld [vmem:[%s5088_s24 + $0x10] sm:$0xff]  ;;  %v93_v12 = vld [vmem:[%s5088_s24 + $0x40] sm:$0xff] }
  0x73   :  { %1352 = vmatprep.mubr.bf16.mxu0 %v100_v37  ;;  %1481 = vmatprep.mubr.bf16.mxu1 %v100_v37  ;;  %v4237_v37 = vld [vmem:[#allocation3 + $0x4ac] ss:$16 sps:$4 sm:$0xff]  }
  0x75   :  { %1323 = vmatpush1.bf16.msra.mxu0 %v4112_v13  ;;  %1452 = vmatpush1.bf16.msra.mxu1 %v4115_v14  ;;  %v4207_v13 = vld [vmem:[#allocation3 + $0x40c] ss:$16 sps:$4 sm:$0xff]   ;;  %v4202_v14 = vld [vmem:[#allocation3 + $0x400] ss:$16 sps:$4 sm:$0xff]  }
  0x76   :  { %1324 = vmatprep.subr.bf16.mxu0 %v4120_v15  ;;  %1453 = vmatprep.subr.bf16.mxu1 %v4123_v16  ;;  %v4205_v15 = vld [vmem:[#allocation3 + $0x408] ss:$16 sps:$4 sm:$0xff]   ;;  %v99_v16 = vpack.c.bf16 %v93_v12, %v87_v11  ;;  %v4294_v12 = vld [vmem:[#allocation3 + $0x5e4] ss:$16 sps:$4 sm:$0xff]  }
  0x77   :  { %v4289_v11 = vld [vmem:[#allocation3 + $0x5c8] ss:$16 sps:$4 sm:$0xff]  }
  0x79   :  { %1325 = vmatpush1.bf16.msra.mxu0 %v4118_v17  ;;  %1454 = vmatpush1.bf16.msra.mxu1 %v4121_v18  ;;  %v4210_v17 = vld [vmem:[#allocation3 + $0x424] ss:$16 sps:$4 sm:$0xff]   ;;  %v4213_v18 = vld [vmem:[#allocation3 + $0x42c] ss:$16 sps:$4 sm:$0xff]  }
  0x7a   :  { %1326 = vmatprep.subr.bf16.mxu0 %v4126_v19  ;;  %1455 = vmatprep.subr.bf16.mxu1 %v4129_v20  ;;  %v90_v19 = vld [vmem:[%s5088_s24 + $0x28] sm:$0xff]  ;;  %v4208_v20 = vld [vmem:[#allocation3 + $0x420] ss:$16 sps:$4 sm:$0xff]  }
  0x7d   :  { %1327 = vmatpush1.bf16.msra.mxu0 %v4124_v21  ;;  %1456 = vmatpush1.bf16.msra.mxu1 %v4127_v22  ;;  %v4211_v21 = vld [vmem:[#allocation3 + $0x428] ss:$16 sps:$4 sm:$0xff]  }
  0x7e   :  { %1328 = vmatprep.subr.bf16.mxu0 %v4132_v23  ;;  %1457 = vmatprep.subr.bf16.mxu1 %v4135_v24  ;;  %v96_v22 = vld [vmem:[%s5088_s24 + $0x58] sm:$0xff] }
  0x7f   :  { %v4216_v23 = vld [vmem:[#allocation3 + $0x444] ss:$16 sps:$4 sm:$0xff]   ;;  %v102_v24 = vpack.c.bf16 %v96_v22, %v90_v19  ;;  %v4303_v19 = vld [vmem:[#allocation6 + $0xc] ss:$20 sps:$4 sm:$0xff]  }
  0x81   :  { %1329 = vmatpush1.bf16.msra.mxu0 %v4130_v25  ;;  %1458 = vmatpush1.bf16.msra.mxu1 %v4133_v26  ;;  %v4219_v25 = vld [vmem:[#allocation3 + $0x44c] ss:$16 sps:$4 sm:$0xff]   ;;  %v4214_v26 = vld [vmem:[#allocation3 + $0x440] ss:$16 sps:$4 sm:$0xff]  }
  0x82   :  { %1330 = vmatprep.subr.bf16.mxu0 %v4138_v27  ;;  %1459 = vmatprep.subr.bf16.mxu1 %v4141_v28  ;;  %v4217_v27 = vld [vmem:[#allocation3 + $0x448] ss:$16 sps:$4 sm:$0xff]   ;;  %v4222_v28 = vld [vmem:[#allocation3 + $0x464] ss:$16 sps:$4 sm:$0xff]  }
  0x85   :  { %1331 = vmatpush1.bf16.msra.mxu0 %v4136_v29  ;;  %1460 = vmatpush1.bf16.msra.mxu1 %v4139_v30  ;;  %v4225_v29 = vld [vmem:[#allocation3 + $0x46c] ss:$16 sps:$4 sm:$0xff]   ;;  %v4220_v30 = vld [vmem:[#allocation3 + $0x460] ss:$16 sps:$4 sm:$0xff]  }
  0x86   :  { %1332 = vmatprep.subr.bf16.mxu0 %v4144_v31  ;;  %1461 = vmatprep.subr.bf16.mxu1 %v4147_v32  ;;  %v4223_v31 = vld [vmem:[#allocation3 + $0x468] ss:$16 sps:$4 sm:$0xff]   ;;  %v4228_v32 = vld [vmem:[#allocation3 + $0x484] ss:$16 sps:$4 sm:$0xff]  }
  0x89   :  { %1333 = vmatpush1.bf16.msra.mxu0 %v4142_v35  ;;  %1462 = vmatpush1.bf16.msra.mxu1 %v4145_v36  ;;  %v4229_v35 = vld [vmem:[#allocation3 + $0x488] ss:$16 sps:$4 sm:$0xff]   ;;  %v4234_v36 = vld [vmem:[#allocation3 + $0x4a4] ss:$16 sps:$4 sm:$0xff]  }
  0x8a   :  { %1334 = vmatprep.subr.bf16.mxu0 %v4150_v38  ;;  %1463 = vmatprep.subr.bf16.mxu1 %v4153_v39  ;;  %v4232_v38 = vld [vmem:[#allocation3 + $0x4a0] ss:$16 sps:$4 sm:$0xff]   ;;  %v4235_v39 = vld [vmem:[#allocation3 + $0x4a8] ss:$16 sps:$4 sm:$0xff]  }
  0x8d   :  { %1335 = vmatpush1.bf16.msra.mxu0 %v4148_v40  ;;  %1464 = vmatpush1.bf16.msra.mxu1 %v4151_v41  ;;  %v4240_v40 = vld [vmem:[#allocation3 + $0x4c4] ss:$16 sps:$4 sm:$0xff]   ;;  %v4243_v41 = vld [vmem:[#allocation3 + $0x4cc] ss:$16 sps:$4 sm:$0xff]  }
  0x8e   :  { %1336 = vmatprep.subr.bf16.mxu0 %v4156_v42  ;;  %1465 = vmatprep.subr.bf16.mxu1 %v4159_v43  ;;  %v4238_v42 = vld [vmem:[#allocation3 + $0x4c0] ss:$16 sps:$4 sm:$0xff]   ;;  %v4241_v43 = vld [vmem:[#allocation3 + $0x4c8] ss:$16 sps:$4 sm:$0xff]  }
  0x91   :  { %1337 = vmatpush1.bf16.msra.mxu0 %v4154_v44  ;;  %1466 = vmatpush1.bf16.msra.mxu1 %v4157_v45  ;;  %v4246_v44 = vld [vmem:[#allocation3 + $0x4e4] ss:$16 sps:$4 sm:$0xff]   ;;  %v4249_v45 = vld [vmem:[#allocation3 + $0x4ec] ss:$16 sps:$4 sm:$0xff]  }
  0x92   :  { %1338 = vmatprep.subr.bf16.mxu0 %v4162_v46  ;;  %1467 = vmatprep.subr.bf16.mxu1 %v4165_v47  ;;  %v4244_v46 = vld [vmem:[#allocation3 + $0x4e0] ss:$16 sps:$4 sm:$0xff]   ;;  %v4247_v47 = vld [vmem:[#allocation3 + $0x4e8] ss:$16 sps:$4 sm:$0xff]  }
  0x95   :  { %1339 = vmatpush1.bf16.msra.mxu0 %v4160_v48  ;;  %1468 = vmatpush1.bf16.msra.mxu1 %v4163_v49  ;;  %v4252_v48 = vld [vmem:[#allocation3 + $0x504] ss:$16 sps:$4 sm:$0xff]   ;;  %v4255_v49 = vld [vmem:[#allocation3 + $0x50c] ss:$16 sps:$4 sm:$0xff]  }
  0x96   :  { %1340 = vmatprep.subr.bf16.mxu0 %v4168_v50  ;;  %1469 = vmatprep.subr.bf16.mxu1 %v4171_v51  ;;  %v4250_v50 = vld [vmem:[#allocation3 + $0x500] ss:$16 sps:$4 sm:$0xff]   ;;  %v4253_v51 = vld [vmem:[#allocation3 + $0x508] ss:$16 sps:$4 sm:$0xff]  }
  0x99   :  { %1341 = vmatpush1.bf16.msra.mxu0 %v4166_v52  ;;  %1470 = vmatpush1.bf16.msra.mxu1 %v4169_v53  ;;  %v4258_v52 = vld [vmem:[#allocation3 + $0x524] ss:$16 sps:$4 sm:$0xff]   ;;  %v4261_v53 = vld [vmem:[#allocation3 + $0x52c] ss:$16 sps:$4 sm:$0xff]  }
  0x9a   :  { %1342 = vmatprep.subr.bf16.mxu0 %v4174_v54  ;;  %1471 = vmatprep.subr.bf16.mxu1 %v4177_v55  ;;  %v4256_v54 = vld [vmem:[#allocation3 + $0x520] ss:$16 sps:$4 sm:$0xff]   ;;  %v4259_v55 = vld [vmem:[#allocation3 + $0x528] ss:$16 sps:$4 sm:$0xff]  }
  0x9d   :  { %1343 = vmatpush1.bf16.msra.mxu0 %v4172_v56  ;;  %1472 = vmatpush1.bf16.msra.mxu1 %v4175_v57  ;;  %v4264_v56 = vld [vmem:[#allocation3 + $0x544] ss:$16 sps:$4 sm:$0xff]   ;;  %v4267_v57 = vld [vmem:[#allocation3 + $0x54c] ss:$16 sps:$4 sm:$0xff]  }
  0x9e   :  { %1344 = vmatprep.subr.bf16.mxu0 %v4180_v58  ;;  %1473 = vmatprep.subr.bf16.mxu1 %v4183_v59  ;;  %v4262_v58 = vld [vmem:[#allocation3 + $0x540] ss:$16 sps:$4 sm:$0xff]   ;;  %v4265_v59 = vld [vmem:[#allocation3 + $0x548] ss:$16 sps:$4 sm:$0xff]  }
  0xa1   :  { %1345 = vmatpush1.bf16.msra.mxu0 %v4178_v60  ;;  %1474 = vmatpush1.bf16.msra.mxu1 %v4181_v61  ;;  %v4270_v60 = vld [vmem:[#allocation3 + $0x564] ss:$16 sps:$4 sm:$0xff]   ;;  %v4273_v61 = vld [vmem:[#allocation3 + $0x56c] ss:$16 sps:$4 sm:$0xff]  }
  0xa2   :  { %1346 = vmatprep.subr.bf16.mxu0 %v4186_v62  ;;  %1475 = vmatprep.subr.bf16.mxu1 %v4189_v63  ;;  %v4268_v62 = vld [vmem:[#allocation3 + $0x560] ss:$16 sps:$4 sm:$0xff]   ;;  %v4271_v63 = vld [vmem:[#allocation3 + $0x568] ss:$16 sps:$4 sm:$0xff]  }
  0xa5   :  { %1347 = vmatpush1.bf16.msra.mxu0 %v4184_v0  ;;  %1476 = vmatpush1.bf16.msra.mxu1 %v4187_v1  ;;  %v4276_v0 = vld [vmem:[#allocation3 + $0x584] ss:$16 sps:$4 sm:$0xff]   ;;  %v4279_v1 = vld [vmem:[#allocation3 + $0x58c] ss:$16 sps:$4 sm:$0xff]  }
  0xa6   :  { %1348 = vmatprep.subr.bf16.mxu0 %v4192_v2  ;;  %1477 = vmatprep.subr.bf16.mxu1 %v4195_v3  ;;  %v4274_v2 = vld [vmem:[#allocation3 + $0x580] ss:$16 sps:$4 sm:$0xff]   ;;  %v4277_v3 = vld [vmem:[#allocation3 + $0x588] ss:$16 sps:$4 sm:$0xff]  }
  0xa9   :  { %1349 = vmatpush1.bf16.msra.mxu0 %v4190_v4  ;;  %1478 = vmatpush1.bf16.msra.mxu1 %v4193_v5  ;;  %v4282_v4 = vld [vmem:[#allocation3 + $0x5a4] ss:$16 sps:$4 sm:$0xff]   ;;  %v4285_v5 = vld [vmem:[#allocation3 + $0x5ac] ss:$16 sps:$4 sm:$0xff]  }
  0xaa   :  { %1350 = vmatprep.subr.bf16.mxu0 %v4198_v6  ;;  %1479 = vmatprep.subr.bf16.mxu1 %v4201_v7  ;;  %v4280_v6 = vld [vmem:[#allocation3 + $0x5a0] ss:$16 sps:$4 sm:$0xff]   ;;  %v4283_v7 = vld [vmem:[#allocation3 + $0x5a8] ss:$16 sps:$4 sm:$0xff]  }
  0xad   :  { %1351 = vmatpush1.bf16.msra.mxu0 %v4196_v8  ;;  %1480 = vmatpush1.bf16.msra.mxu1 %v4199_v9  ;;  %v4288_v8 = vld [vmem:[#allocation3 + $0x5c4] ss:$16 sps:$4 sm:$0xff]   ;;  %v4291_v9 = vld [vmem:[#allocation3 + $0x5cc] ss:$16 sps:$4 sm:$0xff]  }
  0xae   :  { %1363 = vmatprep.subr.bf16.mxu0 %v4204_v10  ;;  %1492 = vmatprep.subr.bf16.mxu1 %v4207_v13  ;;  %v4286_v10 = vld [vmem:[#allocation3 + $0x5c0] ss:$16 sps:$4 sm:$0xff]   ;;  %v4297_v13 = vld [vmem:[#allocation3 + $0x5ec] ss:$16 sps:$4 sm:$0xff]  }
  0xb0   :  { %1353 = vmatmul.mubr.bf16.vlgmr.msra.gmra.mrb[0].mxu0 %v99_v16  ;;  %1482 = vmatmul.mubr.bf16.vlgmr.msra.gmra.mrb[0].mxu1 %v99_v16  ;;  %v89_v16 = vld [vmem:[%s5088_s24 + $0x20] sm:$0xff] }
  0xb1   :  { %1364 = vmatpush1.bf16.msra.mxu0 %v4202_v14  ;;  %1493 = vmatpush1.bf16.msra.mxu1 %v4205_v15  ;;  %v4292_v14 = vld [vmem:[#allocation3 + $0x5e0] ss:$16 sps:$4 sm:$0xff]   ;;  %v4295_v15 = vld [vmem:[#allocation3 + $0x5e8] ss:$16 sps:$4 sm:$0xff]  }
  0xb2   :  { %1365 = vmatprep.subr.bf16.mxu0 %v4210_v17  ;;  %1494 = vmatprep.subr.bf16.mxu1 %v4213_v18  ;;  %v95_v17 = vld [vmem:[%s5088_s24 + $0x50] sm:$0xff]  ;;  %v4300_v18 = vld [vmem:[#allocation6 + $0x4] ss:$20 sps:$4 sm:$0xff]  }
  0xb3   :  { %1395 = vmatprep.mubr.bf16.mxu0 %v102_v24  ;;  %1524 = vmatprep.mubr.bf16.mxu1 %v102_v24  ;;  %v101_v22 = vpack.c.bf16 %v95_v17, %v89_v16  ;;  %v4309_v24 = vld [vmem:[#allocation6 + $0x34] ss:$20 sps:$4 sm:$0xff]   ;;  %v4393_v16 = vld [vmem:[#allocation6 + $0x264] ss:$20 sps:$4 sm:$0xff]  }
  0xb4   :  { %v4388_v17 = vld [vmem:[#allocation6 + $0x258] ss:$20 sps:$4 sm:$0xff]  }
  0xb5   :  { %1366 = vmatpush1.bf16.msra.mxu0 %v4208_v20  ;;  %1495 = vmatpush1.bf16.msra.mxu1 %v4211_v21  ;;  %v4298_v20 = vld [vmem:[#allocation6] ss:$20 sps:$4 sm:$0xff]   ;;  %v4301_v21 = vld [vmem:[#allocation6 + $0x8] ss:$20 sps:$4 sm:$0xff]  }
  0xb6   :  { %1367 = vmatprep.subr.bf16.mxu0 %v4216_v23  ;;  %1496 = vmatprep.subr.bf16.mxu1 %v4219_v25  ;;  %v4306_v23 = vld [vmem:[#allocation6 + $0x2c] ss:$20 sps:$4 sm:$0xff]   ;;  %v4304_v25 = vld [vmem:[#allocation6 + $0x28] ss:$20 sps:$4 sm:$0xff]  }
  0xb9   :  { %1368 = vmatpush1.bf16.msra.mxu0 %v4214_v26  ;;  %1497 = vmatpush1.bf16.msra.mxu1 %v4217_v27  ;;  %v4307_v26 = vld [vmem:[#allocation6 + $0x30] ss:$20 sps:$4 sm:$0xff]   ;;  %v4312_v27 = vld [vmem:[#allocation6 + $0x54] ss:$20 sps:$4 sm:$0xff]  }
  0xba   :  { %1369 = vmatprep.subr.bf16.mxu0 %v4222_v28  ;;  %1498 = vmatprep.subr.bf16.mxu1 %v4225_v29  ;;  %v4315_v28 = vld [vmem:[#allocation6 + $0x5c] ss:$20 sps:$4 sm:$0xff]  }
  0xbb   :  { %v4310_v29 = vld [vmem:[#allocation6 + $0x50] ss:$20 sps:$4 sm:$0xff]  }
  0xbd   :  { %1370 = vmatpush1.bf16.msra.mxu0 %v4220_v30  ;;  %1499 = vmatpush1.bf16.msra.mxu1 %v4223_v31  ;;  %v4313_v30 = vld [vmem:[#allocation6 + $0x58] ss:$20 sps:$4 sm:$0xff]   ;;  %v4318_v31 = vld [vmem:[#allocation6 + $0x7c] ss:$20 sps:$4 sm:$0xff]  }
  0xbe   :  { %1371 = vmatprep.subr.bf16.mxu0 %v4228_v32  ;;  %1500 = vmatprep.subr.bf16.mxu1 %v4231_v33  ;;  %v4321_v32 = vld [vmem:[#allocation6 + $0x84] ss:$20 sps:$4 sm:$0xff]  }
  0xbf   :  { %v4316_v33 = vld [vmem:[#allocation6 + $0x78] ss:$20 sps:$4 sm:$0xff]  }
  0xc1   :  { %1372 = vmatpush1.bf16.msra.mxu0 %v4226_v34  ;;  %1501 = vmatpush1.bf16.msra.mxu1 %v4229_v35  ;;  %v4319_v34 = vld [vmem:[#allocation6 + $0x80] ss:$20 sps:$4 sm:$0xff]   ;;  %v4324_v35 = vld [vmem:[#allocation6 + $0xa4] ss:$20 sps:$4 sm:$0xff]  }
  0xc2   :  { %1373 = vmatprep.subr.bf16.mxu0 %v4234_v36  ;;  %1502 = vmatprep.subr.bf16.mxu1 %v4237_v37  ;;  %v4327_v36 = vld [vmem:[#allocation6 + $0xac] ss:$20 sps:$4 sm:$0xff]  }
  0xc3   :  { %v4322_v37 = vld [vmem:[#allocation6 + $0xa0] ss:$20 sps:$4 sm:$0xff]  }
  0xc5   :  { %1374 = vmatpush1.bf16.msra.mxu0 %v4232_v38  ;;  %1503 = vmatpush1.bf16.msra.mxu1 %v4235_v39  ;;  %v4325_v38 = vld [vmem:[#allocation6 + $0xa8] ss:$20 sps:$4 sm:$0xff]   ;;  %v4330_v39 = vld [vmem:[#allocation6 + $0xcc] ss:$20 sps:$4 sm:$0xff]  }
  0xc6   :  { %1375 = vmatprep.subr.bf16.mxu0 %v4240_v40  ;;  %1504 = vmatprep.subr.bf16.mxu1 %v4243_v41  ;;  %v4333_v40 = vld [vmem:[#allocation6 + $0xd4] ss:$20 sps:$4 sm:$0xff]  }
  0xc7   :  { %v4328_v41 = vld [vmem:[#allocation6 + $0xc8] ss:$20 sps:$4 sm:$0xff]  }
  0xc9   :  { %1376 = vmatpush1.bf16.msra.mxu0 %v4238_v42  ;;  %1505 = vmatpush1.bf16.msra.mxu1 %v4241_v43  ;;  %v4331_v42 = vld [vmem:[#allocation6 + $0xd0] ss:$20 sps:$4 sm:$0xff]   ;;  %v4336_v43 = vld [vmem:[#allocation6 + $0xf4] ss:$20 sps:$4 sm:$0xff]  }
  0xca   :  { %1377 = vmatprep.subr.bf16.mxu0 %v4246_v44  ;;  %1506 = vmatprep.subr.bf16.mxu1 %v4249_v45  ;;  %v4339_v44 = vld [vmem:[#allocation6 + $0xfc] ss:$20 sps:$4 sm:$0xff]  }
  0xcb   :  { %v4334_v45 = vld [vmem:[#allocation6 + $0xf0] ss:$20 sps:$4 sm:$0xff]  }
  0xcd   :  { %1378 = vmatpush1.bf16.msra.mxu0 %v4244_v46  ;;  %1507 = vmatpush1.bf16.msra.mxu1 %v4247_v47  ;;  %v4337_v46 = vld [vmem:[#allocation6 + $0xf8] ss:$20 sps:$4 sm:$0xff]   ;;  %v4342_v47 = vld [vmem:[#allocation6 + $0x11c] ss:$20 sps:$4 sm:$0xff]  }
  0xce   :  { %1379 = vmatprep.subr.bf16.mxu0 %v4252_v48  ;;  %1508 = vmatprep.subr.bf16.mxu1 %v4255_v49  ;;  %v4345_v48 = vld [vmem:[#allocation6 + $0x124] ss:$20 sps:$4 sm:$0xff]  }
  0xcf   :  { %v4340_v49 = vld [vmem:[#allocation6 + $0x118] ss:$20 sps:$4 sm:$0xff]  }
  0xd1   :  { %1380 = vmatpush1.bf16.msra.mxu0 %v4250_v50  ;;  %1509 = vmatpush1.bf16.msra.mxu1 %v4253_v51  ;;  %v4343_v50 = vld [vmem:[#allocation6 + $0x120] ss:$20 sps:$4 sm:$0xff]   ;;  %v4348_v51 = vld [vmem:[#allocation6 + $0x144] ss:$20 sps:$4 sm:$0xff]  }
  0xd2   :  { %1381 = vmatprep.subr.bf16.mxu0 %v4258_v52  ;;  %1510 = vmatprep.subr.bf16.mxu1 %v4261_v53  ;;  %v4351_v52 = vld [vmem:[#allocation6 + $0x14c] ss:$20 sps:$4 sm:$0xff]  }
  0xd3   :  { %v4346_v53 = vld [vmem:[#allocation6 + $0x140] ss:$20 sps:$4 sm:$0xff]  }
  0xd5   :  { %1382 = vmatpush1.bf16.msra.mxu0 %v4256_v54  ;;  %1511 = vmatpush1.bf16.msra.mxu1 %v4259_v55  ;;  %v4349_v54 = vld [vmem:[#allocation6 + $0x148] ss:$20 sps:$4 sm:$0xff]   ;;  %v4354_v55 = vld [vmem:[#allocation6 + $0x16c] ss:$20 sps:$4 sm:$0xff]  }
  0xd6   :  { %1383 = vmatprep.subr.bf16.mxu0 %v4264_v56  ;;  %1512 = vmatprep.subr.bf16.mxu1 %v4267_v57  ;;  %v4357_v56 = vld [vmem:[#allocation6 + $0x174] ss:$20 sps:$4 sm:$0xff]  }
  0xd7   :  { %v4352_v57 = vld [vmem:[#allocation6 + $0x168] ss:$20 sps:$4 sm:$0xff]  }
  0xd9   :  { %1384 = vmatpush1.bf16.msra.mxu0 %v4262_v58  ;;  %1513 = vmatpush1.bf16.msra.mxu1 %v4265_v59  ;;  %v4355_v58 = vld [vmem:[#allocation6 + $0x170] ss:$20 sps:$4 sm:$0xff]   ;;  %v4360_v59 = vld [vmem:[#allocation6 + $0x194] ss:$20 sps:$4 sm:$0xff]  }
  0xda   :  { %1385 = vmatprep.subr.bf16.mxu0 %v4270_v60  ;;  %1514 = vmatprep.subr.bf16.mxu1 %v4273_v61  ;;  %v4363_v60 = vld [vmem:[#allocation6 + $0x19c] ss:$20 sps:$4 sm:$0xff]  }
  0xdb   :  { %v4358_v61 = vld [vmem:[#allocation6 + $0x190] ss:$20 sps:$4 sm:$0xff]  }
  0xdd   :  { %1386 = vmatpush1.bf16.msra.mxu0 %v4268_v62  ;;  %1515 = vmatpush1.bf16.msra.mxu1 %v4271_v63  ;;  %v4361_v62 = vld [vmem:[#allocation6 + $0x198] ss:$20 sps:$4 sm:$0xff]   ;;  %v4366_v63 = vld [vmem:[#allocation6 + $0x1bc] ss:$20 sps:$4 sm:$0xff]  }
  0xde   :  { %1387 = vmatprep.subr.bf16.mxu0 %v4276_v0  ;;  %1516 = vmatprep.subr.bf16.mxu1 %v4279_v1  ;;  %v4369_v0 = vld [vmem:[#allocation6 + $0x1c4] ss:$20 sps:$4 sm:$0xff]  }
  0xdf   :  { %v4364_v1 = vld [vmem:[#allocation6 + $0x1b8] ss:$20 sps:$4 sm:$0xff]  }
  0xe1   :  { %1388 = vmatpush1.bf16.msra.mxu0 %v4274_v2  ;;  %1517 = vmatpush1.bf16.msra.mxu1 %v4277_v3  ;;  %v4367_v2 = vld [vmem:[#allocation6 + $0x1c0] ss:$20 sps:$4 sm:$0xff]   ;;  %v4372_v3 = vld [vmem:[#allocation6 + $0x1e4] ss:$20 sps:$4 sm:$0xff]  }
  0xe2   :  { %1389 = vmatprep.subr.bf16.mxu0 %v4282_v4  ;;  %1518 = vmatprep.subr.bf16.mxu1 %v4285_v5  ;;  %v4375_v4 = vld [vmem:[#allocation6 + $0x1ec] ss:$20 sps:$4 sm:$0xff]  }
  0xe3   :  { %v4370_v5 = vld [vmem:[#allocation6 + $0x1e0] ss:$20 sps:$4 sm:$0xff]  }
  0xe5   :  { %1390 = vmatpush1.bf16.msra.mxu0 %v4280_v6  ;;  %1519 = vmatpush1.bf16.msra.mxu1 %v4283_v7  ;;  %v4373_v6 = vld [vmem:[#allocation6 + $0x1e8] ss:$20 sps:$4 sm:$0xff]   ;;  %v4378_v7 = vld [vmem:[#allocation6 + $0x20c] ss:$20 sps:$4 sm:$0xff]  }
  0xe6   :  { %1391 = vmatprep.subr.bf16.mxu0 %v4288_v8  ;;  %1520 = vmatprep.subr.bf16.mxu1 %v4291_v9  ;;  %v4381_v8 = vld [vmem:[#allocation6 + $0x214] ss:$20 sps:$4 sm:$0xff]  }
  0xe7   :  { %v4376_v9 = vld [vmem:[#allocation6 + $0x208] ss:$20 sps:$4 sm:$0xff]  }
  0xe9   :  { %1392 = vmatpush1.bf16.msra.mxu0 %v4286_v10  ;;  %1521 = vmatpush1.bf16.msra.mxu1 %v4289_v11  ;;  %v4379_v10 = vld [vmem:[#allocation6 + $0x210] ss:$20 sps:$4 sm:$0xff]   ;;  %v4384_v11 = vld [vmem:[#allocation6 + $0x234] ss:$20 sps:$4 sm:$0xff]  }
  0xea   :  { %1393 = vmatprep.subr.bf16.mxu0 %v4294_v12  ;;  %1522 = vmatprep.subr.bf16.mxu1 %v4297_v13  ;;  %v4387_v12 = vld [vmem:[#allocation6 + $0x23c] ss:$20 sps:$4 sm:$0xff]  }
  0xeb   :  { %v4382_v13 = vld [vmem:[#allocation6 + $0x230] ss:$20 sps:$4 sm:$0xff]  }
  0xed   :  { %1394 = vmatpush1.bf16.msra.mxu0 %v4292_v14  ;;  %1523 = vmatpush1.bf16.msra.mxu1 %v4295_v15  ;;  %v4385_v14 = vld [vmem:[#allocation6 + $0x238] ss:$20 sps:$4 sm:$0xff]   ;;  %v4390_v15 = vld [vmem:[#allocation6 + $0x25c] ss:$20 sps:$4 sm:$0xff]  }
  0xee   :  { %2614 = vmatprep.subr.bf16.mxu0 %v4300_v18  ;;  %2700 = vmatprep.subr.bf16.mxu1 %v4303_v19  ;;  %v4391_v18 = vld [vmem:[#allocation6 + $0x260] ss:$20 sps:$4 sm:$0xff]   ;;  %v4396_v19 = vld [vmem:[#allocation6 + $0x284] ss:$20 sps:$4 sm:$0xff]  }
  0xf0   :  { %1396 = vmatmul.mubr.bf16.vlgmr.msra.gmra.mrb[0].mxu0 %v101_v22  ;;  %1525 = vmatmul.mubr.bf16.vlgmr.msra.gmra.mrb[0].mxu1 %v101_v22 }
  0xf1   :  { %2615 = vmatpush1.bf16.msra.mxu0 %v4298_v20  ;;  %2701 = vmatpush1.bf16.msra.mxu1 %v4301_v21  ;;  %v4399_v20 = vld [vmem:[#allocation6 + $0x28c] ss:$20 sps:$4 sm:$0xff]   ;;  %v297_v21 = vlaneseq }
  0xf2   :  { %2616 = vmatprep.subr.bf16.mxu0 %v4306_v23  ;;  %2702 = vmatprep.subr.bf16.mxu1 %v4309_v24 }
  0xf3   :  { %v4804_v22 = vshrl.u32 %v297_v21, 7  ;;  %v4439_v21 = vld [vmem:[#allocation6 + $0x3a0] ss:$20 sps:$4 sm:$0xff]  }
  0xf5   :  { %2617 = vmatpush1.bf16.msra.mxu0 %v4304_v25  ;;  %2703 = vmatpush1.bf16.msra.mxu1 %v4307_v26  ;;  %v4807_v23 = vsub.s32 0, %v4804_v22  ;;  %v4810_v24 = vsub.s32 2, %v4804_v22  ;;  %v295_v25 = vld [vmem:[%s5067_s2] sm:$0xf]  ;;  %v4816_v26 = vsub.s32 1, %v4804_v22 }
  0xf6   :  { %2618 = vmatprep.subr.bf16.mxu0 %v4312_v27  ;;  %2704 = vmatprep.subr.bf16.mxu1 %v4315_v28  ;;  %v4819_v27 = vsub.s32 3, %v4804_v22 }
  0xf7   :  { %v300_v28 = vrot.slane %v295_v25, %v4807_v23 }
  0xf9   :  { %2619 = vmatpush1.bf16.msra.mxu0 %v4310_v29  ;;  %2705 = vmatpush1.bf16.msra.mxu1 %v4313_v30  ;;  %v308_v29 = vrot.slane %v295_v25, %v4810_v24  ;;  %v304_v30 = vrot.slane %v295_v25, %v4816_v26 }
  0xfa   :  { %2620 = vmatprep.subr.bf16.mxu0 %v4318_v31  ;;  %2706 = vmatprep.subr.bf16.mxu1 %v4321_v32  ;;  %v312_v31 = vrot.slane %v295_v25, %v4819_v27  ;;  %v4444_v25 = vld [vmem:[#allocation6 + $0x3c4] ss:$20 sps:$4 sm:$0xff]  }
  0xfd   :  { %2621 = vmatpush1.bf16.msra.mxu0 %v4316_v33  ;;  %2707 = vmatpush1.bf16.msra.mxu1 %v4319_v34 }
  0xfe   :  { %2622 = vmatprep.subr.bf16.mxu0 %v4324_v35  ;;  %2708 = vmatprep.subr.bf16.mxu1 %v4327_v36 }
 0x101   :  { %2623 = vmatpush1.bf16.msra.mxu0 %v4322_v37  ;;  %2709 = vmatpush1.bf16.msra.mxu1 %v4325_v38 }
 0x102   :  { %2624 = vmatprep.subr.bf16.mxu0 %v4330_v39  ;;  %2710 = vmatprep.subr.bf16.mxu1 %v4333_v40 }
 0x105   :  { %2625 = vmatpush1.bf16.msra.mxu0 %v4328_v41  ;;  %2711 = vmatpush1.bf16.msra.mxu1 %v4331_v42 }
 0x106   :  { %2626 = vmatprep.subr.bf16.mxu0 %v4336_v43  ;;  %2712 = vmatprep.subr.bf16.mxu1 %v4339_v44 }
 0x109   :  { %2627 = vmatpush1.bf16.msra.mxu0 %v4334_v45  ;;  %2713 = vmatpush1.bf16.msra.mxu1 %v4337_v46 }
 0x10a   :  { %2628 = vmatprep.subr.bf16.mxu0 %v4342_v47  ;;  %2714 = vmatprep.subr.bf16.mxu1 %v4345_v48 }
 0x10d   :  { %2629 = vmatpush1.bf16.msra.mxu0 %v4340_v49  ;;  %2715 = vmatpush1.bf16.msra.mxu1 %v4343_v50 }
 0x10e   :  { %2630 = vmatprep.subr.bf16.mxu0 %v4348_v51  ;;  %2716 = vmatprep.subr.bf16.mxu1 %v4351_v52 }
 0x111   :  { %2631 = vmatpush1.bf16.msra.mxu0 %v4346_v53  ;;  %2717 = vmatpush1.bf16.msra.mxu1 %v4349_v54 }
 0x112   :  { %2632 = vmatprep.subr.bf16.mxu0 %v4354_v55  ;;  %2718 = vmatprep.subr.bf16.mxu1 %v4357_v56  ;;  %v4394_v56 = vld [vmem:[#allocation6 + $0x280] ss:$20 sps:$4 sm:$0xff]  }
 0x115   :  { %2633 = vmatpush1.bf16.msra.mxu0 %v4352_v57  ;;  %2719 = vmatpush1.bf16.msra.mxu1 %v4355_v58  ;;  %v4397_v57 = vld [vmem:[#allocation6 + $0x288] ss:$20 sps:$4 sm:$0xff]   ;;  %v4402_v58 = vld [vmem:[#allocation6 + $0x2ac] ss:$20 sps:$4 sm:$0xff]  }
 0x116   :  { %2634 = vmatprep.subr.bf16.mxu0 %v4360_v59  ;;  %2720 = vmatprep.subr.bf16.mxu1 %v4363_v60  ;;  %v4405_v59 = vld [vmem:[#allocation6 + $0x2b4] ss:$20 sps:$4 sm:$0xff]  }
 0x117   :  { %v4400_v60 = vld [vmem:[#allocation6 + $0x2a8] ss:$20 sps:$4 sm:$0xff]  }
 0x119   :  { %2635 = vmatpush1.bf16.msra.mxu0 %v4358_v61  ;;  %2721 = vmatpush1.bf16.msra.mxu1 %v4361_v62  ;;  %v4403_v61 = vld [vmem:[#allocation6 + $0x2b0] ss:$20 sps:$4 sm:$0xff]   ;;  %v4408_v62 = vld [vmem:[#allocation6 + $0x2d4] ss:$20 sps:$4 sm:$0xff]  }
 0x11a   :  { %2636 = vmatprep.subr.bf16.mxu0 %v4366_v63  ;;  %2722 = vmatprep.subr.bf16.mxu1 %v4369_v0  ;;  %v4411_v63 = vld [vmem:[#allocation6 + $0x2dc] ss:$20 sps:$4 sm:$0xff]  }
 0x11b   :  { %v4406_v0 = vld [vmem:[#allocation6 + $0x2d0] ss:$20 sps:$4 sm:$0xff]  }
 0x11d   :  { %2637 = vmatpush1.bf16.msra.mxu0 %v4364_v1  ;;  %2723 = vmatpush1.bf16.msra.mxu1 %v4367_v2  ;;  %v4409_v1 = vld [vmem:[#allocation6 + $0x2d8] ss:$20 sps:$4 sm:$0xff]   ;;  %v4414_v2 = vld [vmem:[#allocation6 + $0x2fc] ss:$20 sps:$4 sm:$0xff]  }
 0x11e   :  { %2638 = vmatprep.subr.bf16.mxu0 %v4372_v3  ;;  %2724 = vmatprep.subr.bf16.mxu1 %v4375_v4  ;;  %v4417_v3 = vld [vmem:[#allocation6 + $0x304] ss:$20 sps:$4 sm:$0xff]  }
 0x11f   :  { %v4412_v4 = vld [vmem:[#allocation6 + $0x2f8] ss:$20 sps:$4 sm:$0xff]  }
 0x121   :  { %2639 = vmatpush1.bf16.msra.mxu0 %v4370_v5  ;;  %2725 = vmatpush1.bf16.msra.mxu1 %v4373_v6  ;;  %v4415_v5 = vld [vmem:[#allocation6 + $0x300] ss:$20 sps:$4 sm:$0xff]   ;;  %v4420_v6 = vld [vmem:[#allocation6 + $0x324] ss:$20 sps:$4 sm:$0xff]  }
 0x122   :  { %2640 = vmatprep.subr.bf16.mxu0 %v4378_v7  ;;  %2726 = vmatprep.subr.bf16.mxu1 %v4381_v8  ;;  %v4423_v7 = vld [vmem:[#allocation6 + $0x32c] ss:$20 sps:$4 sm:$0xff]  }
 0x123   :  { %v4418_v8 = vld [vmem:[#allocation6 + $0x320] ss:$20 sps:$4 sm:$0xff]  }
 0x125   :  { %2641 = vmatpush1.bf16.msra.mxu0 %v4376_v9  ;;  %2727 = vmatpush1.bf16.msra.mxu1 %v4379_v10  ;;  %v4421_v9 = vld [vmem:[#allocation6 + $0x328] ss:$20 sps:$4 sm:$0xff]   ;;  %v4426_v10 = vld [vmem:[#allocation6 + $0x34c] ss:$20 sps:$4 sm:$0xff]  }
 0x126   :  { %2642 = vmatprep.subr.bf16.mxu0 %v4384_v11  ;;  %2728 = vmatprep.subr.bf16.mxu1 %v4387_v12  ;;  %v4429_v11 = vld [vmem:[#allocation6 + $0x354] ss:$20 sps:$4 sm:$0xff]  }
 0x127   :  { %v4424_v12 = vld [vmem:[#allocation6 + $0x348] ss:$20 sps:$4 sm:$0xff]  }
 0x129   :  { %2643 = vmatpush1.bf16.msra.mxu0 %v4382_v13  ;;  %2729 = vmatpush1.bf16.msra.mxu1 %v4385_v14  ;;  %v4427_v13 = vld [vmem:[#allocation6 + $0x350] ss:$20 sps:$4 sm:$0xff]   ;;  %v4432_v14 = vld [vmem:[#allocation6 + $0x374] ss:$20 sps:$4 sm:$0xff]  }
 0x12a   :  { %2644 = vmatprep.subr.bf16.mxu0 %v4390_v15  ;;  %2730 = vmatprep.subr.bf16.mxu1 %v4393_v16  ;;  %v4435_v15 = vld [vmem:[#allocation6 + $0x37c] ss:$20 sps:$4 sm:$0xff]  }
 0x12b   :  { %v4430_v16 = vld [vmem:[#allocation6 + $0x370] ss:$20 sps:$4 sm:$0xff]  }
 0x12d   :  { %2645 = vmatpush1.bf16.msra.mxu0 %v4388_v17  ;;  %2731 = vmatpush1.bf16.msra.mxu1 %v4391_v18  ;;  %v4433_v17 = vld [vmem:[#allocation6 + $0x378] ss:$20 sps:$4 sm:$0xff]   ;;  %v4438_v18 = vld [vmem:[#allocation6 + $0x39c] ss:$20 sps:$4 sm:$0xff]  }
 0x12e   :  { %2657 = vmatprep.subr.bf16.mxu0 %v4396_v19  ;;  %2743 = vmatprep.subr.bf16.mxu1 %v4399_v20  ;;  %v4441_v19 = vld [vmem:[#allocation6 + $0x3a4] ss:$20 sps:$4 sm:$0xff]  }
 0x12f   :  { %v4436_v20 = vld [vmem:[#allocation6 + $0x398] ss:$20 sps:$4 sm:$0xff]  }
 0x1c3   :  { %v1397_v32 = vpop.f32.mrb[0].mxu0  ;;  %v1526_v33 = vpop.f32.mrb[0].mxu1 }
 0x1c4   :  { %v3961_v34 = vadd.f32 %v1397_v32, %v300_v28  ;;  %v3965_v35 = vadd.f32 %v1526_v33, %v308_v29  ;;  %v1399_v36 = vpop.f32.mrb[1].mxu0  ;;  %v1528_v37 = vpop.f32.mrb[1].mxu1  ;;  %v4453_v32 = vld [vmem:[#allocation6 + $0x3f4] ss:$20 sps:$4 sm:$0xff]  }
 0x1c5   :  { %v3962_v38 = vadd.f32 %v1399_v36, %v304_v30  ;;  %v3966_v39 = vadd.f32 %v1528_v37, %v312_v31  ;;  %v1401_v40 = vpop.f32.mrb[2].mxu0  ;;  %v1530_v41 = vpop.f32.mrb[2].mxu1  ;;  %v4448_v33 = vld [vmem:[#allocation6 + $0x3e8] ss:$20 sps:$4 sm:$0xff]   ;;  %v4454_v37 = vld [vmem:[#allocation6 + $0x410] ss:$20 sps:$4 sm:$0xff]  }
 0x1c6   :  { %v3963_v42 = vadd.f32 %v1401_v40, %v300_v28  ;;  %v3967_v43 = vadd.f32 %v1530_v41, %v308_v29  ;;  %v1403_v44 = vpop.f32.mrb[3].mxu0  ;;  %v1532_v45 = vpop.f32.mrb[3].mxu1  ;;  %v4447_v28 = vld [vmem:[#allocation6 + $0x3cc] ss:$20 sps:$4 sm:$0xff]   ;;  %v4459_v36 = vld [vmem:[#allocation6 + $0x41c] ss:$20 sps:$4 sm:$0xff]  }
 0x1c7   :  { %v3869_v46 = vpack.c.bf16 %v3962_v38, %v3961_v34  ;;  %v3870_v47 = vpack.c.bf16 %v3966_v39, %v3965_v35  ;;  %v3964_v48 = vadd.f32 %v1403_v44, %v304_v30  ;;  %v3968_v49 = vadd.f32 %v1532_v45, %v312_v31  ;;  %v4442_v29 = vld [vmem:[#allocation6 + $0x3c0] ss:$20 sps:$4 sm:$0xff]   ;;  %v4445_v30 = vld [vmem:[#allocation6 + $0x3c8] ss:$20 sps:$4 sm:$0xff]   ;;  %v4465_v40 = vld [vmem:[#allocation6 + $0x444] ss:$20 sps:$4 sm:$0xff]  }
 0x1c8   :  { %v4825_v50 = vpack.c.bf16 %v3963_v42, %v3961_v34  ;;  %v4827_v51 = vpack.c.bf16 %v3967_v43, %v3965_v35  ;;  %v4450_v31 = vld [vmem:[#allocation6 + $0x3ec] ss:$20 sps:$4 sm:$0xff]   ;;  %v4451_v34 = vld [vmem:[#allocation6 + $0x3f0] ss:$20 sps:$4 sm:$0xff]   ;;  %v4456_v35 = vld [vmem:[#allocation6 + $0x414] ss:$20 sps:$4 sm:$0xff]  }
 0x1c9   :  { %1559 = vst [vmem:[%s5080_s15] sm:$0xff] %v3869_v46  ;;  %1560 = vst [vmem:[%s5080_s15 + $0x8] sm:$0xff] %v3870_v47  ;;  %v4835_v52 = vpack.c.bf16 %v3964_v48, %v3962_v38  ;;  %v3871_v53 = vpack.c.bf16 %v3964_v48, %v3963_v42  ;;  %v4837_v54 = vpack.c.bf16 %v3968_v49, %v3966_v39  ;;  %v4457_v38 = vld [vmem:[#allocation6 + $0x418] ss:$20 sps:$4 sm:$0xff]   ;;  %v4462_v39 = vld [vmem:[#allocation6 + $0x43c] ss:$20 sps:$4 sm:$0xff]  }
 0x1ca   :  { %v3872_v55 = vpack.c.bf16 %v3968_v49, %v3967_v43  ;;  %v4460_v41 = vld [vmem:[#allocation6 + $0x438] ss:$20 sps:$4 sm:$0xff]   ;;  %v4463_v42 = vld [vmem:[#allocation6 + $0x440] ss:$20 sps:$4 sm:$0xff]   ;;  %v4469_v46 = vld [vmem:[#allocation6 + $0x468] ss:$20 sps:$4 sm:$0xff]  }
 0x1cb   :  { %1561 = vst [vmem:[%s5080_s15 + $0x10] sm:$0xff] %v3871_v53  ;;  %2646 = vmatprep.mubr.bf16.mxu0 %v4835_v52  ;;  %2732 = vmatprep.mubr.bf16.mxu1 %v4835_v52  ;;  %v4468_v43 = vld [vmem:[#allocation6 + $0x464] ss:$20 sps:$4 sm:$0xff]   ;;  %v4471_v44 = vld [vmem:[#allocation6 + $0x46c] ss:$20 sps:$4 sm:$0xff]  }
 0x1cc   :  { %1562 = vst [vmem:[%s5080_s15 + $0x18] sm:$0xff] %v3872_v55  ;;  %2647 = vmatmul.mubr.bf16.vlgmr.msra.gmra.mrb[4].mxu0 %v4825_v50  ;;  %2733 = vmatmul.mubr.bf16.vlgmr.msra.gmra.mrb[4].mxu1 %v4825_v50  ;;  %v4466_v45 = vld [vmem:[#allocation6 + $0x460] ss:$20 sps:$4 sm:$0xff]   ;;  %v4472_v49 = vld [vmem:[#allocation6 + $0x488] ss:$20 sps:$4 sm:$0xff]   ;;  %s3455_s15 = sshll.u32 %s4648_s22, 4  ;;  %s3456_s15 = int_to_ptr.vmem [resolvable:$true] %s3455_s15 }
 0x1cd   :  { %2658 = vmatpush1.bf16.msra.mxu0 %v4394_v56  ;;  %2744 = vmatpush1.bf16.msra.mxu1 %v4397_v57  ;;  %v4474_v47 = vld [vmem:[#allocation6 + $0x48c] ss:$20 sps:$4 sm:$0xff]   ;;  %v4477_v48 = vld [vmem:[#allocation6 + $0x494] ss:$20 sps:$4 sm:$0xff]   ;;  %v4475_v53 = vld [vmem:[#allocation6 + $0x490] ss:$20 sps:$4 sm:$0xff]   ;;  %p4619_p3 = scmp.lt.s32.totalorder %s3456_s15, %s3456_s15 }
 0x1ce   :  { %2689 = vmatprep.mubr.bf16.mxu0 %v4837_v54  ;;  %2775 = vmatprep.mubr.bf16.mxu1 %v4837_v54  ;;  %v4480_v55 = vld [vmem:[#allocation6 + $0x4b4] ss:$20 sps:$4 sm:$0xff]   ;;  %v4483_v56 = vld [vmem:[#allocation6 + $0x4bc] ss:$20 sps:$4 sm:$0xff]  }
 0x1cf   :  { %2659 = vmatprep.subr.bf16.mxu0 %v4402_v58  ;;  %2745 = vmatprep.subr.bf16.mxu1 %v4405_v59  ;;  %v4478_v57 = vld [vmem:[#allocation6 + $0x4b0] ss:$20 sps:$4 sm:$0xff]   ;;  %v4481_v58 = vld [vmem:[#allocation6 + $0x4b8] ss:$20 sps:$4 sm:$0xff]  }
 0x1d0   :  { %v4486_v59 = vld [vmem:[#allocation6 + $0x4dc] ss:$20 sps:$4 sm:$0xff]  }
 0x1d1   :  { %2660 = vmatpush1.bf16.msra.mxu0 %v4400_v60  ;;  %2746 = vmatpush1.bf16.msra.mxu1 %v4403_v61  ;;  %v4489_v60 = vld [vmem:[#allocation6 + $0x4e4] ss:$20 sps:$4 sm:$0xff]  }
 0x1d2   :  { %2661 = vmatprep.subr.bf16.mxu0 %v4408_v62  ;;  %2747 = vmatprep.subr.bf16.mxu1 %v4411_v63  ;;  %v4484_v61 = vld [vmem:[#allocation6 + $0x4d8] ss:$20 sps:$4 sm:$0xff]   ;;  %v4487_v62 = vld [vmem:[#allocation6 + $0x4e0] ss:$20 sps:$4 sm:$0xff]   ;;  %v4490_v63 = vld [vmem:[#allocation6 + $0x150] ss:$20 sps:$4 sm:$0xff]  }
 0x1d5   :  { %2662 = vmatpush1.bf16.msra.mxu0 %v4406_v0  ;;  %2748 = vmatpush1.bf16.msra.mxu1 %v4409_v1  ;;  %v4491_v0 = vld [vmem:[#allocation6 + $0x3d0] ss:$20 sps:$4 sm:$0xff]  }
 0x1d6   :  { %2663 = vmatprep.subr.bf16.mxu0 %v4414_v2  ;;  %2749 = vmatprep.subr.bf16.mxu1 %v4417_v3  ;;  %v4492_v1 = vld [vmem:[#allocation6 + $0x10] ss:$20 sps:$4 sm:$0xff]   ;;  %v4494_v3 = vld [vmem:[#allocation6 + $0x178] ss:$20 sps:$4 sm:$0xff]  }
 0x1d7   :  { %v4493_v2 = vld [vmem:[#allocation6 + $0x290] ss:$20 sps:$4 sm:$0xff]  }
 0x1d9   :  { %2664 = vmatpush1.bf16.msra.mxu0 %v4412_v4  ;;  %2750 = vmatpush1.bf16.msra.mxu1 %v4415_v5  ;;  %v4495_v4 = vld [vmem:[#allocation6 + $0x3f8] ss:$20 sps:$4 sm:$0xff]  }
 0x1da   :  { %2665 = vmatprep.subr.bf16.mxu0 %v4420_v6  ;;  %2751 = vmatprep.subr.bf16.mxu1 %v4423_v7  ;;  %v4496_v5 = vld [vmem:[#allocation6 + $0x38] ss:$20 sps:$4 sm:$0xff]   ;;  %v4498_v7 = vld [vmem:[#allocation6 + $0x1a0] ss:$20 sps:$4 sm:$0xff]  }
 0x1db   :  { %v4497_v6 = vld [vmem:[#allocation6 + $0x2b8] ss:$20 sps:$4 sm:$0xff]  }
 0x1dd   :  { %2666 = vmatpush1.bf16.msra.mxu0 %v4418_v8  ;;  %2752 = vmatpush1.bf16.msra.mxu1 %v4421_v9  ;;  %v4499_v8 = vld [vmem:[#allocation6 + $0x420] ss:$20 sps:$4 sm:$0xff]  }
 0x1de   :  { %2667 = vmatprep.subr.bf16.mxu0 %v4426_v10  ;;  %2753 = vmatprep.subr.bf16.mxu1 %v4429_v11  ;;  %v4500_v9 = vld [vmem:[#allocation6 + $0x60] ss:$20 sps:$4 sm:$0xff]   ;;  %v4502_v11 = vld [vmem:[#allocation6 + $0x1c8] ss:$20 sps:$4 sm:$0xff]  }
 0x1df   :  { %v4501_v10 = vld [vmem:[#allocation6 + $0x2e0] ss:$20 sps:$4 sm:$0xff]  }
 0x1e1   :  { %2668 = vmatpush1.bf16.msra.mxu0 %v4424_v12  ;;  %2754 = vmatpush1.bf16.msra.mxu1 %v4427_v13  ;;  %v4503_v12 = vld [vmem:[#allocation6 + $0x448] ss:$20 sps:$4 sm:$0xff]  }
 0x1e2   :  { %2669 = vmatprep.subr.bf16.mxu0 %v4432_v14  ;;  %2755 = vmatprep.subr.bf16.mxu1 %v4435_v15  ;;  %v4504_v13 = vld [vmem:[#allocation6 + $0x88] ss:$20 sps:$4 sm:$0xff]   ;;  %v4506_v14 = vld [vmem:[#allocation6 + $0x1f0] ss:$20 sps:$4 sm:$0xff]  }
 0x1e3   :  { %v4508_v15 = vld [vmem:[#allocation6 + $0xb0] ss:$20 sps:$4 sm:$0xff]  }
 0x1e5   :  { %2670 = vmatpush1.bf16.msra.mxu0 %v4430_v16  ;;  %2756 = vmatpush1.bf16.msra.mxu1 %v4433_v17  ;;  %v4509_v16 = vld [vmem:[#allocation6 + $0x330] ss:$20 sps:$4 sm:$0xff]   ;;  %v4510_v17 = vld [vmem:[#allocation6 + $0x218] ss:$20 sps:$4 sm:$0xff]  }
 0x1e6   :  { %2671 = vmatprep.subr.bf16.mxu0 %v4438_v18  ;;  %2757 = vmatprep.subr.bf16.mxu1 %v4441_v19  ;;  %v4511_v18 = vld [vmem:[#allocation6 + $0x498] ss:$20 sps:$4 sm:$0xff]  }
 0x1e7   :  { %v4512_v19 = vld [vmem:[#allocation6 + $0xd8] ss:$20 sps:$4 sm:$0xff]  }
 0x1e9   :  { %2672 = vmatpush1.bf16.msra.mxu0 %v4436_v20  ;;  %2758 = vmatpush1.bf16.msra.mxu1 %v4439_v21  ;;  %v4513_v20 = vld [vmem:[#allocation6 + $0x358] ss:$20 sps:$4 sm:$0xff]   ;;  %v4514_v21 = vld [vmem:[#allocation6 + $0x240] ss:$20 sps:$4 sm:$0xff]  }
 0x1ea   :  { %2673 = vmatprep.subr.bf16.mxu0 %v4444_v25  ;;  %2759 = vmatprep.subr.bf16.mxu1 %v4447_v28  ;;  %v4515_v25 = vld [vmem:[#allocation6 + $0x4c0] ss:$20 sps:$4 sm:$0xff]  }
 0x1eb   :  { %v4516_v28 = vld [vmem:[#allocation6 + $0x100] ss:$20 sps:$4 sm:$0xff]  }
 0x1ed   :  { %2674 = vmatpush1.bf16.msra.mxu0 %v4442_v29  ;;  %2760 = vmatpush1.bf16.msra.mxu1 %v4445_v30  ;;  %v4517_v29 = vld [vmem:[#allocation6 + $0x380] ss:$20 sps:$4 sm:$0xff]   ;;  %v4518_v30 = vld [vmem:[#allocation6 + $0x268] ss:$20 sps:$4 sm:$0xff]  }
 0x1ee   :  { %2675 = vmatprep.subr.bf16.mxu0 %v4450_v31  ;;  %2761 = vmatprep.subr.bf16.mxu1 %v4453_v32  ;;  %v4519_v31 = vld [vmem:[#allocation6 + $0x4e8] ss:$20 sps:$4 sm:$0xff]  }
 0x1ef   :  { %v4520_v32 = vld [vmem:[#allocation6 + $0x128] ss:$20 sps:$4 sm:$0xff]  }
 0x1f1   :  { %2676 = vmatpush1.bf16.msra.mxu0 %v4448_v33  ;;  %2762 = vmatpush1.bf16.msra.mxu1 %v4451_v34  ;;  %v4521_v33 = vld [vmem:[#allocation6 + $0x3a8] ss:$20 sps:$4 sm:$0xff]  }
 0x1f2   :  { %2677 = vmatprep.subr.bf16.mxu0 %v4456_v35  ;;  %2763 = vmatprep.subr.bf16.mxu1 %v4459_v36  ;;  %v1755_v34 = vld [vmem:[%s5069_s4] sm:$0x1f] }
 0x1f3   :  { %v1760_v35 = vrot.slane %v1755_v34, %v4807_v23  ;;  %v1764_v36 = vrot.slane %v1755_v34, %v4816_v26 }
 0x1f5   :  { %2678 = vmatpush1.bf16.msra.mxu0 %v4454_v37  ;;  %2764 = vmatpush1.bf16.msra.mxu1 %v4457_v38  ;;  %v1768_v38 = vrot.slane %v1755_v34, %v4810_v24 }
 0x1f6   :  { %2679 = vmatprep.subr.bf16.mxu0 %v4462_v39  ;;  %2765 = vmatprep.subr.bf16.mxu1 %v4465_v40 }
 0x1f9   :  { %2680 = vmatpush1.bf16.msra.mxu0 %v4460_v41  ;;  %2766 = vmatpush1.bf16.msra.mxu1 %v4463_v42 }
 0x1fa   :  { %2681 = vmatprep.subr.bf16.mxu0 %v4468_v43  ;;  %2767 = vmatprep.subr.bf16.mxu1 %v4471_v44 }
 0x1fd   :  { %2682 = vmatpush1.bf16.msra.mxu0 %v4466_v45  ;;  %2768 = vmatpush1.bf16.msra.mxu1 %v4469_v46 }
 0x1fe   :  { %2683 = vmatprep.subr.bf16.mxu0 %v4474_v47  ;;  %2769 = vmatprep.subr.bf16.mxu1 %v4477_v48 }
 0x201   :  { %2684 = vmatpush1.bf16.msra.mxu0 %v4472_v49  ;;  %2770 = vmatpush1.bf16.msra.mxu1 %v4475_v53 }
 0x202   :  { %2685 = vmatprep.subr.bf16.mxu0 %v4480_v55  ;;  %2771 = vmatprep.subr.bf16.mxu1 %v4483_v56 }
 0x205   :  { %2686 = vmatpush1.bf16.msra.mxu0 %v4478_v57  ;;  %2772 = vmatpush1.bf16.msra.mxu1 %v4481_v58 }
 0x206   :  { %2687 = vmatprep.subr.bf16.mxu0 %v4486_v59  ;;  %2773 = vmatprep.subr.bf16.mxu1 %v4489_v60 }
 0x209   :  { %2688 = vmatpush1.bf16.msra.mxu0 %v4484_v61  ;;  %2774 = vmatpush1.bf16.msra.mxu1 %v4487_v62 }
 0x20a   :  { %3873 = vmatprep.subr.bf16.mxu0 %v4490_v63  ;;  %3895 = vmatprep.subr.bf16.mxu1 %v4491_v0  ;;  %v1775_v63 = vsub.s32 4, %v4804_v22  ;;  %v4522_v22 = vld [vmem:[%s5074_s9 + $0x40] sm:$0xff]  }
 0x20c   :  { %2690 = vmatmul.mubr.bf16.vlgmr.msra.gmra.mrb[4].mxu0 %v4827_v51  ;;  %2776 = vmatmul.mubr.bf16.vlgmr.msra.gmra.mrb[4].mxu1 %v4827_v51 }
 0x20d   :  { %3874 = vmatpush3.bf16.msra.mxu0 %v4492_v1  ;;  %2818 = vmatprep.mubr.bf16.mxu0 %v4835_v52  ;;  %v4505_v52 = vld [vmem:[#allocation6 + $0x308] ss:$20 sps:$4 sm:$0xff]   ;;  %v1776_v1 = vrot.slane %v1755_v34, %v1775_v63 }
 0x20e   :  { %3896 = vmatpush3.bf16.msra.mxu1 %v4493_v2  ;;  %2859 = vmatprep.mubr.bf16.mxu1 %v4837_v54  ;;  %v4507_v54 = vld [vmem:[#allocation6 + $0x470] ss:$20 sps:$4 sm:$0xff]   ;;  %v4534_v63 = vld [vmem:[%s5074_s9 + $0x58] sm:$0xff]  }
 0x20f   :  { %3875 = vmatprep.subr.bf16.mxu0 %v4494_v3  ;;  %3897 = vmatprep.subr.bf16.mxu1 %v4495_v4 }
 0x211   :  { %3876 = vmatpush3.bf16.msra.mxu0 %v4496_v5 }
 0x212   :  { %3898 = vmatpush3.bf16.msra.mxu1 %v4497_v6  ;;  %3877 = vmatprep.subr.bf16.mxu0 %v4498_v7 }
 0x213   :  { %3899 = vmatprep.subr.bf16.mxu1 %v4499_v8 }
 0x215   :  { %3878 = vmatpush3.bf16.msra.mxu0 %v4500_v9 }
 0x216   :  { %3900 = vmatpush3.bf16.msra.mxu1 %v4501_v10  ;;  %3879 = vmatprep.subr.bf16.mxu0 %v4502_v11 }
 0x217   :  { %3901 = vmatprep.subr.bf16.mxu1 %v4503_v12 }
 0x219   :  { %3880 = vmatpush3.bf16.msra.mxu0 %v4504_v13 }
 0x21a   :  { %3902 = vmatpush3.bf16.msra.mxu1 %v4505_v52  ;;  %3881 = vmatprep.subr.bf16.mxu0 %v4506_v14 }
 0x21b   :  { %3903 = vmatprep.subr.bf16.mxu1 %v4507_v54 }
 0x21d   :  { %3882 = vmatpush3.bf16.msra.mxu0 %v4508_v15  ;;  %v4523_v15 = vld [vmem:[%s5074_s9 + $0xc0] sm:$0xff]  }
 0x21e   :  { %3904 = vmatpush3.bf16.msra.mxu1 %v4509_v16  ;;  %3883 = vmatprep.subr.bf16.mxu0 %v4510_v17  ;;  %v4524_v16 = vld [vmem:[%s5074_s9] sm:$0xff]  }
 0x21f   :  { %3905 = vmatprep.subr.bf16.mxu1 %v4511_v18  ;;  %v4525_v17 = vld [vmem:[%s5074_s9 + $0x80] sm:$0xff]  }
 0x221   :  { %3884 = vmatpush3.bf16.msra.mxu0 %v4512_v19 }
 0x222   :  { %3906 = vmatpush3.bf16.msra.mxu1 %v4513_v20  ;;  %3885 = vmatprep.subr.bf16.mxu0 %v4514_v21 }
 0x223   :  { %3907 = vmatprep.subr.bf16.mxu1 %v4515_v25 }
 0x225   :  { %3886 = vmatpush3.bf16.msra.mxu0 %v4516_v28 }
 0x226   :  { %3908 = vmatpush3.bf16.msra.mxu1 %v4517_v29  ;;  %3887 = vmatprep.subr.bf16.mxu0 %v4518_v30 }
 0x227   :  { %3909 = vmatprep.subr.bf16.mxu1 %v4519_v31 }
 0x229   :  { %3888 = vmatpush3.bf16.msra.mxu0 %v4520_v32 }
 0x22a   :  { %3910 = vmatpush3.bf16.msra.mxu1 %v4521_v33  ;;  %3917 = vmatprep.subr.bf16.mxu0 %v4522_v22  ;;  %v4551_v22 = vld [vmem:[%s5074_s9 + $0xf8] sm:$0xff]  }
 0x22b   :  { %3939 = vmatprep.subr.bf16.mxu1 %v4523_v15  ;;  %v4552_v15 = vld [vmem:[%s5074_s9 + $0x38] sm:$0xff]  }
 0x22c   :  { %2819 = vmatmul.mubr.bf16.vlgmr.msra.gmra.mrb[8].mxu0 %v4825_v50  ;;  %v1772_v50 = vrot.slane %v1755_v34, %v4819_v27 }
 0x22d   :  { %2860 = vmatmul.mubr.bf16.vlgmr.msra.gmra.mrb[8].mxu1 %v4827_v51  ;;  %3918 = vmatpush3.bf16.msra.mxu0 %v4524_v16  ;;  %v4553_v16 = vld [vmem:[%s5074_s9 + $0xb8] sm:$0xff]  }
 0x22e   :  { %3940 = vmatpush3.bf16.msra.mxu1 %v4525_v17 }
 0x2df   :  { %v2691_v37 = vpop.f32.mrb[4].mxu0  ;;  %v2777_v39 = vpop.f32.mrb[4].mxu1 }
 0x2e0   :  { %v3969_v40 = vadd.f32 %v2691_v37, %v1760_v35  ;;  %v2693_v41 = vpop.f32.mrb[5].mxu0  ;;  %v2779_v42 = vpop.f32.mrb[5].mxu1  ;;  %v3973_v48 = vadd.f32 %v2777_v39, %v1768_v38 }
 0x2e1   :  { %v3970_v43 = vadd.f32 %v2693_v41, %v1764_v36  ;;  %v2695_v44 = vpop.f32.mrb[6].mxu0  ;;  %v2781_v51 = vpop.f32.mrb[6].mxu1  ;;  %v3974_v55 = vadd.f32 %v2779_v42, %v1772_v50 }
 0x2e2   :  { %v3971_v45 = vadd.f32 %v2695_v44, %v1760_v35  ;;  %v2697_v46 = vpop.f32.mrb[7].mxu0  ;;  %v2783_v47 = vpop.f32.mrb[7].mxu1  ;;  %v3975_v56 = vadd.f32 %v2781_v51, %v1768_v38 }
 0x2e3   :  { %v2870_v49 = vadd.f32 %v3970_v43, %v3969_v40  ;;  %v3972_v53 = vadd.f32 %v2697_v46, %v1764_v36  ;;  %v3976_v61 = vadd.f32 %v2783_v47, %v1772_v50  ;;  %v4526_v47 = vld [vmem:[%s5074_s9 + $0x48] sm:$0xff]  }
 0x2e4   :  { %3919 = vmatprep.subr.bf16.mxu0 %v4526_v47 }
 0x2e5   :  { %v2875_v57 = vadd.f32 %v3972_v53, %v3971_v45  ;;  %v2871_v58 = vadd.f32 %v3973_v48, %v2870_v49  ;;  %v4528_v49 = vld [vmem:[%s5074_s9 + $0x8] sm:$0xff]  }
 0x2e6   :  { %3920 = vmatpush3.bf16.msra.mxu0 %v4528_v49 }
 0x2e7   :  { %v2872_v59 = vadd.f32 %v3974_v55, %v2871_v58  ;;  %v2876_v60 = vadd.f32 %v3975_v56, %v2875_v57  ;;  %v4530_v57 = vld [vmem:[%s5074_s9 + $0x50] sm:$0xff]  }
 0x2e8   :  { %v4531_v58 = vld [vmem:[%s5074_s9 + $0xd0] sm:$0xff]   ;;  %3921 = vmatprep.subr.bf16.mxu0 %v4530_v57 }
 0x2e9   :  { %2873 = vadd.xlane.f32.xlu0 %v2872_v59  ;;  %v2877_v62 = vadd.f32 %v3976_v61, %v2876_v60  ;;  %v4532_v60 = vld [vmem:[%s5074_s9 + $0x10] sm:$0xff]  }
 0x2ea   :  { %3922 = vmatpush3.bf16.msra.mxu0 %v4532_v60 }
 0x2eb   :  { %3923 = vmatprep.subr.bf16.mxu0 %v4534_v63 }
 0x2ed   :  { %2878 = vadd.xlane.f32.xlu0 %v2877_v62 }
 0x2ff   :  { %v3889_v0 = vpop.f32.mrb[8].mxu0 }
 0x300   :  { %v3911_v2 = vpop.f32.mrb[8].mxu1  ;;  %v3890_v3 = vpop.f32.mrb[9].mxu0 }
 0x301   :  { %v3891_v4 = vadd.f32 %v3890_v3, %v3889_v0  ;;  %v3912_v5 = vpop.f32.mrb[9].mxu1  ;;  %v3892_v6 = vpop.f32.mrb[10].mxu0  ;;  %v4535_v0 = vld [vmem:[%s5074_s9 + $0xd8] sm:$0xff]   ;;  %v4538_v3 = vld [vmem:[%s5074_s9 + $0x60] sm:$0xff]  }
 0x302   :  { %v3913_v7 = vadd.f32 %v3912_v5, %v3911_v2  ;;  %v3914_v8 = vpop.f32.mrb[10].mxu1  ;;  %v3893_v9 = vpop.f32.mrb[11].mxu0  ;;  %v4537_v2 = vld [vmem:[%s5074_s9 + $0x98] sm:$0xff]   ;;  %v4540_v5 = vld [vmem:[%s5074_s9 + $0x20] sm:$0xff]  }
 0x303   :  { %v2821_v10 = vadd.f32 %v3891_v4, %v1776_v1  ;;  %v3894_v11 = vadd.f32 %v3893_v9, %v3892_v6  ;;  %v3915_v12 = vpop.f32.mrb[11].mxu1  ;;  %v4539_v4 = vld [vmem:[%s5074_s9 + $0xe0] sm:$0xff]   ;;  %v4544_v9 = vld [vmem:[%s5074_s9 + $0x28] sm:$0xff]  }
 0x304   :  { %v3916_v13 = vadd.f32 %v3915_v12, %v3914_v8  ;;  %v4541_v6 = vld [vmem:[%s5074_s9 + $0xa0] sm:$0xff]   ;;  %v4543_v8 = vld [vmem:[%s5074_s9 + $0xe8] sm:$0xff]   ;;  %v4547_v12 = vld [vmem:[%s5074_s9 + $0xf0] sm:$0xff]  }
 0x305   :  { %v2824_v52 = vadd.f32 %v3894_v11, %v1776_v1  ;;  %v2862_v14 = vadd.f32 %v3913_v7, %v2821_v10  ;;  %v4536_v1 = vld [vmem:[%s5074_s9 + $0x18] sm:$0xff]   ;;  %v4542_v7 = vld [vmem:[%s5074_s9 + $0x68] sm:$0xff]   ;;  %v4546_v11 = vld [vmem:[%s5074_s9 + $0x70] sm:$0xff]  }
 0x306   :  { %3924 = vmatpush3.bf16.msra.mxu0 %v4536_v1  ;;  %v4545_v10 = vld [vmem:[%s5074_s9 + $0xa8] sm:$0xff]  }
 0x307   :  { %2991 = vadd.xlane.f32.xlu0 %v2862_v14  ;;  %v4865_v54 = vadd.f32 %v3916_v13, %v2824_v52  ;;  %3925 = vmatprep.subr.bf16.mxu0 %v4538_v3  ;;  %v4548_v13 = vld [vmem:[%s5074_s9 + $0x30] sm:$0xff]  }
 0x308   :  { %v4549_v52 = vld [vmem:[%s5074_s9 + $0xb0] sm:$0xff]  }
 0x30a   :  { %3926 = vmatpush3.bf16.msra.mxu0 %v4540_v5 }
 0x30b   :  { %3927 = vmatprep.subr.bf16.mxu0 %v4542_v7 }
 0x30e   :  { %3928 = vmatpush3.bf16.msra.mxu0 %v4544_v9 }
 0x30f   :  { %3929 = vmatprep.subr.bf16.mxu0 %v4546_v11 }
 0x312   :  { %3930 = vmatpush3.bf16.msra.mxu0 %v4548_v13 }
 0x376   :  { %v2874_v18 = vpop.xlane.xlu0 %2873 }
 0x377   :  { %v2881_v19 = vmul.f32 0.001953125, %v2874_v18 }
 0x379   :  { %v4879_v20 = vsub.f32 %v3969_v40, %v2881_v19  ;;  %v4881_v21 = vsub.f32 %v3970_v43, %v2881_v19  ;;  %v4883_v25 = vsub.f32 %v3973_v48, %v2881_v19  ;;  %v4885_v29 = vsub.f32 %v3974_v55, %v2881_v19  ;;  %v4527_v48 = vld [vmem:[%s5074_s9 + $0xc8] sm:$0xff]  }
 0x37a   :  { %v2879_v28 = vpop.xlane.xlu0 %2878  ;;  %3941 = vmatprep.subr.bf16.mxu1 %v4527_v48 }
 0x37b   :  { %v2882_v30 = vmul.f32 0.001953125, %v2879_v28  ;;  %v2891_v31 = vmul.f32 %v4879_v20, %v4879_v20  ;;  %v2892_v32 = vmul.f32 %v4881_v21, %v4881_v21  ;;  %v2893_v33 = vmul.f32 %v4883_v25, %v4883_v25 }
 0x37c   :  { %v2894_v38 = vmul.f32 %v4885_v29, %v4885_v29 }
 0x37d   :  { %v4893_v34 = vsub.f32 %v3971_v45, %v2882_v30  ;;  %v4895_v35 = vsub.f32 %v3972_v53, %v2882_v30  ;;  %v2899_v36 = vadd.f32 %v2892_v32, %v2891_v31  ;;  %v4897_v37 = vsub.f32 %v3975_v56, %v2882_v30  ;;  %v4529_v53 = vld [vmem:[%s5074_s9 + $0x88] sm:$0xff]  }
 0x37e   :  { %v4901_v40 = vsub.f32 %v3976_v61, %v2882_v30  ;;  %3942 = vmatpush3.bf16.msra.mxu1 %v4529_v53  ;;  %v4533_v61 = vld [vmem:[%s5074_s9 + $0x90] sm:$0xff]  }
 0x37f   :  { %v2900_v39 = vadd.f32 %v2899_v36, %v2893_v33  ;;  %v2895_v41 = vmul.f32 %v4893_v34, %v4893_v34  ;;  %v2896_v42 = vmul.f32 %v4895_v35, %v4895_v35  ;;  %v2897_v50 = vmul.f32 %v4897_v37, %v4897_v37  ;;  %3943 = vmatprep.subr.bf16.mxu1 %v4531_v58 }
 0x380   :  { %v2898_v51 = vmul.f32 %v4901_v40, %v4901_v40 }
 0x381   :  { %v2901_v43 = vadd.f32 %v2900_v39, %v2894_v38  ;;  %v2904_v44 = vadd.f32 %v2896_v42, %v2895_v41  ;;  %v2868_v38 = vld [vmem:[%s5070_s5] sm:$0xf] }
 0x382   :  { %3944 = vmatpush3.bf16.msra.mxu1 %v4533_v61  ;;  %v2931_v41 = vrot.slane %v2868_v38, %v4816_v26  ;;  %v2939_v42 = vrot.slane %v2868_v38, %v4819_v27 }
 0x383   :  { %2902 = vadd.xlane.f32.xlu1 %v2901_v43  ;;  %v2905_v45 = vadd.f32 %v2904_v44, %v2897_v50  ;;  %3945 = vmatprep.subr.bf16.mxu1 %v4535_v0  ;;  %v2869_v50 = vld [vmem:[%s5071_s6] sm:$0xf]  ;;  %v2935_v44 = vrot.slane %v2868_v38, %v4810_v24 }
 0x384   :  { %v2960_v49 = vrot.slane %v2869_v50, %v4816_v26  ;;  %v2956_v58 = vrot.slane %v2869_v50, %v4807_v23  ;;  %v2964_v61 = vrot.slane %v2869_v50, %v4810_v24 }
 0x385   :  { %v2906_v46 = vadd.f32 %v2905_v45, %v2898_v51 }
 0x386   :  { %3946 = vmatpush3.bf16.msra.mxu1 %v4537_v2 }
 0x387   :  { %2907 = vadd.xlane.f32.xlu1 %v2906_v46  ;;  %3947 = vmatprep.subr.bf16.mxu1 %v4539_v4 }
 0x38a   :  { %3948 = vmatpush3.bf16.msra.mxu1 %v4541_v6 }
 0x38b   :  { %2993 = vadd.xlane.f32.xlu1 %v4865_v54  ;;  %3949 = vmatprep.subr.bf16.mxu1 %v4543_v8 }
 0x38e   :  { %3950 = vmatpush3.bf16.msra.mxu1 %v4545_v10 }
 0x38f   :  { %3951 = vmatprep.subr.bf16.mxu1 %v4547_v12 }
 0x392   :  { %3952 = vmatpush3.bf16.msra.mxu1 %v4549_v52 }
 0x393   :  { %3953 = vmatprep.subr.bf16.mxu1 %v4551_v22  ;;  %v3832_v22 = vld [vmem:[%s5075_s10] ss:$0 sm:$0xff] }
 0x394   :  { %v2992_v55 = vpop.xlane.xlu0 %2991 }
 0x395   :  { %v2996_v56 = vmul.f32 0.0078125, %v2992_v55  ;;  %v2968_v55 = vrot.slane %v2869_v50, %v4819_v27 }
 0x396   :  { %3954 = vmatpush3.bf16.msra.mxu1 %v4553_v16 }
 0x397   :  { %v4930_v59 = vsub.f32 %v2862_v14, %v2996_v56  ;;  %v4550_v14 = vld [vmem:[%s5074_s9 + $0x78] sm:$0xff]  }
 0x398   :  { %3931 = vmatprep.subr.bf16.mxu0 %v4550_v14 }
 0x399   :  { %v3000_v62 = vmul.f32 %v4930_v59, %v4930_v59  ;;  %3932 = vmatpush3.bf16.msra.mxu0 %v4552_v15 }
 0x39b   :  { %3002 = vadd.xlane.f32.xlu0 %v3000_v62 }
 0x410   :  { %v2903_v17 = vpop.xlane.xlu1 %2902 }
 0x411   :  { %v2909_v18 = vmul.f32 0.001953125, %v2903_v17 }
 0x413   :  { %v2911_v19 = vadd.f32 1e-05, %v2909_v18 }
 0x414   :  { %v2908_v28 = vpop.xlane.xlu1 %2907 }
 0x415   :  { %4554 = vrsqrt.f32 %v2911_v19  ;;  %v2910_v30 = vmul.f32 0.001953125, %v2908_v28 }
 0x417   :  { %v2912_v31 = vadd.f32 1e-05, %v2910_v30 }
 0x418   :  { %v2994_v32 = vpop.xlane.xlu1 %2993 }
 0x419   :  { %4556 = vrsqrt.f32 %v2912_v31  ;;  %v2997_v33 = vmul.f32 0.0078125, %v2994_v32 }
 0x41b   :  { %v5001_v36 = vsub.f32 %v4865_v54, %v2997_v33  ;;  %v2927_v54 = vrot.slane %v2868_v38, %v4807_v23 }
 0x41d   :  { %v3001_v39 = vmul.f32 %v5001_v36, %v5001_v36 }
 0x41f   :  { %v4555_v43 = vpop.eup %4554  ;;  %3004 = vadd.xlane.f32.xlu1 %v3001_v39 }
 0x420   :  { %v2916_v51 = vmul.f32 %v4555_v43, %v4881_v21  ;;  %v2918_v45 = vmul.f32 %v4555_v43, %v4885_v29  ;;  %v2915_v46 = vmul.f32 %v4555_v43, %v4879_v20  ;;  %v2917_v47 = vmul.f32 %v4555_v43, %v4883_v25 }
 0x422   :  { %v2945_v48 = vmul.f32 %v2931_v41, %v2916_v51  ;;  %v2947_v53 = vmul.f32 %v2939_v42, %v2918_v45  ;;  %v2944_v57 = vmul.f32 %v2927_v54, %v2915_v46  ;;  %v2946_v60 = vmul.f32 %v2935_v44, %v2917_v47 }
 0x423   :  { %v4557_v56 = vpop.eup %4556 }
 0x424   :  { %v2920_v21 = vmul.f32 %v4557_v56, %v4895_v35  ;;  %v2922_v29 = vmul.f32 %v4557_v56, %v4901_v40  ;;  %v2919_v20 = vmul.f32 %v4557_v56, %v4893_v34  ;;  %v2921_v25 = vmul.f32 %v4557_v56, %v4897_v37  ;;  %v3831_v56 = vld [vmem:[%s5073_s8] ss:$0 sm:$0xff] }
 0x425   :  { %v2974_v26 = vadd.f32 %v2960_v49, %v2945_v48  ;;  %v2976_v0 = vadd.f32 %v2968_v55, %v2947_v53  ;;  %v2973_v1 = vadd.f32 %v2956_v58, %v2944_v57  ;;  %v2975_v3 = vadd.f32 %v2964_v61, %v2946_v60 }
 0x426   :  { %v2949_v62 = vmul.f32 %v2931_v41, %v2920_v21  ;;  %v2951_v63 = vmul.f32 %v2939_v42, %v2922_v29  ;;  %v2948_v27 = vmul.f32 %v2927_v54, %v2919_v20  ;;  %v2950_v2 = vmul.f32 %v2935_v44, %v2921_v25 }
 0x427   :  { %v2982_v6 = vmax.f32 %v2974_v26, 0.0  ;;  %v2984_v7 = vmax.f32 %v2976_v0, 0.0  ;;  %v2981_v8 = vmax.f32 %v2973_v1, 0.0  ;;  %v2983_v9 = vmax.f32 %v2975_v3, 0.0 }
 0x428   :  { %v2978_v23 = vadd.f32 %v2960_v49, %v2949_v62  ;;  %v2980_v4 = vadd.f32 %v2968_v55, %v2951_v63  ;;  %v2977_v5 = vadd.f32 %v2956_v58, %v2948_v27  ;;  %v2979_v24 = vadd.f32 %v2964_v61, %v2950_v2  ;;  %v3003_v43 = vpop.xlane.xlu0 %3002  ;;  %v3830_v49 = vld [vmem:[%s5072_s7] ss:$0 sm:$0xff] }
 0x429   :  { %v3006_v54 = vmul.f32 0.0078125, %v3003_v43 }
 0x42a   :  { %v2986_v35 = vmax.f32 %v2978_v23, 0.0  ;;  %v2988_v40 = vmax.f32 %v2980_v4, 0.0  ;;  %v2985_v34 = vmax.f32 %v2977_v5, 0.0  ;;  %v2987_v37 = vmax.f32 %v2979_v24, 0.0  ;;  %v3868_v4 = vld [vmem:[#allocation2] ss:$0 sm:$0xff] }
 0x42b   :  { %v3008_v51 = vadd.f32 1e-05, %v3006_v54 }
 0x42c   :  { %v3033_v10 = vpack.c.bf16 %v2986_v35, %v2982_v6  ;;  %v3035_v11 = vpack.c.bf16 %v2988_v40, %v2984_v7  ;;  %v3032_v12 = vpack.c.bf16 %v2985_v34, %v2981_v8  ;;  %v3034_v13 = vpack.c.bf16 %v2987_v37, %v2983_v9  ;;  %v3865_v9 = vld [vmem:[%s5076_s11] ss:$0 sm:$0xff] }
 0x42d   :  { %4558 = vrsqrt.f32 %v3008_v51 }
 0x42e   :  { %3331 = vmatprep.mubr.bf16.mxu0 %v3033_v10  ;;  %3372 = vmatprep.mubr.bf16.mxu1 %v3035_v11  ;;  %v3866_v11 = vld [vmem:[%s5077_s12] ss:$0 sm:$0xff] }
 0x42f   :  { %3332 = vmatmul.mubr.bf16.vlgmr.msra.gmra.mrb[12].mxu0 %v3032_v12  ;;  %3373 = vmatmul.mubr.bf16.vlgmr.msra.gmra.mrb[12].mxu1 %v3034_v13 }
 0x437   :  { %v4559_v46 = vpop.eup %4558 }
 0x438   :  { %v3012_v48 = vmul.f32 %v4559_v46, %v4930_v59 }
 0x43a   :  { %v3020_v55 = vmul.f32 %v3830_v49, %v3012_v48 }
 0x43c   :  { %v3028_v58 = vadd.f32 %v3831_v56, %v3020_v55 }
 0x4ac   :  { %v3005_v50 = vpop.xlane.xlu1 %3004 }
 0x4ad   :  { %v3007_v44 = vmul.f32 0.0078125, %v3005_v50 }
 0x4af   :  { %v3009_v45 = vadd.f32 1e-05, %v3007_v44 }
 0x4b1   :  { %4560 = vrsqrt.f32 %v3009_v45 }
 0x4b2   :  { %4562 = vtanh.f32 %v3028_v58 }
 0x4bb   :  { %v4561_v47 = vpop.eup %4560 }
 0x4bc   :  { %v3013_v53 = vmul.f32 %v4561_v47, %v5001_v36  ;;  %v4563_v26 = vpop.eup %4562  ;;  %v3867_v36 = vld [vmem:[%s5078_s13] ss:$0 sm:$0xff] }
 0x4bd   :  { %v3430_v27 = vmul.f32 %v4563_v26, %v3867_v36 }
 0x4be   :  { %v3021_v57 = vmul.f32 %v3830_v49, %v3013_v53 }
 0x4c0   :  { %v3029_v60 = vadd.f32 %v3831_v56, %v3021_v57 }
 0x4c2   :  { %4564 = vtanh.f32 %v3029_v60 }
 0x4cc   :  { %v4565_v0 = vpop.eup %4564 }
 0x4cd   :  { %v3431_v1 = vmul.f32 %v4565_v0, %v3867_v36 }
 0x502   :  { %v3933_v52 = vpop.f32.mrb[12].mxu0  ;;  %v3955_v14 = vpop.f32.mrb[12].mxu1 }
 0x503   :  { %v3934_v15 = vpop.f32.mrb[13].mxu0  ;;  %v3956_v16 = vpop.f32.mrb[13].mxu1 }
 0x504   :  { %v3935_v17 = vadd.f32 %v3934_v15, %v3933_v52  ;;  %v3957_v18 = vadd.f32 %v3956_v16, %v3955_v14  ;;  %v3936_v19 = vpop.f32.mrb[14].mxu0  ;;  %v3958_v28 = vpop.f32.mrb[14].mxu1 }
 0x505   :  { %v3937_v30 = vpop.f32.mrb[15].mxu0  ;;  %v3959_v31 = vpop.f32.mrb[15].mxu1 }
 0x506   :  { %v3334_v32 = vadd.f32 %v3935_v17, %v3832_v22  ;;  %v3938_v33 = vadd.f32 %v3937_v30, %v3936_v19  ;;  %v3960_v38 = vadd.f32 %v3959_v31, %v3958_v28 }
 0x508   :  { %v3337_v39 = vadd.f32 %v3938_v33, %v3832_v22  ;;  %v3375_v41 = vadd.f32 %v3957_v18, %v3334_v32 }
 0x50a   :  { %3383 = vadd.xlane.f32.xlu0 %v3375_v41  ;;  %v3378_v42 = vadd.f32 %v3960_v38, %v3337_v39 }
 0x50c   :  { %3385 = vadd.xlane.f32.xlu1 %v3378_v42 }
 0x597   :  { %v3384_v61 = vpop.xlane.xlu0 %3383 }
 0x598   :  { %v3387_v21 = vmul.f32 0.0078125, %v3384_v61 }
 0x599   :  { %v3386_v29 = vpop.xlane.xlu1 %3385 }
 0x59a   :  { %v3389_v59 = vsub.f32 %v3375_v41, %v3387_v21  ;;  %v3388_v20 = vmul.f32 0.0078125, %v3386_v29 }
 0x59c   :  { %v3390_v25 = vsub.f32 %v3378_v42, %v3388_v20  ;;  %v3391_v62 = vmul.f32 %v3389_v59, %v3389_v59 }
 0x59e   :  { %3393 = vadd.xlane.f32.xlu0 %v3391_v62  ;;  %v3392_v63 = vmul.f32 %v3390_v25, %v3390_v25 }
 0x5a0   :  { %3395 = vadd.xlane.f32.xlu1 %v3392_v63 }
 0x5a2   :  { %3432 = vadd.xlane.f32.xlu0 %v3430_v27 }
 0x5a4   :  { %3434 = vadd.xlane.f32.xlu1 %v3431_v1 }
 0x62b   :  { %v3394_v2 = vpop.xlane.xlu0 %3393 }
 0x62c   :  { %v3397_v3 = vmul.f32 0.0078125, %v3394_v2 }
 0x62d   :  { %v3396_v23 = vpop.xlane.xlu1 %3395 }
 0x62e   :  { %v3399_v5 = vadd.f32 1e-05, %v3397_v3  ;;  %v3398_v24 = vmul.f32 0.0078125, %v3396_v23 }
 0x62f   :  { %v3433_v6 = vpop.xlane.xlu0 %3432 }
 0x630   :  { %4566 = vrsqrt.f32 %v3399_v5  ;;  %v3400_v35 = vadd.f32 1e-05, %v3398_v24  ;;  %v3443_v7 = vadd.f32 %v3868_v4, %v3433_v6 }
 0x631   :  { %v3435_v40 = vpop.xlane.xlu1 %3434 }
 0x632   :  { %4568 = vrsqrt.f32 %v3400_v35  ;;  %3446 = vst.msk [vmem:[%s5082_s17] sm:$0xff] %vm3445_vm0, %v3443_v7  ;;  %v3444_v8 = vadd.f32 %v3868_v4, %v3435_v40 }
 0x634   :  { %3447 = vst.msk [vmem:[%s5082_s17 + $0x8] sm:$0xff] %vm3445_vm0, %v3444_v8  ;;  %s4614_s17 = scalar_lea.vmem %s3456_s15, 256 }
 0x635   :  { %p4615_p2 = scmp.ne.s32.totalorder %s3456_s15, %s4614_s17  ;;  %p4620_p4 = scmp.lt.s32.totalorder %s4614_s17, %s4614_s17 }
 0x637   :  { %p4621_p5 = por %p4620_p4, %p4619_p3 }
 0x639   :  { %p4622_p6 = pnand %p4621_p5, %p4615_p2 }
 0x63a   :  { %v4567_v34 = vpop.eup %4566 }
 0x63b   :  { %v3403_v37 = vmul.f32 %v4567_v34, %v3389_v59 }
 0x63c   :  { %v4569_v10 = vpop.eup %4568 }
 0x63d   :  { %v3404_v12 = vmul.f32 %v4569_v10, %v3390_v25  ;;  %v3411_v13 = vmul.f32 %v3865_v9, %v3403_v37 }
 0x63f   :  { %v3412_v52 = vmul.f32 %v3865_v9, %v3404_v12  ;;  %v3419_v14 = vadd.f32 %v3866_v11, %v3411_v13 }
 0x641   :  { %v3420_v22 = vadd.f32 %v3866_v11, %v3412_v52  ;;  %3421 = vst [vmem:[#allocation8] sm:$0xff] %v3419_v14 }
 0x643   :  { %3422 = vst [vmem:[#allocation8 + $0x8] sm:$0xff] %v3420_v22 }
 0x644   :  { %4625 = shalt.err (!%p4622_p6)
}
 0x645   :  { %s4626_s12 = scalar_lea.hbm %s5081_s16, 256 }
 0x646   :  { %p4627_p7 = scmp.ne.s32.totalorder %s5081_s16, %s4626_s12  ;;  %p4630_p8 = scmp.lt.u32.totalorder %s4626_s12, %s5081_s16 }
 0x648   :  { %p4632_p9 = pnand %p4630_p8, %p4627_p7 }
 0x64a   :  { %4635 = shalt.err (!%p4632_p9)
}
 0x64b   :  { %s4649_s28 = smov 128   ;;  %s4650_s29 = smov 8  }
 0x64c   :  { %3461 = dma.vmem_to_hbm [thread:$0]  %s3456_s15, 256, %s5081_s16, [#allocation5], %s4649_s28, %s4649_s28, %s4650_s29  }
 0x64d   :  { %4640 = dma.done.wait [#allocation5], 256  }
 0x64e   :  { %4641 = vsyncadd [#allocation5], 4294967040 }
 0x64f   :  { %3471 = vsyncpa [#allocation4], 1 }
 0x650   :  { %3472 = vsyncpa [#allocation7], 1 }
 0x651   :  { %3473 = vsyncpa [#allocation5], 1 }

</bundles_post_ra>
